<compile_context>
chip_gen: v7x
topology: tpu7x:2x2x1
jax: 0.10.0
libtpu: 0.0.40
codegen_flags: <defaults>
</compile_context>

<pallas_src>
import functools

import jax
import jax.numpy as jnp
from jax.experimental import pallas as pl
from jax.experimental.pallas import tpu as pltpu

NEG_SLOPE = 0.01  # PyTorch LeakyReLU default


def _round_up(n, m):
    return (n + m - 1) // m * m


def _leaky_relu(h):
    return jnp.where(h >= 0, h, NEG_SLOPE * h)


def mlp_kernel(x_ref,
               w1_ref, b1_ref,
               w2_ref, b2_ref,
               w3_ref, b3_ref,
               w4_ref, b4_ref,
               w5_ref, b5_ref,
               o_ref):
    """Whole MLP for one batch tile, feature-major layout (features x batch).

    x_ref : (in_pad,  block_b)   compute dtype (bf16 or f32)
    wN_ref: (out, in)            compute dtype (PyTorch layout, zero-padded)
    bN_ref: (out, 1)             f32
    w5_ref: (64, 1) f32, b5_ref: (1, 1) f32
    o_ref : (1, block_b)         f32 (lane-dense)
    """
    # Layer 1: (hid1_pad, in_pad) @ (in_pad, block_b) -> (hid1_pad, block_b)
    h = jnp.dot(w1_ref[...], x_ref[...],
                preferred_element_type=jnp.float32) + b1_ref[...]
    h = _leaky_relu(h)

    # Layer 2: 1152 -> 512
    h = jnp.dot(w2_ref[...], h.astype(w2_ref.dtype),
                preferred_element_type=jnp.float32) + b2_ref[...]
    h = _leaky_relu(h)

    # Layer 3: 512 -> 128
    h = jnp.dot(w3_ref[...], h.astype(w3_ref.dtype),
                preferred_element_type=jnp.float32) + b3_ref[...]
    h = _leaky_relu(h)

    # Layer 4: 128 -> 64
    h = jnp.dot(w4_ref[...], h.astype(w4_ref.dtype),
                preferred_element_type=jnp.float32) + b4_ref[...]
    h = _leaky_relu(h)                                   # (64, block_b) f32

    # Layer 5 (64 -> 1): VPU multiply + sublane reduction, fused with sigmoid.
    logits = jnp.sum(h * w5_ref[...], axis=0, keepdims=True) + b5_ref[...]
    o_ref[...] = (1.0 / (1.0 + jnp.exp(-logits))).astype(o_ref.dtype)


@functools.partial(jax.jit, static_argnames=("block_b", "use_bf16"))
def deep_nn_forward(x, params, *, block_b=256, use_bf16=True):
    """x: (B, in_features) float32.  params: list of (W, b) in PyTorch layout
    (W: (out, in), b: (out,)).  Returns (B, 1) float32."""
    B, in_features = x.shape
    compute_dtype = jnp.bfloat16 if use_bf16 else jnp.float32

    (w1, b1), (w2, b2), (w3, b3), (w4, b4), (w5, b5) = params
    hid1 = w1.shape[0]                       # 1028

    # ---- exact zero padding for alignment ----
    in_pad = _round_up(in_features, 16)      # clean bf16 sublane packing
    hid1_pad = _round_up(hid1, 128)          # 1028 -> 1152
    # Shrink the batch tile for small batches; keep it a multiple of 128.
    block_b = min(block_b, _round_up(B, 128))
    B_pad = _round_up(B, block_b)
    num_blocks = B_pad // block_b

    w1p = jnp.zeros((hid1_pad, in_pad), jnp.float32).at[:hid1, :in_features].set(w1)
    b1p = jnp.zeros((hid1_pad,), jnp.float32).at[:hid1].set(b1)
    w2p = jnp.zeros((w2.shape[0], hid1_pad), jnp.float32).at[:, :hid1].set(w2)

    # Feature-major (transposed) input so the batch sits on the lane axis.
    xt = jnp.zeros((in_pad, B_pad), jnp.float32).at[:in_features, :B].set(x.T)
    xt = xt.astype(compute_dtype)

    # Weights in compute dtype (bf16 MXU operands); biases stay f32 as columns.
    flat = []
    for w, b in ((w1p, b1p), (w2p, b2), (w3, b3), (w4, b4)):
        flat.append(w.astype(compute_dtype))                 # (out, in)
        flat.append(b.reshape(-1, 1).astype(jnp.float32))    # (out, 1)
    flat.append(w5.reshape(-1, 1).astype(jnp.float32))       # (64, 1)
    flat.append(b5.reshape(1, 1).astype(jnp.float32))        # (1, 1)

    def full_spec(a):
        return pl.BlockSpec(a.shape, lambda i: (0, 0))       # resident constants

    in_specs = [pl.BlockSpec((in_pad, block_b), lambda i: (0, i))]
    in_specs += [full_spec(a) for a in flat]
    out_spec = pl.BlockSpec((1, block_b), lambda i: (0, i))   # lane-dense output

    out = pl.pallas_call(
        mlp_kernel,
        out_shape=jax.ShapeDtypeStruct((1, B_pad), jnp.float32),
        grid_spec=pltpu.PrefetchScalarGridSpec(
            num_scalar_prefetch=0,
            grid=(num_blocks,),
            in_specs=in_specs,
            out_specs=out_spec,
        ),
        compiler_params=pltpu.CompilerParams(
            dimension_semantics=("parallel",),
        ),
    )(xt, *flat)

    return out[0, :B].reshape(B, 1)


def init_params(key, in_features):
    """Deterministic PyTorch-style init: U(-1/sqrt(fan_in), 1/sqrt(fan_in))."""
    dims = [in_features, 1028, 512, 128, 64, 1]
    params = []
    for fan_in, fan_out in zip(dims[:-1], dims[1:]):
        key, kw, kb = jax.random.split(key, 3)
        bound = 1.0 / jnp.sqrt(float(fan_in))
        w = jax.random.uniform(kw, (fan_out, fan_in), jnp.float32, -bound, bound)
        b = jax.random.uniform(kb, (fan_out,), jnp.float32, -bound, bound)
        params.append((w, b))
    return params


def reference_forward(x, params, *, matmul_dtype=jnp.float32):
    """Pure-JAX reference of the PyTorch module. `matmul_dtype` lets us match
    the kernel's bf16-operand / f32-accumulate precision for tight checks."""
    h = x
    n = len(params)
    for i, (w, b) in enumerate(params):
        if i < n - 1:
            h = jnp.dot(h.astype(matmul_dtype), w.T.astype(matmul_dtype),
                        preferred_element_type=jnp.float32) + b
            h = jnp.where(h >= 0, h, NEG_SLOPE * h)
        else:
            h = jnp.dot(h.astype(jnp.float32), w.T.astype(jnp.float32),
                        preferred_element_type=jnp.float32) + b
    return 1.0 / (1.0 + jnp.exp(-h))


if __name__ == "__main__":
    key = jax.random.PRNGKey(0)
    in_features = 16   # adult-dataset-like small feature count
    batch = 16

    kx, kp = jax.random.split(key)
    x = jax.random.normal(kx, (batch, in_features), dtype=jnp.float32)
    params = init_params(kp, in_features)

    out = deep_nn_forward(x, params)          # bf16 MXU operands, f32 accum
    out = jax.block_until_ready(out)
    assert out.shape == (batch, 1)

    # Check vs. precision-matched reference (bf16 operands, f32 accum).
    ref_matched = reference_forward(x, params, matmul_dtype=jnp.bfloat16)
    err_m = float(jnp.max(jnp.abs(out - ref_matched)))
    assert err_m < 2e-3, f"matched-precision max abs err {err_m}"

    # Loose sanity check vs. the full-f32 PyTorch-equivalent reference.
    ref_f32 = reference_forward(x, params, matmul_dtype=jnp.float32)
    err_f = float(jnp.max(jnp.abs(out - ref_f32)))
    assert err_f < 3e-2, f"f32-reference max abs err {err_f}"

    print("KERNEL_OK")
</pallas_src>

<mosaic_0001>
module attributes {stable_mosaic.version = 11 : i64} {
  func.func @mlp_kernel(%arg0: i32, %arg1: memref<16x128xbf16, #tpu.memory_space<vmem>>, %arg2: memref<1152x16xbf16, #tpu.memory_space<vmem>>, %arg3: memref<1152x1xf32, #tpu.memory_space<vmem>>, %arg4: memref<512x1152xbf16, #tpu.memory_space<vmem>>, %arg5: memref<512x1xf32, #tpu.memory_space<vmem>>, %arg6: memref<128x512xbf16, #tpu.memory_space<vmem>>, %arg7: memref<128x1xf32, #tpu.memory_space<vmem>>, %arg8: memref<64x128xbf16, #tpu.memory_space<vmem>>, %arg9: memref<64x1xf32, #tpu.memory_space<vmem>>, %arg10: memref<64x1xf32, #tpu.memory_space<vmem>>, %arg11: memref<1x1xf32, #tpu.memory_space<vmem>>, %arg12: memref<1x128xf32, #tpu.memory_space<vmem>>) attributes {dimension_semantics = [#tpu.dimension_semantics<parallel>], iteration_bounds = array<i64: 1>, scalar_prefetch = 0 : i64, scratch_operands = 0 : i64, tpu.core_type = #tpu.core_type<tc>, window_params = [{transform_indices = @transform_0, window_bounds = array<i64: 16, 128>}, {pipeline_mode = #tpu.pipeline_mode<synchronous>, transform_indices = @transform_1, window_bounds = array<i64: 1152, 16>}, {pipeline_mode = #tpu.pipeline_mode<synchronous>, transform_indices = @transform_2, window_bounds = array<i64: 1152, 1>}, {pipeline_mode = #tpu.pipeline_mode<synchronous>, transform_indices = @transform_3, window_bounds = array<i64: 512, 1152>}, {pipeline_mode = #tpu.pipeline_mode<synchronous>, transform_indices = @transform_4, window_bounds = array<i64: 512, 1>}, {pipeline_mode = #tpu.pipeline_mode<synchronous>, transform_indices = @transform_5, window_bounds = array<i64: 128, 512>}, {pipeline_mode = #tpu.pipeline_mode<synchronous>, transform_indices = @transform_6, window_bounds = array<i64: 128, 1>}, {pipeline_mode = #tpu.pipeline_mode<synchronous>, transform_indices = @transform_7, window_bounds = array<i64: 64, 128>}, {pipeline_mode = #tpu.pipeline_mode<synchronous>, transform_indices = @transform_8, window_bounds = array<i64: 64, 1>}, {pipeline_mode = #tpu.pipeline_mode<synchronous>, transform_indices = @transform_9, window_bounds = array<i64: 64, 1>}, {pipeline_mode = #tpu.pipeline_mode<synchronous>, transform_indices = @transform_10, window_bounds = array<i64: 1, 1>}, {transform_indices = @transform_11, window_bounds = array<i64: 1, 128>}]} {
    %c0 = arith.constant 0 : index
    %c0_0 = arith.constant 0 : index
    %0 = vector.load %arg2[%c0, %c0_0] : memref<1152x16xbf16, #tpu.memory_space<vmem>>, vector<1152x16xbf16>
    %c0_1 = arith.constant 0 : index
    %c0_2 = arith.constant 0 : index
    %1 = vector.load %arg1[%c0_1, %c0_2] : memref<16x128xbf16, #tpu.memory_space<vmem>>, vector<16x128xbf16>
    %cst = arith.constant dense<0.000000e+00> : vector<1152x128xf32>
    %2 = tpu.matmul %0, %1, %cst {dimension_numbers = #tpu.dot_dimension_numbers<[1], [0], [0], [1], [0, 0, 1, 1], [], []>} : vector<1152x16xbf16>, vector<16x128xbf16>, vector<1152x128xf32> -> vector<1152x128xf32>
    %c0_3 = arith.constant 0 : index
    %c0_4 = arith.constant 0 : index
    %3 = vector.load %arg3[%c0_3, %c0_4] : memref<1152x1xf32, #tpu.memory_space<vmem>>, vector<1152x1xf32>
    %4 = vector.broadcast %3 : vector<1152x1xf32> to vector<1152x128xf32>
    %5 = arith.addf %2, %4 : vector<1152x128xf32>
    %cst_5 = arith.constant 0.000000e+00 : f32
    %6 = vector.broadcast %cst_5 : f32 to vector<1152x128xf32>
    %7 = arith.cmpf oge, %5, %6 : vector<1152x128xf32>
    %cst_6 = arith.constant 0.00999999977 : f32
    %8 = vector.broadcast %cst_6 : f32 to vector<1152x128xf32>
    %9 = arith.mulf %8, %5 : vector<1152x128xf32>
    %10 = arith.select %7, %5, %9 : vector<1152x128xi1>, vector<1152x128xf32>
    %c0_7 = arith.constant 0 : index
    %c0_8 = arith.constant 0 : index
    %11 = vector.load %arg4[%c0_7, %c0_8] : memref<512x1152xbf16, #tpu.memory_space<vmem>>, vector<512x1152xbf16>
    %12 = arith.truncf %10 : vector<1152x128xf32> to vector<1152x128xbf16>
    %cst_9 = arith.constant dense<0.000000e+00> : vector<512x128xf32>
    %13 = tpu.matmul %11, %12, %cst_9 {dimension_numbers = #tpu.dot_dimension_numbers<[1], [0], [0], [1], [0, 0, 1, 1], [], []>} : vector<512x1152xbf16>, vector<1152x128xbf16>, vector<512x128xf32> -> vector<512x128xf32>
    %c0_10 = arith.constant 0 : index
    %c0_11 = arith.constant 0 : index
    %14 = vector.load %arg5[%c0_10, %c0_11] : memref<512x1xf32, #tpu.memory_space<vmem>>, vector<512x1xf32>
    %15 = vector.broadcast %14 : vector<512x1xf32> to vector<512x128xf32>
    %16 = arith.addf %13, %15 : vector<512x128xf32>
    %cst_12 = arith.constant 0.000000e+00 : f32
    %17 = vector.broadcast %cst_12 : f32 to vector<512x128xf32>
    %18 = arith.cmpf oge, %16, %17 : vector<512x128xf32>
    %cst_13 = arith.constant 0.00999999977 : f32
    %19 = vector.broadcast %cst_13 : f32 to vector<512x128xf32>
    %20 = arith.mulf %19, %16 : vector<512x128xf32>
    %21 = arith.select %18, %16, %20 : vector<512x128xi1>, vector<512x128xf32>
    %c0_14 = arith.constant 0 : index
    %c0_15 = arith.constant 0 : index
    %22 = vector.load %arg6[%c0_14, %c0_15] : memref<128x512xbf16, #tpu.memory_space<vmem>>, vector<128x512xbf16>
    %23 = arith.truncf %21 : vector<512x128xf32> to vector<512x128xbf16>
    %cst_16 = arith.constant dense<0.000000e+00> : vector<128x128xf32>
    %24 = tpu.matmul %22, %23, %cst_16 {dimension_numbers = #tpu.dot_dimension_numbers<[1], [0], [0], [1], [0, 0, 1, 1], [], []>} : vector<128x512xbf16>, vector<512x128xbf16>, vector<128x128xf32> -> vector<128x128xf32>
    %c0_17 = arith.constant 0 : index
    %c0_18 = arith.constant 0 : index
    %25 = vector.load %arg7[%c0_17, %c0_18] : memref<128x1xf32, #tpu.memory_space<vmem>>, vector<128x1xf32>
    %26 = vector.broadcast %25 : vector<128x1xf32> to vector<128x128xf32>
    %27 = arith.addf %24, %26 : vector<128x128xf32>
    %cst_19 = arith.constant 0.000000e+00 : f32
    %28 = vector.broadcast %cst_19 : f32 to vector<128x128xf32>
    %29 = arith.cmpf oge, %27, %28 : vector<128x128xf32>
    %cst_20 = arith.constant 0.00999999977 : f32
    %30 = vector.broadcast %cst_20 : f32 to vector<128x128xf32>
    %31 = arith.mulf %30, %27 : vector<128x128xf32>
    %32 = arith.select %29, %27, %31 : vector<128x128xi1>, vector<128x128xf32>
    %c0_21 = arith.constant 0 : index
    %c0_22 = arith.constant 0 : index
    %33 = vector.load %arg8[%c0_21, %c0_22] : memref<64x128xbf16, #tpu.memory_space<vmem>>, vector<64x128xbf16>
    %34 = arith.truncf %32 : vector<128x128xf32> to vector<128x128xbf16>
    %cst_23 = arith.constant dense<0.000000e+00> : vector<64x128xf32>
    %35 = tpu.matmul %33, %34, %cst_23 {dimension_numbers = #tpu.dot_dimension_numbers<[1], [0], [0], [1], [0, 0, 1, 1], [], []>} : vector<64x128xbf16>, vector<128x128xbf16>, vector<64x128xf32> -> vector<64x128xf32>
    %c0_24 = arith.constant 0 : index
    %c0_25 = arith.constant 0 : index
    %36 = vector.load %arg9[%c0_24, %c0_25] : memref<64x1xf32, #tpu.memory_space<vmem>>, vector<64x1xf32>
    %37 = vector.broadcast %36 : vector<64x1xf32> to vector<64x128xf32>
    %38 = arith.addf %35, %37 : vector<64x128xf32>
    %cst_26 = arith.constant 0.000000e+00 : f32
    %39 = vector.broadcast %cst_26 : f32 to vector<64x128xf32>
    %40 = arith.cmpf oge, %38, %39 : vector<64x128xf32>
    %cst_27 = arith.constant 0.00999999977 : f32
    %41 = vector.broadcast %cst_27 : f32 to vector<64x128xf32>
    %42 = arith.mulf %41, %38 : vector<64x128xf32>
    %43 = arith.select %40, %38, %42 : vector<64x128xi1>, vector<64x128xf32>
    %c0_28 = arith.constant 0 : index
    %c0_29 = arith.constant 0 : index
    %44 = vector.load %arg10[%c0_28, %c0_29] : memref<64x1xf32, #tpu.memory_space<vmem>>, vector<64x1xf32>
    %45 = vector.broadcast %44 : vector<64x1xf32> to vector<64x128xf32>
    %46 = arith.mulf %43, %45 : vector<64x128xf32>
    %cst_30 = arith.constant dense<0.000000e+00> : vector<128xf32>
    %47 = vector.multi_reduction <add>, %46, %cst_30 [0] : vector<64x128xf32> to vector<128xf32>
    %48 = vector.shape_cast %47 : vector<128xf32> to vector<1x128xf32>
    %c0_31 = arith.constant 0 : index
    %c0_32 = arith.constant 0 : index
    %49 = vector.load %arg11[%c0_31, %c0_32] : memref<1x1xf32, #tpu.memory_space<vmem>>, vector<1x1xf32>
    %50 = vector.broadcast %49 : vector<1x1xf32> to vector<1x128xf32>
    %51 = arith.addf %48, %50 : vector<1x128xf32>
    %cst_33 = arith.constant 0.000000e+00 : f32
    %52 = vector.broadcast %cst_33 : f32 to vector<1x128xf32>
    %53 = arith.subf %52, %51 : vector<1x128xf32>
    %54 = math.exp %53 : vector<1x128xf32>
    %cst_34 = arith.constant 1.000000e+00 : f32
    %55 = vector.broadcast %cst_34 : f32 to vector<1x128xf32>
    %56 = arith.addf %55, %54 : vector<1x128xf32>
    %cst_35 = arith.constant 1.000000e+00 : f32
    %57 = vector.broadcast %cst_35 : f32 to vector<1x128xf32>
    %58 = arith.divf %57, %56 : vector<1x128xf32>
    %c0_36 = arith.constant 0 : index
    %c0_37 = arith.constant 0 : index
    %59 = vector.load %arg12[%c0_36, %c0_37] : memref<1x128xf32, #tpu.memory_space<vmem>>, vector<1x128xf32>
    tpu.vector_store %arg12[%c0_36, %c0_37], %58 {strides = array<i32>} : memref<1x128xf32, #tpu.memory_space<vmem>>, vector<1x128xf32>,
    return
  }
  func.func @transform_0(%arg0: i32) -> (i32, i32) {
    %c0_i32 = arith.constant 0 : i32
    %c0_i32_0 = arith.constant 0 : i32
    return %c0_i32, %arg0 : i32, i32
  }
  func.func @transform_1(%arg0: i32) -> (i32, i32) {
    %c0_i32 = arith.constant 0 : i32
    %c0_i32_0 = arith.constant 0 : i32
    %c0_i32_1 = arith.constant 0 : i32
    return %c0_i32, %c0_i32_0 : i32, i32
  }
  func.func @transform_2(%arg0: i32) -> (i32, i32) {
    %c0_i32 = arith.constant 0 : i32
    %c0_i32_0 = arith.constant 0 : i32
    %c0_i32_1 = arith.constant 0 : i32
    return %c0_i32, %c0_i32_0 : i32, i32
  }
  func.func @transform_3(%arg0: i32) -> (i32, i32) {
    %c0_i32 = arith.constant 0 : i32
    %c0_i32_0 = arith.constant 0 : i32
    %c0_i32_1 = arith.constant 0 : i32
    return %c0_i32, %c0_i32_0 : i32, i32
  }
  func.func @transform_4(%arg0: i32) -> (i32, i32) {
    %c0_i32 = arith.constant 0 : i32
    %c0_i32_0 = arith.constant 0 : i32
    %c0_i32_1 = arith.constant 0 : i32
    return %c0_i32, %c0_i32_0 : i32, i32
  }
  func.func @transform_5(%arg0: i32) -> (i32, i32) {
    %c0_i32 = arith.constant 0 : i32
    %c0_i32_0 = arith.constant 0 : i32
    %c0_i32_1 = arith.constant 0 : i32
    return %c0_i32, %c0_i32_0 : i32, i32
  }
  func.func @transform_6(%arg0: i32) -> (i32, i32) {
    %c0_i32 = arith.constant 0 : i32
    %c0_i32_0 = arith.constant 0 : i32
    %c0_i32_1 = arith.constant 0 : i32
    return %c0_i32, %c0_i32_0 : i32, i32
  }
  func.func @transform_7(%arg0: i32) -> (i32, i32) {
    %c0_i32 = arith.constant 0 : i32
    %c0_i32_0 = arith.constant 0 : i32
    %c0_i32_1 = arith.constant 0 : i32
    return %c0_i32, %c0_i32_0 : i32, i32
  }
  func.func @transform_8(%arg0: i32) -> (i32, i32) {
    %c0_i32 = arith.constant 0 : i32
    %c0_i32_0 = arith.constant 0 : i32
    %c0_i32_1 = arith.constant 0 : i32
    return %c0_i32, %c0_i32_0 : i32, i32
  }
  func.func @transform_9(%arg0: i32) -> (i32, i32) {
    %c0_i32 = arith.constant 0 : i32
    %c0_i32_0 = arith.constant 0 : i32
    %c0_i32_1 = arith.constant 0 : i32
    return %c0_i32, %c0_i32_0 : i32, i32
  }
  func.func @transform_10(%arg0: i32) -> (i32, i32) {
    %c0_i32 = arith.constant 0 : i32
    %c0_i32_0 = arith.constant 0 : i32
    %c0_i32_1 = arith.constant 0 : i32
    return %c0_i32, %c0_i32_0 : i32, i32
  }
  func.func @transform_11(%arg0: i32) -> (i32, i32) {
    %c0_i32 = arith.constant 0 : i32
    %c0_i32_0 = arith.constant 0 : i32
    return %c0_i32, %arg0 : i32, i32
  }
}

</mosaic_0001>

<bundles_post_ra>
// kernel: deep_nn_forward.1
= control target key start
LH: loop header
LB: loop body
LE: loop exit
PB: predicated region body
PF: predicated region fallthrough
CT: control target
= control target key end

     0   :  { %v12967_v0 = vmov 0   ;;  %vm1417_vm0 = vcmask 130048   ;;  %s12955_s2 = inlined_call_operand.vmem [shape: f32[1152,1], index: 2, kind: input, shape index: {}]   ;;  %s12956_s0 = inlined_call_operand.vmem [shape: bf16[16,128], index: 0, kind: input, shape index: {}]   ;;  %s12957_s1 = inlined_call_operand.vmem [shape: bf16[1152,16], index: 1, kind: input, shape index: {}]   ;;  %s12958_s3 = inlined_call_operand.vmem [shape: bf16[512,1152], index: 3, kind: input, shape index: {}]   ;;  %s12959_s4 = inlined_call_operand.vmem [shape: f32[512,1], index: 4, kind: input, shape index: {}]   ;;  %s12960_s10 = inlined_call_operand.<no memory space> [shape: f32[1,1], index: 10, kind: input, shape index: {}]   ;;  %s12961_s6 = inlined_call_operand.vmem [shape: f32[128,1], index: 6, kind: input, shape index: {}]   ;;  %s12962_s8 = inlined_call_operand.vmem [shape: f32[64,1], index: 8, kind: input, shape index: {}]   ;;  %s12963_s9 = inlined_call_operand.vmem [shape: f32[64,1], index: 9, kind: input, shape index: {}]   ;;  %s12964_s5 = inlined_call_operand.vmem [shape: bf16[128,512], index: 5, kind: input, shape index: {}]   ;;  %s12965_s7 = inlined_call_operand.vmem [shape: bf16[64,128], index: 7, kind: input, shape index: {}]   ;;  %s12966_s11 = inlined_call_operand.vmem [shape: f32[1,128], index: 11, kind: output, shape index: {}]  }
   0x1   :  { %8748 = vset.pattern.permute.xlu1 %v12967_v0  ;;  %8747 = vset.pattern.permute.xlu0 %v12967_v0  ;;  %v221_v1 = vld [vmem:[%s12955_s2 + $0x110] sm:$0xff]  ;;  %v219_v2 = vld [vmem:[%s12955_s2 + $0x100] sm:$0xff]  ;;  %v222_v4 = vld [vmem:[%s12955_s2 + $0x118] sm:$0xff] }
   0x2   :  { %503 = vperm.xlu1 %8748, %v221_v1   ;;  %493 = vperm.xlu0 %8747, %v219_v2   ;;  %v8749_v3 = vld [vmem:[%s12956_s0] sm:$0xff]   ;;  %v220_v5 = vld [vmem:[%s12955_s2 + $0x108] sm:$0xff]  ;;  %v8752_v10 = vld [vmem:[%s12957_s1 + $0x10] sm:$0xff]  }
   0x3   :  { %5212 = vmatprep.subr.bf16.mxu1 %v12967_v0  ;;  %8112 = vmatprep.subr.bf16.mxu0 %v8749_v3  ;;  %v8750_v6 = vld [vmem:[%s12957_s1] sm:$0xff]   ;;  %v8751_v7 = vld [vmem:[%s12957_s1 + $0x8] sm:$0xff]   ;;  %v226_v11 = vld [vmem:[%s12955_s2 + $0x138] sm:$0xff] }
   0x4   :  { %8113 = vmatpush3.bf16.msra.mxu0 %v8749_v3  ;;  %v224_v8 = vld [vmem:[%s12955_s2 + $0x128] sm:$0xff]  ;;  %v223_v9 = vld [vmem:[%s12955_s2 + $0x120] sm:$0xff]  ;;  %8114 = vmatprep.mubr.msk.bf16.mxu0 %vm1417_vm0, %v8750_v6  ;;  %v225_v12 = vld [vmem:[%s12955_s2 + $0x130] sm:$0xff] }
   0x5   :  { %4923 = vmatprep.subr.bf16.mxu0 %v12967_v0  ;;  %v8753_v13 = vld [vmem:[%s12957_s1 + $0x18] sm:$0xff]   ;;  %v8754_v14 = vld [vmem:[%s12957_s1 + $0x20] sm:$0xff]   ;;  %v228_v15 = vld [vmem:[%s12955_s2 + $0x148] sm:$0xff] }
   0x6   :  { %508 = vperm.xlu1 %8748, %v222_v4   ;;  %498 = vperm.xlu0 %8747, %v220_v5   ;;  %v227_v16 = vld [vmem:[%s12955_s2 + $0x140] sm:$0xff]  ;;  %v230_v17 = vld [vmem:[%s12955_s2 + $0x158] sm:$0xff]  ;;  %v229_v18 = vld [vmem:[%s12955_s2 + $0x150] sm:$0xff] }
   0x7   :  { %8115 = vmatmul.mubr.msk.bf16.vlgmr.msra.gmra.mrb[0].mxu0 %vm1417_vm0, %v8751_v7  ;;  %v8755_v19 = vld [vmem:[%s12957_s1 + $0x28] sm:$0xff]   ;;  %v8756_v20 = vld [vmem:[%s12957_s1 + $0x30] sm:$0xff]   ;;  %v231_v22 = vld [vmem:[%s12955_s2 + $0x160] sm:$0xff] }
   0x8   :  { %8118 = vmatprep.mubr.msk.bf16.mxu0 %vm1417_vm0, %v8752_v10  ;;  %v232_v21 = vld [vmem:[%s12955_s2 + $0x168] sm:$0xff]  ;;  %v234_v23 = vld [vmem:[%s12955_s2 + $0x178] sm:$0xff]  ;;  %v233_v24 = vld [vmem:[%s12955_s2 + $0x170] sm:$0xff] }
   0x9   :  { %v8757_v25 = vld [vmem:[%s12957_s1 + $0x38] sm:$0xff]   ;;  %v8758_v26 = vld [vmem:[%s12957_s1 + $0x40] sm:$0xff]   ;;  %v236_v27 = vld [vmem:[%s12955_s2 + $0x188] sm:$0xff] }
   0xa   :  { %518 = vperm.xlu1 %8748, %v224_v8   ;;  %513 = vperm.xlu0 %8747, %v223_v9   ;;  %v235_v28 = vld [vmem:[%s12955_s2 + $0x180] sm:$0xff]  ;;  %v238_v29 = vld [vmem:[%s12955_s2 + $0x198] sm:$0xff]  ;;  %v237_v30 = vld [vmem:[%s12955_s2 + $0x190] sm:$0xff] }
   0xb   :  { %v8759_v31 = vld [vmem:[%s12957_s1 + $0x48] sm:$0xff]   ;;  %v8760_v32 = vld [vmem:[%s12957_s1 + $0x50] sm:$0xff]   ;;  %v239_v34 = vld [vmem:[%s12955_s2 + $0x1a0] sm:$0xff] }
   0xc   :  { %v240_v33 = vld [vmem:[%s12955_s2 + $0x1a8] sm:$0xff]  ;;  %v242_v35 = vld [vmem:[%s12955_s2 + $0x1b8] sm:$0xff]  ;;  %v241_v36 = vld [vmem:[%s12955_s2 + $0x1b0] sm:$0xff] }
   0xd   :  { %v8761_v37 = vld [vmem:[%s12957_s1 + $0x58] sm:$0xff]   ;;  %v8762_v38 = vld [vmem:[%s12957_s1 + $0x60] sm:$0xff]   ;;  %v244_v39 = vld [vmem:[%s12955_s2 + $0x1c8] sm:$0xff] }
   0xe   :  { %528 = vperm.xlu1 %8748, %v226_v11   ;;  %523 = vperm.xlu0 %8747, %v225_v12   ;;  %v243_v40 = vld [vmem:[%s12955_s2 + $0x1c0] sm:$0xff]  ;;  %v246_v41 = vld [vmem:[%s12955_s2 + $0x1d8] sm:$0xff]  ;;  %v245_v42 = vld [vmem:[%s12955_s2 + $0x1d0] sm:$0xff] }
   0xf   :  { %8119 = vmatmul.mubr.msk.bf16.gmra.mrb[4].mxu0 %vm1417_vm0, %v8753_v13  ;;  %v8763_v43 = vld [vmem:[%s12957_s1 + $0x68] sm:$0xff]   ;;  %v8764_v44 = vld [vmem:[%s12957_s1 + $0x70] sm:$0xff]   ;;  %v247_v46 = vld [vmem:[%s12955_s2 + $0x1e0] sm:$0xff] }
  0x10   :  { %8122 = vmatprep.mubr.msk.bf16.mxu0 %vm1417_vm0, %v8754_v14  ;;  %v248_v45 = vld [vmem:[%s12955_s2 + $0x1e8] sm:$0xff]  ;;  %v250_v47 = vld [vmem:[%s12955_s2 + $0x1f8] sm:$0xff]  ;;  %v249_v48 = vld [vmem:[%s12955_s2 + $0x1f0] sm:$0xff] }
  0x11   :  { %v8765_v49 = vld [vmem:[%s12957_s1 + $0x78] sm:$0xff]   ;;  %v8766_v50 = vld [vmem:[%s12957_s1 + $0x80] sm:$0xff]   ;;  %v252_v51 = vld [vmem:[%s12955_s2 + $0x208] sm:$0xff] }
  0x12   :  { %538 = vperm.xlu1 %8748, %v228_v15   ;;  %533 = vperm.xlu0 %8747, %v227_v16   ;;  %v251_v52 = vld [vmem:[%s12955_s2 + $0x200] sm:$0xff]  ;;  %v254_v53 = vld [vmem:[%s12955_s2 + $0x218] sm:$0xff]  ;;  %v253_v54 = vld [vmem:[%s12955_s2 + $0x210] sm:$0xff] }
  0x13   :  { %v8767_v55 = vld [vmem:[%s12957_s1 + $0x88] sm:$0xff]   ;;  %v8768_v56 = vld [vmem:[%s12957_s1 + $0x90] sm:$0xff]   ;;  %v255_v58 = vld [vmem:[%s12955_s2 + $0x220] sm:$0xff] }
  0x14   :  { %v256_v57 = vld [vmem:[%s12955_s2 + $0x228] sm:$0xff]  ;;  %v258_v59 = vld [vmem:[%s12955_s2 + $0x238] sm:$0xff]  ;;  %v257_v60 = vld [vmem:[%s12955_s2 + $0x230] sm:$0xff] }
  0x15   :  { %v8769_v61 = vld [vmem:[%s12957_s1 + $0x98] sm:$0xff]   ;;  %v8770_v62 = vld [vmem:[%s12957_s1 + $0xa0] sm:$0xff]   ;;  %v260_v63 = vld [vmem:[%s12955_s2 + $0x248] sm:$0xff] }
  0x16   :  { %548 = vperm.xlu1 %8748, %v230_v17   ;;  %543 = vperm.xlu0 %8747, %v229_v18   ;;  %v259_v1 = vld [vmem:[%s12955_s2 + $0x240] sm:$0xff]  ;;  %v262_v2 = vld [vmem:[%s12955_s2 + $0x258] sm:$0xff]  ;;  %v261_v3 = vld [vmem:[%s12955_s2 + $0x250] sm:$0xff] }
  0x17   :  { %8123 = vmatmul.mubr.msk.bf16.gmra.mrb[8].mxu0 %vm1417_vm0, %v8755_v19  ;;  %v8771_v4 = vld [vmem:[%s12957_s1 + $0xa8] sm:$0xff]   ;;  %v8772_v5 = vld [vmem:[%s12957_s1 + $0xb0] sm:$0xff]   ;;  %v263_v7 = vld [vmem:[%s12955_s2 + $0x260] sm:$0xff] }
  0x18   :  { %8126 = vmatprep.mubr.msk.bf16.mxu0 %vm1417_vm0, %v8756_v20  ;;  %v264_v6 = vld [vmem:[%s12955_s2 + $0x268] sm:$0xff]  ;;  %v266_v8 = vld [vmem:[%s12955_s2 + $0x278] sm:$0xff]  ;;  %v265_v9 = vld [vmem:[%s12955_s2 + $0x270] sm:$0xff] }
  0x19   :  { %v8773_v10 = vld [vmem:[%s12957_s1 + $0xb8] sm:$0xff]   ;;  %v8774_v11 = vld [vmem:[%s12957_s1 + $0xc0] sm:$0xff]   ;;  %v268_v12 = vld [vmem:[%s12955_s2 + $0x288] sm:$0xff] }
  0x1a   :  { %558 = vperm.xlu1 %8748, %v232_v21   ;;  %553 = vperm.xlu0 %8747, %v231_v22   ;;  %v267_v13 = vld [vmem:[%s12955_s2 + $0x280] sm:$0xff]  ;;  %v270_v14 = vld [vmem:[%s12955_s2 + $0x298] sm:$0xff]  ;;  %v269_v15 = vld [vmem:[%s12955_s2 + $0x290] sm:$0xff] }
  0x1b   :  { %v8775_v16 = vld [vmem:[%s12957_s1 + $0xc8] sm:$0xff]   ;;  %v8776_v17 = vld [vmem:[%s12957_s1 + $0xd0] sm:$0xff]   ;;  %v271_v19 = vld [vmem:[%s12955_s2 + $0x2a0] sm:$0xff] }
  0x1c   :  { %v272_v18 = vld [vmem:[%s12955_s2 + $0x2a8] sm:$0xff]  ;;  %v274_v20 = vld [vmem:[%s12955_s2 + $0x2b8] sm:$0xff]  ;;  %v273_v21 = vld [vmem:[%s12955_s2 + $0x2b0] sm:$0xff] }
  0x1d   :  { %v8777_v22 = vld [vmem:[%s12957_s1 + $0xd8] sm:$0xff]  }
  0x1e   :  { %568 = vperm.xlu1 %8748, %v234_v23   ;;  %563 = vperm.xlu0 %8747, %v233_v24   ;;  %v8778_v23 = vld [vmem:[%s12957_s1 + $0xe0] sm:$0xff]   ;;  %v276_v24 = vld [vmem:[%s12955_s2 + $0x2c8] sm:$0xff] }
  0x1f   :  { %8127 = vmatmul.mubr.msk.bf16.gmra.mrb[12].mxu0 %vm1417_vm0, %v8757_v25  ;;  %v275_v25 = vld [vmem:[%s12955_s2 + $0x2c0] sm:$0xff] }
  0x20   :  { %8130 = vmatprep.mubr.msk.bf16.mxu0 %vm1417_vm0, %v8758_v26  ;;  %v278_v26 = vld [vmem:[%s12955_s2 + $0x2d8] sm:$0xff] }
  0x22   :  { %578 = vperm.xlu1 %8748, %v236_v27   ;;  %573 = vperm.xlu0 %8747, %v235_v28   ;;  %v277_v27 = vld [vmem:[%s12955_s2 + $0x2d0] sm:$0xff]  ;;  %v8779_v28 = vld [vmem:[%s12957_s1 + $0xe8] sm:$0xff]  }
  0x26   :  { %588 = vperm.xlu1 %8748, %v238_v29   ;;  %583 = vperm.xlu0 %8747, %v237_v30   ;;  %v8780_v29 = vld [vmem:[%s12957_s1 + $0xf0] sm:$0xff]   ;;  %v280_v30 = vld [vmem:[%s12955_s2 + $0x2e8] sm:$0xff] }
  0x27   :  { %8131 = vmatmul.mubr.msk.bf16.gmra.mrb[16].mxu0 %vm1417_vm0, %v8759_v31  ;;  %v279_v31 = vld [vmem:[%s12955_s2 + $0x2e0] sm:$0xff] }
  0x28   :  { %8134 = vmatprep.mubr.msk.bf16.mxu0 %vm1417_vm0, %v8760_v32  ;;  %v282_v32 = vld [vmem:[%s12955_s2 + $0x2f8] sm:$0xff] }
  0x2a   :  { %598 = vperm.xlu1 %8748, %v240_v33   ;;  %593 = vperm.xlu0 %8747, %v239_v34   ;;  %v281_v33 = vld [vmem:[%s12955_s2 + $0x2f0] sm:$0xff]  ;;  %v8781_v34 = vld [vmem:[%s12957_s1 + $0xf8] sm:$0xff]  }
  0x2e   :  { %608 = vperm.xlu1 %8748, %v242_v35   ;;  %603 = vperm.xlu0 %8747, %v241_v36   ;;  %v8782_v35 = vld [vmem:[%s12957_s1 + $0x100] sm:$0xff]   ;;  %v188_v36 = vld [vmem:[%s12955_s2 + $0x8] sm:$0xff] }
  0x2f   :  { %8135 = vmatmul.mubr.msk.bf16.gmra.mrb[20].mxu0 %vm1417_vm0, %v8761_v37  ;;  %v187_v37 = vld [vmem:[%s12955_s2] sm:$0xff] }
  0x30   :  { %8138 = vmatprep.mubr.msk.bf16.mxu0 %vm1417_vm0, %v8762_v38 }
  0x32   :  { %618 = vperm.xlu1 %8748, %v244_v39   ;;  %613 = vperm.xlu0 %8747, %v243_v40   ;;  %v190_v40 = vld [vmem:[%s12955_s2 + $0x18] sm:$0xff] }
  0x36   :  { %628 = vperm.xlu1 %8748, %v246_v41   ;;  %623 = vperm.xlu0 %8747, %v245_v42   ;;  %v189_v41 = vld [vmem:[%s12955_s2 + $0x10] sm:$0xff]  ;;  %v8783_v42 = vld [vmem:[%s12957_s1 + $0x108] sm:$0xff]  }
  0x37   :  { %8139 = vmatmul.mubr.msk.bf16.gmra.mrb[24].mxu0 %vm1417_vm0, %v8763_v43 }
  0x38   :  { %8142 = vmatprep.mubr.msk.bf16.mxu0 %vm1417_vm0, %v8764_v44 }
  0x3a   :  { %638 = vperm.xlu1 %8748, %v248_v45   ;;  %633 = vperm.xlu0 %8747, %v247_v46   ;;  %v8784_v45 = vld [vmem:[%s12957_s1 + $0x110] sm:$0xff]   ;;  %v192_v46 = vld [vmem:[%s12955_s2 + $0x28] sm:$0xff] }
  0x3e   :  { %648 = vperm.xlu1 %8748, %v250_v47   ;;  %643 = vperm.xlu0 %8747, %v249_v48   ;;  %v191_v47 = vld [vmem:[%s12955_s2 + $0x20] sm:$0xff] }
  0x3f   :  { %8143 = vmatmul.mubr.msk.bf16.gmra.mrb[28].mxu0 %vm1417_vm0, %v8765_v49 }
  0x40   :  { %8146 = vmatprep.mubr.msk.bf16.mxu0 %vm1417_vm0, %v8766_v50  ;;  %v194_v50 = vld [vmem:[%s12955_s2 + $0x38] sm:$0xff] }
  0x42   :  { %658 = vperm.xlu1 %8748, %v252_v51   ;;  %653 = vperm.xlu0 %8747, %v251_v52   ;;  %v193_v51 = vld [vmem:[%s12955_s2 + $0x30] sm:$0xff]  ;;  %v8785_v52 = vld [vmem:[%s12957_s1 + $0x118] sm:$0xff]  }
  0x46   :  { %668 = vperm.xlu1 %8748, %v254_v53   ;;  %663 = vperm.xlu0 %8747, %v253_v54  }
  0x47   :  { %8147 = vmatmul.mubr.msk.bf16.gmra.mrb[32].mxu0 %vm1417_vm0, %v8767_v55  ;;  %v8786_v55 = vld [vmem:[%s12957_s1 + $0x120] sm:$0xff]  }
  0x48   :  { %8150 = vmatprep.mubr.msk.bf16.mxu0 %vm1417_vm0, %v8768_v56  ;;  %v196_v56 = vld [vmem:[%s12955_s2 + $0x48] sm:$0xff] }
  0x4a   :  { %678 = vperm.xlu1 %8748, %v256_v57   ;;  %673 = vperm.xlu0 %8747, %v255_v58   ;;  %v195_v57 = vld [vmem:[%s12955_s2 + $0x40] sm:$0xff] }
  0x4e   :  { %688 = vperm.xlu1 %8748, %v258_v59   ;;  %683 = vperm.xlu0 %8747, %v257_v60   ;;  %v198_v60 = vld [vmem:[%s12955_s2 + $0x58] sm:$0xff] }
  0x4f   :  { %8151 = vmatmul.mubr.msk.bf16.gmra.mrb[36].mxu0 %vm1417_vm0, %v8769_v61  ;;  %v197_v61 = vld [vmem:[%s12955_s2 + $0x50] sm:$0xff] }
  0x50   :  { %8154 = vmatprep.mubr.msk.bf16.mxu0 %vm1417_vm0, %v8770_v62  ;;  %v8787_v62 = vld [vmem:[%s12957_s1 + $0x128] sm:$0xff]  }
  0x52   :  { %698 = vperm.xlu1 %8748, %v260_v63   ;;  %693 = vperm.xlu0 %8747, %v259_v1  }
  0x56   :  { %708 = vperm.xlu1 %8748, %v262_v2   ;;  %703 = vperm.xlu0 %8747, %v261_v3   ;;  %v8788_v2 = vld [vmem:[%s12957_s1 + $0x130] sm:$0xff]   ;;  %v200_v3 = vld [vmem:[%s12955_s2 + $0x68] sm:$0xff] }
  0x57   :  { %8155 = vmatmul.mubr.msk.bf16.gmra.mrb[40].mxu0 %vm1417_vm0, %v8771_v4  ;;  %v199_v4 = vld [vmem:[%s12955_s2 + $0x60] sm:$0xff] }
  0x58   :  { %8158 = vmatprep.mubr.msk.bf16.mxu0 %vm1417_vm0, %v8772_v5 }
  0x5a   :  { %718 = vperm.xlu1 %8748, %v264_v6   ;;  %713 = vperm.xlu0 %8747, %v263_v7   ;;  %v202_v7 = vld [vmem:[%s12955_s2 + $0x78] sm:$0xff] }
  0x5e   :  { %728 = vperm.xlu1 %8748, %v266_v8   ;;  %723 = vperm.xlu0 %8747, %v265_v9   ;;  %v201_v8 = vld [vmem:[%s12955_s2 + $0x70] sm:$0xff]  ;;  %v8789_v9 = vld [vmem:[%s12957_s1 + $0x138] sm:$0xff]  }
  0x5f   :  { %8159 = vmatmul.mubr.msk.bf16.gmra.mrb[44].mxu0 %vm1417_vm0, %v8773_v10 }
  0x60   :  { %8162 = vmatprep.mubr.msk.bf16.mxu0 %vm1417_vm0, %v8774_v11 }
  0x62   :  { %738 = vperm.xlu1 %8748, %v268_v12   ;;  %733 = vperm.xlu0 %8747, %v267_v13   ;;  %v8790_v12 = vld [vmem:[%s12957_s1 + $0x140] sm:$0xff]   ;;  %v204_v13 = vld [vmem:[%s12955_s2 + $0x88] sm:$0xff] }
  0x66   :  { %748 = vperm.xlu1 %8748, %v270_v14   ;;  %743 = vperm.xlu0 %8747, %v269_v15   ;;  %v203_v14 = vld [vmem:[%s12955_s2 + $0x80] sm:$0xff] }
  0x67   :  { %8163 = vmatmul.mubr.msk.bf16.gmra.mrb[48].mxu0 %vm1417_vm0, %v8775_v16 }
  0x68   :  { %8166 = vmatprep.mubr.msk.bf16.mxu0 %vm1417_vm0, %v8776_v17  ;;  %v206_v17 = vld [vmem:[%s12955_s2 + $0x98] sm:$0xff] }
  0x6a   :  { %758 = vperm.xlu1 %8748, %v272_v18   ;;  %753 = vperm.xlu0 %8747, %v271_v19   ;;  %v205_v18 = vld [vmem:[%s12955_s2 + $0x90] sm:$0xff]  ;;  %v8791_v19 = vld [vmem:[%s12957_s1 + $0x148] sm:$0xff]  }
  0x6e   :  { %768 = vperm.xlu1 %8748, %v274_v20   ;;  %763 = vperm.xlu0 %8747, %v273_v21  }
  0x6f   :  { %8167 = vmatmul.mubr.msk.bf16.gmra.mrb[52].mxu0 %vm1417_vm0, %v8777_v22  ;;  %v8792_v22 = vld [vmem:[%s12957_s1 + $0x150] sm:$0xff]  }
  0x70   :  { %8170 = vmatprep.mubr.msk.bf16.mxu0 %vm1417_vm0, %v8778_v23  ;;  %v208_v23 = vld [vmem:[%s12955_s2 + $0xa8] sm:$0xff] }
  0x72   :  { %778 = vperm.xlu1 %8748, %v276_v24   ;;  %773 = vperm.xlu0 %8747, %v275_v25   ;;  %v207_v24 = vld [vmem:[%s12955_s2 + $0xa0] sm:$0xff] }
  0x76   :  { %788 = vperm.xlu1 %8748, %v278_v26   ;;  %783 = vperm.xlu0 %8747, %v277_v27   ;;  %v210_v27 = vld [vmem:[%s12955_s2 + $0xb8] sm:$0xff] }
  0x77   :  { %8171 = vmatmul.mubr.msk.bf16.gmra.mrb[56].mxu0 %vm1417_vm0, %v8779_v28  ;;  %v209_v28 = vld [vmem:[%s12955_s2 + $0xb0] sm:$0xff] }
  0x78   :  { %8174 = vmatprep.mubr.msk.bf16.mxu0 %vm1417_vm0, %v8780_v29  ;;  %v8793_v29 = vld [vmem:[%s12957_s1 + $0x158] sm:$0xff]  }
  0x7a   :  { %798 = vperm.xlu1 %8748, %v280_v30   ;;  %793 = vperm.xlu0 %8747, %v279_v31  }
  0x7e   :  { %808 = vperm.xlu1 %8748, %v282_v32   ;;  %803 = vperm.xlu0 %8747, %v281_v33   ;;  %v8794_v32 = vld [vmem:[%s12957_s1 + $0x160] sm:$0xff]   ;;  %v212_v33 = vld [vmem:[%s12955_s2 + $0xc8] sm:$0xff] }
  0x7f   :  { %8175 = vmatmul.mubr.msk.bf16.gmra.mrb[60].mxu0 %vm1417_vm0, %v8781_v34  ;;  %v211_v34 = vld [vmem:[%s12955_s2 + $0xc0] sm:$0xff] }
  0x80   :  { %8178 = vmatprep.mubr.msk.bf16.mxu0 %vm1417_vm0, %v8782_v35 }
  0x81   :  { %v9691_v38 = vpop.permute.xlu1 %503  ;;  %v9693_v39 = vpop.permute.xlu0 %493 }
  0x82   :  { %338 = vperm.xlu1 %8748, %v188_v36   ;;  %333 = vperm.xlu0 %8747, %v187_v37   ;;  %v214_v37 = vld [vmem:[%s12955_s2 + $0xd8] sm:$0xff] }
  0x85   :  { %v9705_v43 = vpop.permute.xlu1 %508  ;;  %v9707_v44 = vpop.permute.xlu0 %498 }
  0x86   :  { %348 = vperm.xlu1 %8748, %v190_v40   ;;  %343 = vperm.xlu0 %8747, %v189_v41   ;;  %v213_v40 = vld [vmem:[%s12955_s2 + $0xd0] sm:$0xff]  ;;  %v8795_v41 = vld [vmem:[%s12957_s1 + $0x168] sm:$0xff]  }
  0x87   :  { %8179 = vmatmul.mubr.msk.bf16.gmra.mrb[64].mxu0 %vm1417_vm0, %v8783_v42 }
  0x88   :  { %8182 = vmatprep.mubr.msk.bf16.mxu0 %vm1417_vm0, %v8784_v45 }
  0x89   :  { %v9719_v48 = vpop.permute.xlu1 %518  ;;  %v9721_v49 = vpop.permute.xlu0 %513 }
  0x8a   :  { %358 = vperm.xlu1 %8748, %v192_v46   ;;  %353 = vperm.xlu0 %8747, %v191_v47   ;;  %v8796_v46 = vld [vmem:[%s12957_s1 + $0x170] sm:$0xff]   ;;  %v216_v47 = vld [vmem:[%s12955_s2 + $0xe8] sm:$0xff] }
  0x8d   :  { %v9733_v53 = vpop.permute.xlu1 %528  ;;  %v9735_v54 = vpop.permute.xlu0 %523 }
  0x8e   :  { %368 = vperm.xlu1 %8748, %v194_v50   ;;  %363 = vperm.xlu0 %8747, %v193_v51   ;;  %v215_v50 = vld [vmem:[%s12955_s2 + $0xe0] sm:$0xff] }
  0x8f   :  { %8183 = vmatmul.mubr.msk.bf16.gmra.mrb[68].mxu0 %vm1417_vm0, %v8785_v52 }
  0x90   :  { %8186 = vmatprep.mubr.msk.bf16.mxu0 %vm1417_vm0, %v8786_v55  ;;  %v218_v55 = vld [vmem:[%s12955_s2 + $0xf8] sm:$0xff] }
  0x91   :  { %v9747_v58 = vpop.permute.xlu1 %538  ;;  %v9749_v59 = vpop.permute.xlu0 %533 }
  0x92   :  { %378 = vperm.xlu1 %8748, %v196_v56   ;;  %373 = vperm.xlu0 %8747, %v195_v57   ;;  %v217_v56 = vld [vmem:[%s12955_s2 + $0xf0] sm:$0xff]  ;;  %v8797_v57 = vld [vmem:[%s12957_s1 + $0x178] sm:$0xff]  }
  0x95   :  { %v9761_v63 = vpop.permute.xlu1 %548  ;;  %v9763_v1 = vpop.permute.xlu0 %543 }
  0x96   :  { %388 = vperm.xlu1 %8748, %v198_v60   ;;  %383 = vperm.xlu0 %8747, %v197_v61  }
  0x97   :  { %8187 = vmatmul.mubr.msk.bf16.gmra.mrb[72].mxu0 %vm1417_vm0, %v8787_v62  ;;  %v8798_v62 = vld [vmem:[%s12957_s1 + $0x180] sm:$0xff]  }
  0x98   :  { %8190 = vmatprep.mubr.msk.bf16.mxu0 %vm1417_vm0, %v8788_v2  ;;  %v284_v2 = vld [vmem:[%s12955_s2 + $0x308] sm:$0xff] }
  0x99   :  { %v9775_v5 = vpop.permute.xlu1 %558  ;;  %v9777_v6 = vpop.permute.xlu0 %553 }
  0x9a   :  { %398 = vperm.xlu1 %8748, %v200_v3   ;;  %393 = vperm.xlu0 %8747, %v199_v4   ;;  %v283_v3 = vld [vmem:[%s12955_s2 + $0x300] sm:$0xff] }
  0x9d   :  { %v9789_v10 = vpop.permute.xlu1 %568  ;;  %v9791_v11 = vpop.permute.xlu0 %563 }
  0x9e   :  { %408 = vperm.xlu1 %8748, %v202_v7   ;;  %403 = vperm.xlu0 %8747, %v201_v8   ;;  %v286_v8 = vld [vmem:[%s12955_s2 + $0x318] sm:$0xff] }
  0x9f   :  { %8191 = vmatmul.mubr.msk.bf16.gmra.mrb[76].mxu0 %vm1417_vm0, %v8789_v9  ;;  %v285_v9 = vld [vmem:[%s12955_s2 + $0x310] sm:$0xff] }
  0xa0   :  { %8194 = vmatprep.mubr.msk.bf16.mxu0 %vm1417_vm0, %v8790_v12  ;;  %v8799_v12 = vld [vmem:[%s12957_s1 + $0x188] sm:$0xff]  }
  0xa1   :  { %v9803_v15 = vpop.permute.xlu1 %578  ;;  %v9805_v16 = vpop.permute.xlu0 %573 }
  0xa2   :  { %418 = vperm.xlu1 %8748, %v204_v13   ;;  %413 = vperm.xlu0 %8747, %v203_v14  }
  0xa5   :  { %v9817_v20 = vpop.permute.xlu1 %588  ;;  %v9819_v21 = vpop.permute.xlu0 %583 }
  0xa6   :  { %428 = vperm.xlu1 %8748, %v206_v17   ;;  %423 = vperm.xlu0 %8747, %v205_v18   ;;  %v8800_v17 = vld [vmem:[%s12957_s1 + $0x190] sm:$0xff]   ;;  %v288_v18 = vld [vmem:[%s12955_s2 + $0x328] sm:$0xff] }
  0xa7   :  { %8195 = vmatmul.mubr.msk.bf16.gmra.mrb[80].mxu0 %vm1417_vm0, %v8791_v19  ;;  %v287_v19 = vld [vmem:[%s12955_s2 + $0x320] sm:$0xff] }
  0xa8   :  { %8198 = vmatprep.mubr.msk.bf16.mxu0 %vm1417_vm0, %v8792_v22 }
  0xa9   :  { %v9831_v25 = vpop.permute.xlu1 %598  ;;  %v9833_v26 = vpop.permute.xlu0 %593 }
  0xaa   :  { %438 = vperm.xlu1 %8748, %v208_v23   ;;  %433 = vperm.xlu0 %8747, %v207_v24   ;;  %v290_v24 = vld [vmem:[%s12955_s2 + $0x338] sm:$0xff] }
  0xad   :  { %v9845_v30 = vpop.permute.xlu1 %608  ;;  %v9847_v31 = vpop.permute.xlu0 %603 }
  0xae   :  { %448 = vperm.xlu1 %8748, %v210_v27   ;;  %443 = vperm.xlu0 %8747, %v209_v28   ;;  %v289_v27 = vld [vmem:[%s12955_s2 + $0x330] sm:$0xff]  ;;  %v8801_v28 = vld [vmem:[%s12957_s1 + $0x198] sm:$0xff]  }
  0xaf   :  { %8199 = vmatmul.mubr.msk.bf16.gmra.mrb[84].mxu0 %vm1417_vm0, %v8793_v29 }
  0xb0   :  { %8202 = vmatprep.mubr.msk.bf16.mxu0 %vm1417_vm0, %v8794_v32 }
  0xb1   :  { %v9859_v35 = vpop.permute.xlu1 %618  ;;  %v9861_v36 = vpop.permute.xlu0 %613 }
  0xb2   :  { %12973 = vst [vmem:[#allocation3_spill] sm:$0xff] %v9859_v35  ;;  %12974 = vst [vmem:[#allocation4_spill] sm:$0xff] %v9861_v36  ;;  %458 = vperm.xlu1 %8748, %v212_v33   ;;  %453 = vperm.xlu0 %8747, %v211_v34   ;;  %v8802_v33 = vld [vmem:[%s12957_s1 + $0x1a0] sm:$0xff]   ;;  %v292_v34 = vld [vmem:[%s12955_s2 + $0x348] sm:$0xff] }
  0xb5   :  { %v9873_v42 = vpop.permute.xlu1 %628  ;;  %v9875_v45 = vpop.permute.xlu0 %623 }
  0xb6   :  { %12975 = vst [vmem:[#allocation5_spill] sm:$0xff] %v9873_v42  ;;  %12976 = vst [vmem:[#allocation6_spill] sm:$0xff] %v9875_v45  ;;  %468 = vperm.xlu1 %8748, %v214_v37   ;;  %463 = vperm.xlu0 %8747, %v213_v40   ;;  %v291_v37 = vld [vmem:[%s12955_s2 + $0x340] sm:$0xff]  ;;  %v320_v42 = vld [vmem:[%s12955_s2 + $0x428] sm:$0xff] }
  0xb7   :  { %8203 = vmatmul.mubr.msk.bf16.gmra.mrb[88].mxu0 %vm1417_vm0, %v8795_v41 }
  0xb8   :  { %8206 = vmatprep.mubr.msk.bf16.mxu0 %vm1417_vm0, %v8796_v46  ;;  %v294_v46 = vld [vmem:[%s12955_s2 + $0x358] sm:$0xff] }
  0xb9   :  { %v9887_v51 = vpop.permute.xlu1 %638  ;;  %v9889_v52 = vpop.permute.xlu0 %633 }
  0xba   :  { %12977 = vst [vmem:[#allocation7_spill] sm:$0xff] %v9887_v51  ;;  %12978 = vst [vmem:[#allocation8_spill] sm:$0xff] %v9889_v52  ;;  %478 = vperm.xlu1 %8748, %v216_v47   ;;  %473 = vperm.xlu0 %8747, %v215_v50   ;;  %v293_v47 = vld [vmem:[%s12955_s2 + $0x350] sm:$0xff]  ;;  %v8803_v50 = vld [vmem:[%s12957_s1 + $0x1a8] sm:$0xff]  }
  0xbd   :  { %v9901_v60 = vpop.permute.xlu1 %648  ;;  %v9903_v61 = vpop.permute.xlu0 %643 }
  0xbe   :  { %12979 = vst [vmem:[#allocation9_spill] sm:$0xff] %v9901_v60  ;;  %12980 = vst [vmem:[#allocation10_spill] sm:$0xff] %v9903_v61  ;;  %488 = vperm.xlu1 %8748, %v218_v55   ;;  %483 = vperm.xlu0 %8747, %v217_v56   ;;  %v8804_v55 = vld [vmem:[%s12957_s1 + $0x1b0] sm:$0xff]  }
  0xbf   :  { %8207 = vmatmul.mubr.msk.bf16.gmra.mrb[92].mxu0 %vm1417_vm0, %v8797_v57 }
  0xc0   :  { %8210 = vmatprep.mubr.msk.bf16.mxu0 %vm1417_vm0, %v8798_v62  ;;  %v296_v62 = vld [vmem:[%s12955_s2 + $0x368] sm:$0xff] }
  0xc1   :  { %v9915_v4 = vpop.permute.xlu1 %658  ;;  %v9917_v7 = vpop.permute.xlu0 %653 }
  0xc2   :  { %12981 = vst [vmem:[#allocation11_spill] sm:$0xff] %v9915_v4  ;;  %12982 = vst [vmem:[#allocation12_spill] sm:$0xff] %v9917_v7  ;;  %818 = vperm.xlu1 %8748, %v284_v2   ;;  %813 = vperm.xlu0 %8747, %v283_v3   ;;  %v295_v2 = vld [vmem:[%s12955_s2 + $0x360] sm:$0xff] }
  0xc5   :  { %v9929_v13 = vpop.permute.xlu1 %668  ;;  %v9931_v14 = vpop.permute.xlu0 %663 }
  0xc6   :  { %12983 = vst [vmem:[#allocation13_spill] sm:$0xff] %v9929_v13  ;;  %12984 = vst [vmem:[#allocation14_spill] sm:$0xff] %v9931_v14  ;;  %828 = vperm.xlu1 %8748, %v286_v8   ;;  %823 = vperm.xlu0 %8747, %v285_v9   ;;  %v298_v9 = vld [vmem:[%s12955_s2 + $0x378] sm:$0xff]  ;;  %v8816_v14 = vld [vmem:[%s12957_s1 + $0x210] sm:$0xff]  }
  0xc7   :  { %8211 = vmatmul.mubr.msk.bf16.gmra.mrb[96].mxu0 %vm1417_vm0, %v8799_v12  ;;  %v297_v12 = vld [vmem:[%s12955_s2 + $0x370] sm:$0xff] }
  0xc8   :  { %8214 = vmatprep.mubr.msk.bf16.mxu0 %vm1417_vm0, %v8800_v17 }
  0xc9   :  { %v9943_v22 = vpop.permute.xlu1 %678  ;;  %v9945_v23 = vpop.permute.xlu0 %673 }
  0xca   :  { %12985 = vst [vmem:[#allocation15_spill] sm:$0xff] %v9943_v22  ;;  %12986 = vst [vmem:[#allocation16_spill] sm:$0xff] %v9945_v23  ;;  %838 = vperm.xlu1 %8748, %v288_v18   ;;  %833 = vperm.xlu0 %8747, %v287_v19   ;;  %v8805_v19 = vld [vmem:[%s12957_s1 + $0x1b8] sm:$0xff]  }
  0xcd   :  { %v9957_v29 = vpop.permute.xlu1 %688  ;;  %v9959_v32 = vpop.permute.xlu0 %683 }
  0xce   :  { %12987 = vst [vmem:[#allocation17_spill] sm:$0xff] %v9957_v29  ;;  %12988 = vst [vmem:[#allocation18_spill] sm:$0xff] %v9959_v32  ;;  %848 = vperm.xlu1 %8748, %v290_v24   ;;  %843 = vperm.xlu0 %8747, %v289_v27   ;;  %v8806_v24 = vld [vmem:[%s12957_s1 + $0x1c0] sm:$0xff]  }
  0xcf   :  { %8215 = vmatmul.mubr.msk.bf16.gmra.mrb[100].mxu0 %vm1417_vm0, %v8801_v28 }
  0xd0   :  { %8218 = vmatprep.mubr.msk.bf16.mxu0 %vm1417_vm0, %v8802_v33 }
  0xd1   :  { %v9971_v40 = vpop.permute.xlu1 %698  ;;  %v9973_v41 = vpop.permute.xlu0 %693 }
  0xd2   :  { %12989 = vst [vmem:[#allocation19_spill] sm:$0xff] %v9971_v40  ;;  %12990 = vst [vmem:[#allocation20_spill] sm:$0xff] %v9973_v41  ;;  %858 = vperm.xlu1 %8748, %v292_v34   ;;  %853 = vperm.xlu0 %8747, %v291_v37   ;;  %v300_v37 = vld [vmem:[%s12955_s2 + $0x388] sm:$0xff]  ;;  %v307_v40 = vld [vmem:[%s12955_s2 + $0x3c0] sm:$0xff] }
  0xd5   :  { %v9988_v56 = vpop.permute.xlu1 %708  ;;  %v9990_v57 = vpop.permute.xlu0 %703 }
  0xd6   :  { %12991 = vst [vmem:[#allocation21_spill] sm:$0xff] %v9988_v56  ;;  %12992 = vst [vmem:[#allocation22_spill] sm:$0xff] %v9990_v57  ;;  %868 = vperm.xlu1 %8748, %v294_v46   ;;  %863 = vperm.xlu0 %8747, %v293_v47   ;;  %v299_v46 = vld [vmem:[%s12955_s2 + $0x380] sm:$0xff] }
  0xd7   :  { %8219 = vmatmul.mubr.msk.bf16.gmra.mrb[104].mxu0 %vm1417_vm0, %v8803_v50 }
  0xd8   :  { %8222 = vmatprep.mubr.msk.bf16.mxu0 %vm1417_vm0, %v8804_v55  ;;  %v302_v55 = vld [vmem:[%s12955_s2 + $0x398] sm:$0xff] }
  0xd9   :  { %v9999_v3 = vpop.permute.xlu1 %718  ;;  %v10001_v8 = vpop.permute.xlu0 %713 }
  0xda   :  { %12993 = vst [vmem:[#allocation23_spill] sm:$0xff] %v9999_v3  ;;  %12994 = vst [vmem:[#allocation24_spill] sm:$0xff] %v10001_v8  ;;  %878 = vperm.xlu1 %8748, %v296_v62   ;;  %873 = vperm.xlu0 %8747, %v295_v2   ;;  %v10010_v17 = vpop.f32.mrb[0].mxu0  ;;  %v301_v62 = vld [vmem:[%s12955_s2 + $0x390] sm:$0xff] }
  0xdb   :  { %v10012_v18 = vpop.f32.mrb[1].mxu0 }
  0xdc   :  { %v10024_v33 = vpop.f32.mrb[2].mxu0 }
  0xdd   :  { %v10020_v27 = vpop.permute.xlu1 %728  ;;  %v10022_v28 = vpop.permute.xlu0 %723 }
  0xde   :  { %12995 = vst [vmem:[#allocation25_spill] sm:$0xff] %v10020_v27  ;;  %12996 = vst [vmem:[#allocation26_spill] sm:$0xff] %v10022_v28  ;;  %888 = vperm.xlu1 %8748, %v298_v9   ;;  %883 = vperm.xlu0 %8747, %v297_v12   ;;  %v10026_v34 = vpop.f32.mrb[3].mxu0  ;;  %v8807_v12 = vld [vmem:[%s12957_s1 + $0x1c8] sm:$0xff]  }
  0xdf   :  { %8223 = vmatmul.mubr.msk.bf16.gmra.mrb[108].mxu0 %vm1417_vm0, %v8805_v19  ;;  %v8808_v19 = vld [vmem:[%s12957_s1 + $0x1d0] sm:$0xff]   ;;  %v308_v28 = vld [vmem:[%s12955_s2 + $0x3c8] sm:$0xff] }
  0xe0   :  { %8226 = vmatprep.mubr.msk.bf16.mxu0 %vm1417_vm0, %v8806_v24 }
  0xe1   :  { %v10035_v47 = vpop.permute.xlu1 %738  ;;  %v10037_v50 = vpop.permute.xlu0 %733 }
  0xe2   :  { %12997 = vst [vmem:[#allocation27_spill] sm:$0xff] %v10035_v47  ;;  %12998 = vst [vmem:[#allocation28_spill] sm:$0xff] %v10037_v50  ;;  %898 = vperm.xlu1 %8748, %v300_v37   ;;  %893 = vperm.xlu0 %8747, %v299_v46   ;;  %v10046_v2 = vpop.f32.mrb[4].mxu0  ;;  %v304_v37 = vld [vmem:[%s12955_s2 + $0x3a8] sm:$0xff]  ;;  %v303_v46 = vld [vmem:[%s12955_s2 + $0x3a0] sm:$0xff] }
  0xe3   :  { %v10048_v9 = vpop.f32.mrb[5].mxu0 }
  0xe4   :  { %v10060_v50 = vpop.f32.mrb[6].mxu0 }
  0xe5   :  { %v10056_v0 = vpop.permute.xlu1 %748  ;;  %v10058_v47 = vpop.permute.xlu0 %743 }
  0xe6   :  { %12999 = vst [vmem:[#allocation29_spill] sm:$0xff] %v10056_v0  ;;  %13000 = vst [vmem:[#allocation30_spill] sm:$0xff] %v10058_v47  ;;  %908 = vperm.xlu1 %8748, %v302_v55   ;;  %903 = vperm.xlu0 %8747, %v301_v62   ;;  %v10062_v24 = vpop.f32.mrb[7].mxu0  ;;  %v306_v55 = vld [vmem:[%s12955_s2 + $0x3b8] sm:$0xff]  ;;  %v305_v62 = vld [vmem:[%s12955_s2 + $0x3b0] sm:$0xff] }
  0xe7   :  { %8227 = vmatmul.mubr.msk.bf16.gmra.mrb[112].mxu0 %vm1417_vm0, %v8807_v12  ;;  %v8809_v12 = vld [vmem:[%s12957_s1 + $0x1d8] sm:$0xff]  }
  0xe8   :  { %8230 = vmatprep.mubr.msk.bf16.mxu0 %vm1417_vm0, %v8808_v19 }
  0xe9   :  { %v10071_v3 = vpop.permute.xlu1 %758  ;;  %v10073_v0 = vpop.permute.xlu0 %753 }
  0xea   :  { %13001 = vst [vmem:[#allocation31_spill] sm:$0xff] %v10071_v3  ;;  %13002 = vst [vmem:[#allocation32_spill] sm:$0xff] %v10073_v0  ;;  %918 = vperm.xlu1 %8748, %v304_v37   ;;  %913 = vperm.xlu0 %8747, %v303_v46   ;;  %v10085_v47 = vpop.f32.mrb[8].mxu0  ;;  %v8810_v3 = vld [vmem:[%s12957_s1 + $0x1e0] sm:$0xff]   ;;  %v8836_v0 = vld [vmem:[%s12958_s3 + $0xc] ss:$36 sps:$4 sm:$0xff]  }
  0xeb   :  { %v10093_v27 = vpop.f32.mrb[9].mxu0  ;;  %5244 = vmatprep.mubr.bf16.mxu1 %v8836_v0  ;;  %v310_v0 = vld [vmem:[%s12955_s2 + $0x3d8] sm:$0xff] }
  0xec   :  { %v10099_v37 = vpop.f32.mrb[10].mxu0 }
  0xed   :  { %v10095_v8 = vpop.permute.xlu1 %768  ;;  %v10097_v19 = vpop.permute.xlu0 %763 }
  0xee   :  { %13003 = vst [vmem:[#allocation33_spill] sm:$0xff] %v10095_v8  ;;  %13004 = vst [vmem:[#allocation34_spill] sm:$0xff] %v10097_v19  ;;  %928 = vperm.xlu1 %8748, %v306_v55   ;;  %923 = vperm.xlu0 %8747, %v305_v62   ;;  %v10101_v46 = vpop.f32.mrb[11].mxu0  ;;  %v309_v55 = vld [vmem:[%s12955_s2 + $0x3d0] sm:$0xff] }
  0xef   :  { %8231 = vmatmul.mubr.msk.bf16.gmra.mrb[116].mxu0 %vm1417_vm0, %v8809_v12  ;;  %v8811_v12 = vld [vmem:[%s12957_s1 + $0x1e8] sm:$0xff]  }
  0xf0   :  { %8234 = vmatprep.mubr.msk.bf16.mxu0 %vm1417_vm0, %v8810_v3  ;;  %v312_v3 = vld [vmem:[%s12955_s2 + $0x3e8] sm:$0xff] }
  0xf1   :  { %v10110_v8 = vpop.permute.xlu1 %778  ;;  %v10112_v19 = vpop.permute.xlu0 %773 }
  0xf2   :  { %13005 = vst [vmem:[#allocation35_spill] sm:$0xff] %v10110_v8  ;;  %13006 = vst [vmem:[#allocation36_spill] sm:$0xff] %v10112_v19  ;;  %938 = vperm.xlu1 %8748, %v308_v28   ;;  %933 = vperm.xlu0 %8747, %v307_v40   ;;  %v10121_v62 = vpop.f32.mrb[12].mxu0  ;;  %v8812_v8 = vld [vmem:[%s12957_s1 + $0x1f0] sm:$0xff]   ;;  %v311_v28 = vld [vmem:[%s12955_s2 + $0x3e0] sm:$0xff] }
  0xf3   :  { %v10129_v19 = vpop.f32.mrb[13].mxu0 }
  0xf4   :  { %v10135_v57 = vpop.f32.mrb[14].mxu0 }
  0xf5   :  { %v10131_v56 = vpop.permute.xlu1 %788  ;;  %v10133_v41 = vpop.permute.xlu0 %783 }
  0xf6   :  { %13007 = vst [vmem:[#allocation37_spill] sm:$0xff] %v10131_v56  ;;  %13008 = vst [vmem:[#allocation38_spill] sm:$0xff] %v10133_v41  ;;  %948 = vperm.xlu1 %8748, %v310_v0   ;;  %943 = vperm.xlu0 %8747, %v309_v55   ;;  %v10137_v40 = vpop.f32.mrb[15].mxu0  ;;  %v314_v0 = vld [vmem:[%s12955_s2 + $0x3f8] sm:$0xff]  ;;  %v313_v55 = vld [vmem:[%s12955_s2 + $0x3f0] sm:$0xff] }
  0xf7   :  { %8235 = vmatmul.mubr.msk.bf16.gmra.mrb[120].mxu0 %vm1417_vm0, %v8811_v12  ;;  %v8813_v12 = vld [vmem:[%s12957_s1 + $0x1f8] sm:$0xff]  }
  0xf8   :  { %8238 = vmatprep.mubr.msk.bf16.mxu0 %vm1417_vm0, %v8812_v8 }
  0xf9   :  { %v10146_v22 = vpop.permute.xlu1 %798  ;;  %v10148_v56 = vpop.permute.xlu0 %793 }
  0xfa   :  { %13009 = vst [vmem:[#allocation39_spill] sm:$0xff] %v10146_v22  ;;  %13010 = vst [vmem:[#allocation40_spill] sm:$0xff] %v10148_v56  ;;  %958 = vperm.xlu1 %8748, %v312_v3   ;;  %953 = vperm.xlu0 %8747, %v311_v28   ;;  %v10157_v41 = vpop.f32.mrb[16].mxu0  ;;  %v8814_v22 = vld [vmem:[%s12957_s1 + $0x200] sm:$0xff]   ;;  %v316_v3 = vld [vmem:[%s12955_s2 + $0x408] sm:$0xff] }
  0xfb   :  { %v10165_v56 = vpop.f32.mrb[17].mxu0  ;;  %v315_v28 = vld [vmem:[%s12955_s2 + $0x400] sm:$0xff] }
  0xfc   :  { %v10171_v32 = vpop.f32.mrb[18].mxu0 }
  0xfd   :  { %v10167_v29 = vpop.permute.xlu1 %808  ;;  %v10169_v23 = vpop.permute.xlu0 %803 }
  0xfe   :  { %13011 = vst [vmem:[#allocation41_spill] sm:$0xff] %v10167_v29  ;;  %13012 = vst [vmem:[#allocation42_spill] sm:$0xff] %v10169_v23  ;;  %968 = vperm.xlu1 %8748, %v314_v0   ;;  %963 = vperm.xlu0 %8747, %v313_v55   ;;  %v10173_v8 = vpop.f32.mrb[19].mxu0  ;;  %v318_v23 = vld [vmem:[%s12955_s2 + $0x418] sm:$0xff]  ;;  %v317_v0 = vld [vmem:[%s12955_s2 + $0x410] sm:$0xff] }
  0xff   :  { %8239 = vmatmul.mubr.msk.bf16.gmra.mrb[124].mxu0 %vm1417_vm0, %v8813_v12  ;;  %v8815_v12 = vld [vmem:[%s12957_s1 + $0x208] sm:$0xff]  }
 0x100   :  { %8242 = vmatprep.mubr.msk.bf16.mxu0 %vm1417_vm0, %v8814_v22 }
 0x101   :  { %v339_v4 = vpop.permute.xlu1 %338  ;;  %v334_v29 = vpop.permute.xlu0 %333 }
 0x102   :  { %v1672_v55 = vadd.f32 %v10026_v34, %v339_v4  ;;  %v1669_v13 = vadd.f32 %v10012_v18, %v334_v29  ;;  %978 = vperm.xlu1 %8748, %v316_v3   ;;  %973 = vperm.xlu0 %8747, %v315_v28   ;;  %v10191_v7 = vpop.f32.mrb[20].mxu0 }
 0x103   :  { %v10199_v60 = vpop.f32.mrb[21].mxu0 }
 0x104   :  { %vm2244_vm1 = vcmp.ge.f32.partialorder %v1672_v55, 0.0  ;;  %v2388_v51 = vmul.f32 0.01, %v1672_v55  ;;  %vm2243_vm2 = vcmp.ge.f32.partialorder %v1669_v13, 0.0  ;;  %v2387_v22 = vmul.f32 0.01, %v1669_v13 }
 0x105   :  { %v349_v4 = vpop.permute.xlu1 %348  ;;  %v344_v3 = vpop.permute.xlu0 %343 }
 0x106   :  { %v2532_v29 = vsel %vm2244_vm1, %v1672_v55, %v2388_v51  ;;  %v2531_v18 = vsel %vm2243_vm2, %v1669_v13, %v2387_v22  ;;  %v1680_v34 = vadd.f32 %v10024_v33, %v349_v4  ;;  %v10202_v28 = vpop.f32.mrb[22].mxu0  ;;  %988 = vperm.xlu1 %8748, %v318_v23   ;;  %983 = vperm.xlu0 %8747, %v317_v0   ;;  %v319_v51 = vld [vmem:[%s12955_s2 + $0x420] sm:$0xff] }
 0x107   :  { %v2995_v52 = vpack.c.bf16 %v2532_v29, %v2531_v18  ;;  %v1677_v61 = vadd.f32 %v10010_v17, %v344_v3  ;;  %v10205_v35 = vpop.f32.mrb[23].mxu0  ;;  %8243 = vmatmul.mubr.msk.bf16.gmra.mrb[128].mxu0 %vm1417_vm0, %v8815_v12  ;;  %v322_v17 = vld [vmem:[%s12955_s2 + $0x438] sm:$0xff]  ;;  %v321_v12 = vld [vmem:[%s12955_s2 + $0x430] sm:$0xff]  ;;  %v13013_v18 = vmov 0  }
 0x108   :  { %vm2246_vm3 = vcmp.ge.f32.partialorder %v1680_v34, 0.0  ;;  %v2390_v13 = vmul.f32 0.01, %v1680_v34  ;;  %8246 = vmatprep.mubr.msk.bf16.mxu0 %vm1417_vm0, %v8816_v14  ;;  %v8817_v14 = vld [vmem:[%s12957_s1 + $0x218] sm:$0xff]  }
 0x109   :  { %vm2245_vm4 = vcmp.ge.f32.partialorder %v1677_v61, 0.0  ;;  %v2389_v23 = vmul.f32 0.01, %v1677_v61  ;;  %v359_v33 = vpop.permute.xlu1 %358  ;;  %4924 = vmatpush1.bf16.msra.mxu0 %v2995_v52  ;;  %v354_v22 = vpop.permute.xlu0 %353 }
 0x10a   :  { %v2534_v0 = vsel %vm2246_vm3, %v1680_v34, %v2390_v13  ;;  %v1688_v55 = vadd.f32 %v10062_v24, %v359_v33  ;;  %998 = vperm.xlu1 %8748, %v320_v42   ;;  %993 = vperm.xlu0 %8747, %v319_v51   ;;  %v1685_v29 = vadd.f32 %v10048_v9, %v354_v22  ;;  %v10223_v52 = vpop.f32.mrb[24].mxu0  ;;  %v8818_v42 = vld [vmem:[%s12957_s1 + $0x220] sm:$0xff]  }
 0x10b   :  { %v2533_v4 = vsel %vm2245_vm4, %v1677_v61, %v2389_v23  ;;  %4925 = vmatprep.subr.bf16.mxu0 %v13013_v18  ;;  %v10232_v3 = vpop.f32.mrb[25].mxu0 }
 0x10c   :  { %v2996_v24 = vpack.c.bf16 %v2534_v0, %v2533_v4  ;;  %vm2248_vm5 = vcmp.ge.f32.partialorder %v1688_v55, 0.0  ;;  %v2392_v34 = vmul.f32 0.01, %v1688_v55  ;;  %vm2247_vm6 = vcmp.ge.f32.partialorder %v1685_v29, 0.0  ;;  %v10234_v51 = vpop.f32.mrb[26].mxu0  ;;  %v324_v4 = vld [vmem:[%s12955_s2 + $0x448] sm:$0xff] }
 0x10d   :  { %v2391_v61 = vmul.f32 0.01, %v1685_v29  ;;  %v369_v9 = vpop.permute.xlu1 %368  ;;  %v364_v33 = vpop.permute.xlu0 %363 }
 0x10e   :  { %v2536_v13 = vsel %vm2248_vm5, %v1688_v55, %v2392_v34  ;;  %v1696_v23 = vadd.f32 %v10060_v50, %v369_v9  ;;  %4926 = vmatpush1.bf16.msra.mxu0 %v2996_v24  ;;  %1008 = vperm.xlu1 %8748, %v322_v17   ;;  %v10237_v22 = vpop.f32.mrb[27].mxu0  ;;  %v1693_v0 = vadd.f32 %v10046_v2, %v364_v33  ;;  %v323_v50 = vld [vmem:[%s12955_s2 + $0x440] sm:$0xff]  ;;  %v326_v2 = vld [vmem:[%s12955_s2 + $0x458] sm:$0xff] }
 0x10f   :  { %v2535_v36 = vsel %vm2247_vm6, %v1685_v29, %v2391_v61  ;;  %1003 = vperm.xlu0 %8747, %v321_v12   ;;  %4927 = vmatprep.subr.bf16.mxu0 %v13013_v18 }
 0x110   :  { %v2997_v45 = vpack.c.bf16 %v2536_v13, %v2535_v36  ;;  %vm2250_vm7 = vcmp.ge.f32.partialorder %v1696_v23, 0.0  ;;  %v2394_v55 = vmul.f32 0.01, %v1696_v23  ;;  %8247 = vmatmul.mubr.msk.bf16.gmra.mrb[132].mxu0 %vm1417_vm0, %v8817_v14  ;;  %vm2249_vm8 = vcmp.ge.f32.partialorder %v1693_v0, 0.0  ;;  %v325_v14 = vld [vmem:[%s12955_s2 + $0x450] sm:$0xff] }
 0x111   :  { %v2393_v17 = vmul.f32 0.01, %v1693_v0  ;;  %v379_v29 = vpop.permute.xlu1 %378  ;;  %8250 = vmatprep.mubr.msk.bf16.mxu0 %vm1417_vm0, %v8818_v42  ;;  %v374_v24 = vpop.permute.xlu0 %373  ;;  %v8819_v42 = vld [vmem:[%s12957_s1 + $0x228] sm:$0xff]  }
 0x112   :  { %v2538_v12 = vsel %vm2250_vm7, %v1696_v23, %v2394_v55  ;;  %v1704_v36 = vadd.f32 %v10101_v46, %v379_v29  ;;  %4928 = vmatpush1.bf16.msra.mxu0 %v2997_v45  ;;  %1018 = vperm.xlu1 %8748, %v324_v4   ;;  %v1701_v61 = vadd.f32 %v10093_v27, %v374_v24  ;;  %v10257_v9 = vpop.f32.mrb[28].mxu0  ;;  %v8820_v45 = vld [vmem:[%s12957_s1 + $0x230] sm:$0xff]   ;;  %v328_v24 = vld [vmem:[%s12955_s2 + $0x468] sm:$0xff] }
 0x113   :  { %v2537_v34 = vsel %vm2249_vm8, %v1693_v0, %v2393_v17  ;;  %1013 = vperm.xlu0 %8747, %v323_v50   ;;  %4929 = vmatprep.subr.bf16.mxu0 %v13013_v18  ;;  %v10266_v23 = vpop.f32.mrb[29].mxu0 }
 0x114   :  { %v2998_v46 = vpack.c.bf16 %v2538_v12, %v2537_v34  ;;  %vm2252_vm9 = vcmp.ge.f32.partialorder %v1704_v36, 0.0  ;;  %v2396_v13 = vmul.f32 0.01, %v1704_v36  ;;  %vm2251_vm10 = vcmp.ge.f32.partialorder %v1701_v61, 0.0  ;;  %v10268_v0 = vpop.f32.mrb[30].mxu0 }
 0x115   :  { %v2395_v27 = vmul.f32 0.01, %v1701_v61  ;;  %v389_v33 = vpop.permute.xlu1 %388  ;;  %v384_v50 = vpop.permute.xlu0 %383 }
 0x116   :  { %v2540_v4 = vsel %vm2252_vm9, %v1704_v36, %v2396_v13  ;;  %v1712_v55 = vadd.f32 %v10099_v37, %v389_v33  ;;  %4930 = vmatpush1.bf16.msra.mxu0 %v2998_v46  ;;  %1028 = vperm.xlu1 %8748, %v326_v2   ;;  %v10271_v17 = vpop.f32.mrb[31].mxu0  ;;  %v1709_v12 = vadd.f32 %v10085_v47, %v384_v50  ;;  %v327_v37 = vld [vmem:[%s12955_s2 + $0x460] sm:$0xff]  ;;  %v330_v47 = vld [vmem:[%s12955_s2 + $0x478] sm:$0xff] }
 0x117   :  { %v2539_v29 = vsel %vm2251_vm10, %v1701_v61, %v2395_v27  ;;  %1023 = vperm.xlu0 %8747, %v325_v14   ;;  %4931 = vmatprep.subr.bf16.mxu0 %v13013_v18 }
 0x118   :  { %v2999_v34 = vpack.c.bf16 %v2540_v4, %v2539_v29  ;;  %vm2254_vm11 = vcmp.ge.f32.partialorder %v1712_v55, 0.0  ;;  %v2398_v36 = vmul.f32 0.01, %v1712_v55  ;;  %8251 = vmatmul.mubr.msk.bf16.gmra.mrb[136].mxu0 %vm1417_vm0, %v8819_v42  ;;  %vm2253_vm12 = vcmp.ge.f32.partialorder %v1709_v12, 0.0  ;;  %v329_v42 = vld [vmem:[%s12955_s2 + $0x470] sm:$0xff] }
 0x119   :  { %v2397_v2 = vmul.f32 0.01, %v1709_v12  ;;  %v399_v61 = vpop.permute.xlu1 %398  ;;  %8254 = vmatprep.mubr.msk.bf16.mxu0 %vm1417_vm0, %v8820_v45  ;;  %v394_v13 = vpop.permute.xlu0 %393  ;;  %v8821_v45 = vld [vmem:[%s12957_s1 + $0x238] sm:$0xff]  }
 0x11a   :  { %v2542_v14 = vsel %vm2254_vm11, %v1712_v55, %v2398_v36  ;;  %v1720_v46 = vadd.f32 %v10137_v40, %v399_v61  ;;  %4932 = vmatpush1.bf16.msra.mxu0 %v2999_v34  ;;  %1038 = vperm.xlu1 %8748, %v328_v24   ;;  %v1717_v33 = vadd.f32 %v10129_v19, %v394_v13  ;;  %v8148_v4 = vpop.f32.mrb[32].mxu0  ;;  %v8824_v40 = vld [vmem:[%s12958_s3 + $0x4] ss:$36 sps:$4 sm:$0xff]  }
 0x11b   :  { %v2541_v27 = vsel %vm2253_vm12, %v1709_v12, %v2397_v2  ;;  %1033 = vperm.xlu0 %8747, %v327_v37   ;;  %4933 = vmatprep.subr.bf16.mxu0 %v13013_v18  ;;  %v10299_v29 = vadd.f32 %v8148_v4, %v9691_v38  ;;  %v1796_v12 = vpop.f32.mrb[33].mxu0 }
 0x11c   :  { %v3000_v55 = vpack.c.bf16 %v2542_v14, %v2541_v27  ;;  %vm2256_vm13 = vcmp.ge.f32.partialorder %v1720_v46, 0.0  ;;  %v2400_v50 = vmul.f32 0.01, %v1720_v46  ;;  %vm2255_vm14 = vcmp.ge.f32.partialorder %v1717_v33, 0.0  ;;  %v8149_v36 = vpop.f32.mrb[34].mxu0 }
 0x11d   :  { %v2399_v19 = vmul.f32 0.01, %v1717_v33  ;;  %v1797_v24 = vadd.f32 %v1796_v12, %v9693_v39  ;;  %v409_v34 = vpop.permute.xlu1 %408  ;;  %v10303_v2 = vmul.f32 0.01, %v10299_v29  ;;  %v404_v13 = vpop.permute.xlu0 %403  ;;  %v10307_v14 = vadd.f32 %v8149_v36, %v9705_v43 }
 0x11e   :  { %v2544_v37 = vsel %vm2256_vm13, %v1720_v46, %v2400_v50  ;;  %v1728_v61 = vadd.f32 %v10135_v57, %v409_v34  ;;  %4934 = vmatpush1.bf16.msra.mxu0 %v3000_v55  ;;  %1048 = vperm.xlu1 %8748, %v330_v47   ;;  %v1799_v38 = vpop.f32.mrb[35].mxu0  ;;  %v1725_v4 = vadd.f32 %v10121_v62, %v404_v13  ;;  %v3084_v46 = vld [vmem:[%s12959_s4 + $0x88] sm:$0xff]  ;;  %v3083_v62 = vld [vmem:[%s12959_s4 + $0x80] sm:$0xff]  ;;  %vm2277_vm4 = vcmp.ge.f32.partialorder %v10299_v29, 0.0 }
 0x11f   :  { %v2543_v27 = vsel %vm2255_vm14, %v1717_v33, %v2399_v19  ;;  %1043 = vperm.xlu0 %8747, %v329_v42   ;;  %v1800_v39 = vadd.f32 %v1799_v38, %v9707_v44  ;;  %4935 = vmatprep.subr.bf16.mxu0 %v13013_v18  ;;  %vm2275_vm15 = vcmp.ge.f32.partialorder %v1797_v24, 0.0  ;;  %v10316_v55 = vmul.f32 0.01, %v10307_v14 }
 0x120   :  { %v3001_v57 = vpack.c.bf16 %v2544_v37, %v2543_v27  ;;  %vm2258_vm1 = vcmp.ge.f32.partialorder %v1728_v61, 0.0  ;;  %v2402_v43 = vmul.f32 0.01, %v1728_v61  ;;  %8255 = vmatmul.mubr.msk.bf16.gmra.mrb[140].mxu0 %vm1417_vm0, %v8821_v45  ;;  %vm2257_vm2 = vcmp.ge.f32.partialorder %v1725_v4, 0.0 }
 0x121   :  { %v2401_v44 = vmul.f32 0.01, %v1725_v4  ;;  %v419_v47 = vpop.permute.xlu1 %418  ;;  %vm2276_vm3 = vcmp.ge.f32.partialorder %v1800_v39, 0.0  ;;  %v2419_v42 = vmul.f32 0.01, %v1797_v24  ;;  %4955 = vmatprep.mubr.bf16.mxu0 %v8824_v40  ;;  %v414_v12 = vpop.permute.xlu0 %413  ;;  %v3068_v40 = vld [vmem:[%s12959_s4 + $0x8] sm:$0xff] }
 0x122   :  { %v2546_v33 = vsel %vm2258_vm1, %v1728_v61, %v2402_v43  ;;  %v1736_v50 = vadd.f32 %v10173_v8, %v419_v47  ;;  %4936 = vmatpush1.bf16.msra.mxu0 %v3001_v57  ;;  %3218 = vperm.xlu1 %8748, %v3084_v46   ;;  %v2420_v19 = vmul.f32 0.01, %v1800_v39  ;;  %v1733_v34 = vadd.f32 %v10165_v56, %v414_v12  ;;  %v8152_v36 = vpop.f32.mrb[36].mxu0  ;;  %v3067_v8 = vld [vmem:[%s12959_s4] sm:$0xff] }
 0x123   :  { %v2545_v45 = vsel %vm2257_vm2, %v1725_v4, %v2401_v44  ;;  %3213 = vperm.xlu0 %8747, %v3083_v62   ;;  %4937 = vmatprep.subr.bf16.mxu0 %v13013_v18  ;;  %v2563_v37 = vsel %vm2275_vm15, %v1797_v24, %v2419_v42  ;;  %vm2278_vm0 = vcmp.ge.f32.partialorder %v10307_v14, 0.0  ;;  %v10335_v56 = vadd.f32 %v8152_v36, %v9735_v54  ;;  %v1812_v38 = vpop.f32.mrb[37].mxu0 }
 0x124   :  { %v3002_v61 = vpack.c.bf16 %v2546_v33, %v2545_v45  ;;  %vm2260_vm5 = vcmp.ge.f32.partialorder %v1736_v50, 0.0  ;;  %v2404_v13 = vmul.f32 0.01, %v1736_v50  ;;  %vm2259_vm6 = vcmp.ge.f32.partialorder %v1733_v34, 0.0  ;;  %v8153_v57 = vpop.f32.mrb[38].mxu0 }
 0x125   :  { %v2403_v27 = vmul.f32 0.01, %v1733_v34  ;;  %v10338_v4 = vadd.f32 %v1812_v38, %v9721_v49  ;;  %v429_v46 = vpop.permute.xlu1 %428  ;;  %v2564_v43 = vsel %vm2276_vm3, %v1800_v39, %v2420_v19  ;;  %v10342_v24 = vmul.f32 0.01, %v10335_v56  ;;  %v424_v47 = vpop.permute.xlu0 %423 }
 0x126   :  { %v2548_v62 = vsel %vm2260_vm5, %v1736_v50, %v2404_v13  ;;  %v1744_v44 = vadd.f32 %v10171_v32, %v429_v46  ;;  %v10346_v54 = vadd.f32 %v8153_v57, %v9733_v53  ;;  %4938 = vmatpush1.bf16.msra.mxu0 %v3002_v61  ;;  %3138 = vperm.xlu1 %8748, %v3068_v40   ;;  %v1815_v42 = vpop.f32.mrb[39].mxu0  ;;  %v3086_v53 = vld [vmem:[%s12959_s4 + $0x98] sm:$0xff]  ;;  %v3085_v32 = vld [vmem:[%s12959_s4 + $0x90] sm:$0xff]  ;;  %vm2281_vm13 = vcmp.ge.f32.partialorder %v10335_v56, 0.0 }
 0x127   :  { %v2547_v33 = vsel %vm2259_vm6, %v1733_v34, %v2403_v27  ;;  %v10349_v49 = vmul.f32 0.01, %v10338_v4  ;;  %v1741_v12 = vadd.f32 %v10157_v41, %v424_v47  ;;  %3133 = vperm.xlu0 %8747, %v3067_v8   ;;  %v10353_v39 = vadd.f32 %v1815_v42, %v9719_v48  ;;  %4939 = vmatprep.subr.bf16.mxu0 %v13013_v18  ;;  %v3070_v46 = vld [vmem:[%s12959_s4 + $0x18] sm:$0xff] }
 0x128   :  { %v3003_v50 = vpack.c.bf16 %v2548_v62, %v2547_v33  ;;  %vm2262_vm7 = vcmp.ge.f32.partialorder %v1744_v44, 0.0  ;;  %v2406_v19 = vmul.f32 0.01, %v1744_v44  ;;  %v10363_v45 = vmul.f32 0.01, %v10346_v54 }
 0x129   :  { %vm2261_vm8 = vcmp.ge.f32.partialorder %v1741_v12, 0.0  ;;  %v2405_v41 = vmul.f32 0.01, %v1741_v12  ;;  %v2424_v48 = vmul.f32 0.01, %v10353_v39  ;;  %v3011_v34 = vpack.c.bf16 %v2564_v43, %v2563_v37  ;;  %v439_v36 = vpop.permute.xlu1 %438  ;;  %v434_v61 = vpop.permute.xlu0 %433 }
 0x12a   :  { %v2550_v40 = vsel %vm2262_vm7, %v1744_v44, %v2406_v19  ;;  %v1752_v8 = vadd.f32 %v10205_v35, %v439_v36  ;;  %4940 = vmatpush1.bf16.msra.mxu0 %v3003_v50  ;;  %3228 = vperm.xlu1 %8748, %v3086_v53   ;;  %v2565_v13 = vsel %vm2277_vm4, %v10299_v29, %v10303_v2  ;;  %vm2279_vm9 = vcmp.ge.f32.partialorder %v10338_v4, 0.0  ;;  %v8156_v37 = vpop.f32.mrb[40].mxu0  ;;  %v3069_v29 = vld [vmem:[%s12959_s4 + $0x10] sm:$0xff]  ;;  %v3087_v36 = vld [vmem:[%s12959_s4 + $0xa0] sm:$0xff] }
 0x12b   :  { %v2549_v38 = vsel %vm2261_vm8, %v1741_v12, %v2405_v41  ;;  %5213 = vmatpush1.bf16.msra.mxu1 %v3011_v34  ;;  %v1749_v27 = vadd.f32 %v10199_v60, %v434_v61  ;;  %3223 = vperm.xlu0 %8747, %v3085_v32   ;;  %v2566_v35 = vsel %vm2278_vm0, %v10307_v14, %v10316_v55  ;;  %vm2280_vm10 = vcmp.ge.f32.partialorder %v10353_v39, 0.0  ;;  %v1828_v43 = vpop.f32.mrb[41].mxu0 }
 0x12c   :  { %v3004_v2 = vpack.c.bf16 %v2550_v40, %v2549_v38  ;;  %vm2264_vm11 = vcmp.ge.f32.partialorder %v1752_v8, 0.0  ;;  %v2408_v60 = vmul.f32 0.01, %v1752_v8  ;;  %5214 = vmatprep.subr.bf16.mxu1 %v13013_v18  ;;  %v3012_v57 = vpack.c.bf16 %v2566_v35, %v2565_v13  ;;  %4941 = vmatprep.subr.bf16.mxu0 %v13013_v18  ;;  %v8157_v47 = vpop.f32.mrb[42].mxu0 }
 0x12d   :  { %vm2263_vm12 = vcmp.ge.f32.partialorder %v1749_v27, 0.0  ;;  %v2407_v14 = vmul.f32 0.01, %v1749_v27  ;;  %v10387_v55 = vadd.f32 %v8156_v37, %v9763_v1  ;;  %v10390_v62 = vadd.f32 %v1828_v43, %v9749_v59  ;;  %v449_v44 = vpop.permute.xlu1 %448  ;;  %v444_v12 = vpop.permute.xlu0 %443 }
 0x12e   :  { %v2552_v42 = vsel %vm2264_vm11, %v1752_v8, %v2408_v60  ;;  %v1760_v33 = vadd.f32 %v10202_v28, %v449_v44  ;;  %v10394_v53 = vadd.f32 %v8157_v47, %v9761_v63  ;;  %4942 = vmatpush1.bf16.msra.mxu0 %v3004_v2  ;;  %3148 = vperm.xlu1 %8748, %v3070_v46   ;;  %v1831_v32 = vpop.f32.mrb[43].mxu0  ;;  %v3088_v63 = vld [vmem:[%s12959_s4 + $0xa8] sm:$0xff]  ;;  %vm2282_vm1 = vcmp.ge.f32.partialorder %v10346_v54, 0.0 }
 0x12f   :  { %v2551_v50 = vsel %vm2263_vm12, %v1749_v27, %v2407_v14  ;;  %5215 = vmatpush1.bf16.msra.mxu1 %v3012_v57  ;;  %v10398_v1 = vmul.f32 0.01, %v10387_v55  ;;  %v10401_v59 = vmul.f32 0.01, %v10390_v62  ;;  %v1757_v19 = vadd.f32 %v10191_v7, %v444_v12  ;;  %3143 = vperm.xlu0 %8747, %v3069_v29  }
 0x130   :  { %v3005_v28 = vpack.c.bf16 %v2552_v42, %v2551_v50  ;;  %vm2266_vm14 = vcmp.ge.f32.partialorder %v1760_v33, 0.0  ;;  %v2410_v41 = vmul.f32 0.01, %v1760_v33  ;;  %v10408_v34 = vmul.f32 0.01, %v10394_v53  ;;  %5216 = vmatprep.subr.bf16.mxu1 %v13013_v18  ;;  %4943 = vmatprep.subr.bf16.mxu0 %v13013_v18 }
 0x131   :  { %vm2265_vm15 = vcmp.ge.f32.partialorder %v1757_v19, 0.0  ;;  %v2409_v7 = vmul.f32 0.01, %v1757_v19  ;;  %v10416_v40 = vadd.f32 %v1831_v32, %v9747_v58  ;;  %v2567_v8 = vsel %vm2279_vm9, %v10338_v4, %v10349_v49  ;;  %v459_v61 = vpop.permute.xlu1 %458  ;;  %v454_v35 = vpop.permute.xlu0 %453  ;;  %v3072_v58 = vld [vmem:[%s12959_s4 + $0x28] sm:$0xff] }
 0x132   :  { %v2554_v13 = vsel %vm2266_vm14, %v1760_v33, %v2410_v41  ;;  %v2568_v38 = vsel %vm2280_vm10, %v10353_v39, %v2424_v48  ;;  %v1768_v27 = vadd.f32 %v10237_v22, %v459_v61  ;;  %4944 = vmatpush1.bf16.msra.mxu0 %v3005_v28  ;;  %3238 = vperm.xlu1 %8748, %v3088_v63   ;;  %v8160_v29 = vpop.f32.mrb[44].mxu0  ;;  %v3071_v22 = vld [vmem:[%s12959_s4 + $0x20] sm:$0xff]  ;;  %vm2283_vm5 = vcmp.ge.f32.partialorder %v10390_v62, 0.0 }
 0x133   :  { %v2553_v37 = vsel %vm2265_vm15, %v1757_v19, %v2409_v7  ;;  %v2428_v4 = vmul.f32 0.01, %v10416_v40  ;;  %v3013_v49 = vpack.c.bf16 %v2568_v38, %v2567_v8  ;;  %v1765_v46 = vadd.f32 %v10232_v3, %v454_v35  ;;  %3233 = vperm.xlu0 %8747, %v3087_v36   ;;  %4945 = vmatprep.subr.bf16.mxu0 %v13013_v18  ;;  %v1844_v60 = vpop.f32.mrb[45].mxu0  ;;  %v3074_v35 = vld [vmem:[%s12959_s4 + $0x38] sm:$0xff] }
 0x134   :  { %v3006_v39 = vpack.c.bf16 %v2554_v13, %v2553_v37  ;;  %vm2268_vm2 = vcmp.ge.f32.partialorder %v1768_v27, 0.0  ;;  %v2412_v48 = vmul.f32 0.01, %v1768_v27  ;;  %v2569_v2 = vsel %vm2281_vm13, %v10335_v56, %v10342_v24  ;;  %v8161_v44 = vpop.f32.mrb[46].mxu0 }
 0x135   :  { %5217 = vmatpush1.bf16.msra.mxu1 %v3013_v49  ;;  %vm2267_vm3 = vcmp.ge.f32.partialorder %v1765_v46, 0.0  ;;  %v2411_v3 = vmul.f32 0.01, %v1765_v46  ;;  %v2570_v57 = vsel %vm2282_vm1, %v10346_v54, %v10363_v45  ;;  %v10445_v43 = vadd.f32 %v8160_v29, %v9791_v11  ;;  %v469_v14 = vpop.permute.xlu1 %468  ;;  %v464_v33 = vpop.permute.xlu0 %463 }
 0x136   :  { %v2556_v47 = vsel %vm2268_vm2, %v1768_v27, %v2412_v48  ;;  %5218 = vmatprep.subr.bf16.mxu1 %v13013_v18  ;;  %v3014_v42 = vpack.c.bf16 %v2570_v57, %v2569_v2  ;;  %v10449_v56 = vadd.f32 %v1844_v60, %v9777_v6  ;;  %v1776_v24 = vadd.f32 %v10234_v51, %v469_v14  ;;  %v1847_v12 = vpop.f32.mrb[47].mxu0  ;;  %v3090_v6 = vld [vmem:[%s12959_s4 + $0xb8] sm:$0xff]  ;;  %v3089_v51 = vld [vmem:[%s12959_s4 + $0xb0] sm:$0xff] }
 0x137   :  { %v2555_v32 = vsel %vm2267_vm3, %v1765_v46, %v2411_v3  ;;  %v10453_v50 = vmul.f32 0.01, %v10445_v43  ;;  %v1773_v11 = vadd.f32 %v10223_v52, %v464_v33  ;;  %v10457_v54 = vadd.f32 %v8161_v44, %v9789_v10  ;;  %4946 = vmatpush1.bf16.msra.mxu0 %v3006_v39  ;;  %3158 = vperm.xlu1 %8748, %v3072_v58  }
 0x138   :  { %v3007_v45 = vpack.c.bf16 %v2556_v47, %v2555_v32  ;;  %v10466_v19 = vmul.f32 0.01, %v10449_v56  ;;  %vm2270_vm4 = vcmp.ge.f32.partialorder %v1776_v24, 0.0  ;;  %v2414_v63 = vmul.f32 0.01, %v1776_v24  ;;  %3153 = vperm.xlu0 %8747, %v3071_v22   ;;  %4947 = vmatprep.subr.bf16.mxu0 %v13013_v18 }
 0x139   :  { %5219 = vmatpush1.bf16.msra.mxu1 %v3014_v42  ;;  %vm2269_vm0 = vcmp.ge.f32.partialorder %v1773_v11, 0.0  ;;  %v2413_v10 = vmul.f32 0.01, %v1773_v11  ;;  %v10470_v52 = vmul.f32 0.01, %v10457_v54  ;;  %v10473_v28 = vadd.f32 %v1847_v12, %v9775_v5  ;;  %v479_v41 = vpop.permute.xlu1 %478  ;;  %v474_v8 = vpop.permute.xlu0 %473 }
 0x13a   :  { %v2558_v36 = vsel %vm2270_vm4, %v1776_v24, %v2414_v63  ;;  %5220 = vmatprep.subr.bf16.mxu1 %v13013_v18  ;;  %vm2284_vm6 = vcmp.ge.f32.partialorder %v10416_v40, 0.0  ;;  %v1784_v7 = vadd.f32 %v10271_v17, %v479_v41  ;;  %v2571_v38 = vsel %vm2283_vm5, %v10390_v62, %v10401_v59  ;;  %v8164_v27 = vpop.f32.mrb[48].mxu0  ;;  %v3073_v17 = vld [vmem:[%s12959_s4 + $0x30] sm:$0xff]  ;;  %v3076_v41 = vld [vmem:[%s12959_s4 + $0x48] sm:$0xff] }
 0x13b   :  { %v2557_v61 = vsel %vm2269_vm0, %v1773_v11, %v2413_v10  ;;  %v2432_v13 = vmul.f32 0.01, %v10473_v28  ;;  %v2572_v5 = vsel %vm2284_vm6, %v10416_v40, %v2428_v4  ;;  %4948 = vmatpush1.bf16.msra.mxu0 %v3007_v45  ;;  %3248 = vperm.xlu1 %8748, %v3090_v6   ;;  %v1860_v46 = vpop.f32.mrb[49].mxu0  ;;  %v1781_v62 = vadd.f32 %v10266_v23, %v474_v8 }
 0x13c   :  { %v3008_v58 = vpack.c.bf16 %v2558_v36, %v2557_v61  ;;  %v3015_v37 = vpack.c.bf16 %v2572_v5, %v2571_v38  ;;  %vm2272_vm7 = vcmp.ge.f32.partialorder %v1784_v7, 0.0  ;;  %v2416_v49 = vmul.f32 0.01, %v1784_v7  ;;  %3243 = vperm.xlu0 %8747, %v3089_v51   ;;  %4949 = vmatprep.subr.bf16.mxu0 %v13013_v18  ;;  %v8165_v4 = vpop.f32.mrb[50].mxu0 }
 0x13d   :  { %vm2285_vm8 = vcmp.ge.f32.partialorder %v10387_v55, 0.0  ;;  %vm2286_vm9 = vcmp.ge.f32.partialorder %v10394_v53, 0.0  ;;  %v10494_v59 = vadd.f32 %v8164_v27, %v9819_v21  ;;  %v489_v40 = vpop.permute.xlu1 %488  ;;  %v10501_v48 = vadd.f32 %v1860_v46, %v9805_v16  ;;  %v484_v23 = vpop.permute.xlu0 %483  ;;  %v3093_v27 = vld [vmem:[%s12959_s4 + $0xd0] sm:$0xff] }
 0x13e   :  { %5221 = vmatpush1.bf16.msra.mxu1 %v3015_v37  ;;  %v2560_v29 = vsel %vm2272_vm7, %v1784_v7, %v2416_v49  ;;  %v2573_v22 = vsel %vm2285_vm8, %v10387_v55, %v10398_v1  ;;  %v2574_v39 = vsel %vm2286_vm9, %v10394_v53, %v10408_v34  ;;  %v1863_v2 = vpop.f32.mrb[51].mxu0  ;;  %vm2271_vm10 = vcmp.ge.f32.partialorder %v1781_v62, 0.0  ;;  %v13014_v49 = vld [vmem:[#allocation6_spill] sm:$0xff] }
 0x13f   :  { %v2415_v60 = vmul.f32 0.01, %v1781_v62  ;;  %5222 = vmatprep.subr.bf16.mxu1 %v13013_v18  ;;  %v3016_v21 = vpack.c.bf16 %v2574_v39, %v2573_v22  ;;  %v10505_v3 = vmul.f32 0.01, %v10494_v59  ;;  %4950 = vmatpush1.bf16.msra.mxu0 %v3008_v58  ;;  %v2435_v57 = vmul.f32 0.01, %v10501_v48 }
 0x140   :  { %v1792_v55 = vadd.f32 %v10268_v0, %v489_v40  ;;  %v1789_v53 = vadd.f32 %v10257_v9, %v484_v23  ;;  %v10511_v16 = vadd.f32 %v8165_v4, %v9817_v20  ;;  %3168 = vperm.xlu1 %8748, %v3074_v35   ;;  %3163 = vperm.xlu0 %8747, %v3073_v17   ;;  %vm2287_vm11 = vcmp.ge.f32.partialorder %v10449_v56, 0.0  ;;  %v3092_v0 = vld [vmem:[%s12959_s4 + $0xc8] sm:$0xff]  ;;  %v3091_v9 = vld [vmem:[%s12959_s4 + $0xc0] sm:$0xff] }
 0x141   :  { %v2559_v1 = vsel %vm2271_vm10, %v1781_v62, %v2415_v60  ;;  %v1864_v34 = vadd.f32 %v1863_v2, %v9803_v15  ;;  %vm2288_vm12 = vcmp.ge.f32.partialorder %v10473_v28, 0.0  ;;  %4951 = vmatprep.subr.bf16.mxu0 %v13013_v18  ;;  %v2575_v42 = vsel %vm2287_vm11, %v10449_v56, %v10466_v19  ;;  %v13015_v4 = vld [vmem:[#allocation4_spill] sm:$0xff]  ;;  %v13016_v2 = vld [vmem:[#allocation5_spill] sm:$0xff] }
 0x142   :  { %v3009_v14 = vpack.c.bf16 %v2560_v29, %v2559_v1  ;;  %5223 = vmatpush1.bf16.msra.mxu1 %v3016_v21  ;;  %vm2274_vm13 = vcmp.ge.f32.partialorder %v1792_v55, 0.0  ;;  %v2418_v20 = vmul.f32 0.01, %v1792_v55  ;;  %vm2273_vm14 = vcmp.ge.f32.partialorder %v1789_v53, 0.0  ;;  %v8168_v12 = vpop.f32.mrb[52].mxu0  ;;  %v3078_v21 = vld [vmem:[%s12959_s4 + $0x58] sm:$0xff] }
 0x143   :  { %v2417_v15 = vmul.f32 0.01, %v1789_v53  ;;  %v2438_v44 = vmul.f32 0.01, %v10511_v16  ;;  %5224 = vmatprep.subr.bf16.mxu1 %v13013_v18  ;;  %v2436_v47 = vmul.f32 0.01, %v1864_v34  ;;  %v2576_v33 = vsel %vm2288_vm12, %v10473_v28, %v2432_v13 }
 0x144   :  { %v2562_v24 = vsel %vm2274_vm13, %v1792_v55, %v2418_v20  ;;  %4952 = vmatpush1.bf16.msra.mxu0 %v3009_v14  ;;  %3258 = vperm.xlu1 %8748, %v3092_v0   ;;  %vm2289_vm15 = vcmp.ge.f32.partialorder %v10445_v43, 0.0  ;;  %vm2290_vm1 = vcmp.ge.f32.partialorder %v10457_v54, 0.0  ;;  %v3017_v11 = vpack.c.bf16 %v2576_v33, %v2575_v42  ;;  %v1876_v56 = vpop.f32.mrb[53].mxu0  ;;  %v3096_v14 = vld [vmem:[%s12959_s4 + $0xe8] sm:$0xff]  ;;  %v8828_v20 = vld [vmem:[%s12958_s3 + $0x94] ss:$36 sps:$4 sm:$0xff]  }
 0x145   :  { %v2561_v32 = vsel %vm2273_vm14, %v1789_v53, %v2417_v15  ;;  %3253 = vperm.xlu0 %8747, %v3091_v9   ;;  %v2577_v6 = vsel %vm2289_vm15, %v10445_v43, %v10453_v50  ;;  %v2578_v51 = vsel %vm2290_vm1, %v10457_v54, %v10470_v52  ;;  %v1885_v63 = vadd.f32 %v8168_v12, %v9847_v31  ;;  %v8169_v28 = vpop.f32.mrb[54].mxu0  ;;  %v3075_v43 = vld [vmem:[%s12959_s4 + $0x40] sm:$0xff] }
 0x146   :  { %v3010_v45 = vpack.c.bf16 %v2562_v24, %v2561_v32  ;;  %v3018_v19 = vpack.c.bf16 %v2578_v51, %v2577_v6  ;;  %v1877_v10 = vadd.f32 %v1876_v56, %v9833_v26  ;;  %4953 = vmatprep.subr.bf16.mxu0 %v13013_v18  ;;  %5225 = vmatpush1.bf16.msra.mxu1 %v3017_v11  ;;  %v1879_v54 = vpop.f32.mrb[55].mxu0  ;;  %vm2291_vm2 = vcmp.ge.f32.partialorder %v10501_v48, 0.0  ;;  %v8822_v26 = vld [vmem:[%s12958_s3] ss:$36 sps:$4 sm:$0xff]   ;;  %v13019_v56 = vld [vmem:[#allocation8_spill] sm:$0xff] }
 0x147   :  { %v1888_v50 = vadd.f32 %v8169_v28, %v9845_v30  ;;  %vm2292_vm3 = vcmp.ge.f32.partialorder %v1864_v34, 0.0  ;;  %vm2293_vm4 = vcmp.ge.f32.partialorder %v10494_v59, 0.0  ;;  %5226 = vmatprep.subr.bf16.mxu1 %v13013_v18  ;;  %v2441_v31 = vmul.f32 0.01, %v1885_v63  ;;  %v8825_v30 = vld [vmem:[%s12958_s3 + $0x4c] ss:$36 sps:$4 sm:$0xff]  }
 0x148   :  { %v2439_v52 = vmul.f32 0.01, %v1877_v10  ;;  %4954 = vmatpush1.bf16.msra.mxu0 %v3010_v45  ;;  %v1880_v36 = vadd.f32 %v1879_v54, %v9831_v25  ;;  %v2579_v7 = vsel %vm2291_vm2, %v10501_v48, %v2435_v57  ;;  %3178 = vperm.xlu1 %8748, %v3076_v41   ;;  %v2580_v61 = vsel %vm2292_vm3, %v1864_v34, %v2436_v47  ;;  %v3094_v25 = vld [vmem:[%s12959_s4 + $0xd8] sm:$0xff]  ;;  %v8827_v34 = vld [vmem:[%s12958_s3 + $0x48] ss:$36 sps:$4 sm:$0xff]   ;;  %v3095_v15 = vld [vmem:[%s12959_s4 + $0xe0] sm:$0xff] }
 0x149   :  { %v2442_v8 = vmul.f32 0.01, %v1888_v50  ;;  %3173 = vperm.xlu0 %8747, %v3075_v43   ;;  %vm2294_vm0 = vcmp.ge.f32.partialorder %v10511_v16, 0.0  ;;  %v2581_v13 = vsel %vm2293_vm4, %v10494_v59, %v10505_v3  ;;  %v3019_v5 = vpack.c.bf16 %v2580_v61, %v2579_v7  ;;  %v3077_v3 = vld [vmem:[%s12959_s4 + $0x50] sm:$0xff]  ;;  %v13018_v32 = vld [vmem:[#allocation10_spill] sm:$0xff]  ;;  %v3080_v41 = vld [vmem:[%s12959_s4 + $0x68] sm:$0xff] }
 0x14a   :  { %v2440_v38 = vmul.f32 0.01, %v1880_v36  ;;  %v2582_v35 = vsel %vm2294_vm0, %v10511_v16, %v2438_v44  ;;  %vm2295_vm5 = vcmp.ge.f32.partialorder %v1877_v10, 0.0  ;;  %5227 = vmatpush1.bf16.msra.mxu1 %v3018_v19  ;;  %v8172_v58 = vpop.f32.mrb[56].mxu0  ;;  %vm2296_vm6 = vcmp.ge.f32.partialorder %v1880_v36, 0.0  ;;  %v13017_v16 = vld [vmem:[#allocation3_spill] sm:$0xff] }
 0x14b   :  { %4956 = vmatmul.mubr.bf16.vlgmr.msra.gmra.mrb[144].mxu0 %v8822_v26  ;;  %v3020_v17 = vpack.c.bf16 %v2582_v35, %v2581_v13  ;;  %v2583_v37 = vsel %vm2295_vm5, %v1877_v10, %v2439_v52  ;;  %vm2297_vm7 = vcmp.ge.f32.partialorder %v1885_v63, 0.0  ;;  %5228 = vmatprep.subr.bf16.mxu1 %v13013_v18  ;;  %v1901_v46 = vadd.f32 %v8172_v58, %v13014_v49  ;;  %v1892_v62 = vpop.f32.mrb[57].mxu0  ;;  %v13020_v10 = vld [vmem:[#allocation9_spill] sm:$0xff]  ;;  %v3079_v43 = vld [vmem:[%s12959_s4 + $0x60] sm:$0xff] }
 0x14c   :  { %v2584_v59 = vsel %vm2296_vm6, %v1880_v36, %v2440_v38  ;;  %4963 = vmatprep.mubr.bf16.mxu0 %v8825_v30  ;;  %vm2298_vm8 = vcmp.ge.f32.partialorder %v1888_v50, 0.0  ;;  %v10567_v40 = vsel %vm2297_vm7, %v1885_v63, %v2441_v31  ;;  %3268 = vperm.xlu1 %8748, %v3094_v25   ;;  %v1893_v29 = vadd.f32 %v1892_v62, %v13015_v4  ;;  %v8173_v22 = vpop.f32.mrb[58].mxu0  ;;  %v13021_v26 = vld [vmem:[#allocation7_spill] sm:$0xff]  ;;  %v8830_v52 = vld [vmem:[%s12958_s3 + $0x90] ss:$36 sps:$4 sm:$0xff]   ;;  %v3098_v7 = vld [vmem:[%s12959_s4 + $0xf8] sm:$0xff]  ;;  %v10635_v62 = vpop.permute.xlu1 %818 }
 0x14d   :  { %3263 = vperm.xlu0 %8747, %v3093_v27   ;;  %v3021_v39 = vpack.c.bf16 %v2584_v59, %v2583_v37  ;;  %v10570_v48 = vsel %vm2298_vm8, %v1888_v50, %v2442_v8  ;;  %v2445_v23 = vmul.f32 0.01, %v1901_v46  ;;  %v1904_v60 = vadd.f32 %v8173_v22, %v13016_v2  ;;  %v1895_v57 = vpop.f32.mrb[59].mxu0  ;;  %v8831_v30 = vld [vmem:[%s12958_s3 + $0xdc] ss:$36 sps:$4 sm:$0xff]   ;;  %v3097_v61 = vld [vmem:[%s12959_s4 + $0xf0] sm:$0xff] }
 0x14e   :  { %v3022_v55 = vpack.c.bf16 %v10570_v48, %v10567_v40  ;;  %5229 = vmatpush1.bf16.msra.mxu1 %v3019_v5  ;;  %v2443_v53 = vmul.f32 0.01, %v1893_v29  ;;  %v1896_v1 = vadd.f32 %v1895_v57, %v13017_v16  ;;  %vm2301_vm9 = vcmp.ge.f32.partialorder %v1901_v46, 0.0  ;;  %v10629_v5 = vpop.permute.xlu0 %813  ;;  %v13022_v58 = vld [vmem:[#allocation14_spill] sm:$0xff]  ;;  %v13023_v59 = vld [vmem:[#allocation12_spill] sm:$0xff]  ;;  %v13024_v22 = vld [vmem:[#allocation13_spill] sm:$0xff] }
 0x14f   :  { %5230 = vmatprep.subr.bf16.mxu1 %v13013_v18  ;;  %v2446_v0 = vmul.f32 0.01, %v1904_v60  ;;  %vm2299_vm10 = vcmp.ge.f32.partialorder %v1893_v29, 0.0  ;;  %vm2302_vm11 = vcmp.ge.f32.partialorder %v1904_v60, 0.0  ;;  %v10595_v44 = vsel %vm2301_vm9, %v1901_v46, %v2445_v23  ;;  %v3082_v48 = vld [vmem:[%s12959_s4 + $0x78] sm:$0xff]  ;;  %v3081_v23 = vld [vmem:[%s12959_s4 + $0x70] sm:$0xff] }
 0x150   :  { %3188 = vperm.xlu1 %8748, %v3078_v21   ;;  %v2444_v9 = vmul.f32 0.01, %v1896_v1  ;;  %vm2300_vm12 = vcmp.ge.f32.partialorder %v1896_v1, 0.0  ;;  %v2587_v24 = vsel %vm2299_vm10, %v1893_v29, %v2443_v53  ;;  %v13025_v21 = vld [vmem:[#allocation11_spill] sm:$0xff]  ;;  %v8833_v57 = vld [vmem:[%s12958_s3 + $0xd8] ss:$36 sps:$4 sm:$0xff]  }
 0x151   :  { %3183 = vperm.xlu0 %8747, %v3077_v3   ;;  %v10597_v47 = vsel %vm2302_vm11, %v1904_v60, %v2446_v0  ;;  %v8837_v53 = vld [vmem:[%s12958_s3 + $0x124] ss:$36 sps:$4 sm:$0xff]  }
 0x152   :  { %5231 = vmatpush1.bf16.msra.mxu1 %v3020_v17  ;;  %v8176_v42 = vpop.f32.mrb[60].mxu0  ;;  %v2588_v33 = vsel %vm2300_vm12, %v1896_v1, %v2444_v9  ;;  %v3024_v12 = vpack.c.bf16 %v10597_v47, %v10595_v44  ;;  %v10653_v16 = vpop.permute.xlu0 %823  ;;  %v13027_v47 = vld [vmem:[#allocation16_spill] sm:$0xff] }
 0x153   :  { %4964 = vmatmul.mubr.bf16.gmra.mrb[148].mxu0 %v8827_v34  ;;  %5232 = vmatprep.subr.bf16.mxu1 %v13013_v18  ;;  %v1917_v11 = vadd.f32 %v8176_v42, %v13018_v32  ;;  %v1908_v6 = vpop.f32.mrb[61].mxu0  ;;  %v3023_v51 = vpack.c.bf16 %v2588_v33, %v2587_v24  ;;  %v3116_v34 = vld [vmem:[%s12959_s4 + $0x188] sm:$0xff]  ;;  %v10665_v9 = vpop.permute.xlu1 %828  ;;  %v13026_v32 = vld [vmem:[#allocation18_spill] sm:$0xff] }
 0x154   :  { %4971 = vmatprep.mubr.bf16.mxu0 %v8828_v20  ;;  %3278 = vperm.xlu1 %8748, %v3096_v14   ;;  %v1909_v45 = vadd.f32 %v1908_v6, %v13019_v56  ;;  %v8177_v19 = vpop.f32.mrb[62].mxu0  ;;  %v3115_v20 = vld [vmem:[%s12959_s4 + $0x180] sm:$0xff] }
 0x155   :  { %3273 = vperm.xlu0 %8747, %v3095_v15   ;;  %v2449_v63 = vmul.f32 0.01, %v1917_v11  ;;  %v1920_v28 = vadd.f32 %v8177_v19, %v13020_v10  ;;  %v1911_v50 = vpop.f32.mrb[63].mxu0  ;;  %vm2305_vm13 = vcmp.ge.f32.partialorder %v1917_v11, 0.0  ;;  %v13028_v19 = vld [vmem:[#allocation17_spill] sm:$0xff]  ;;  %v3099_v10 = vld [vmem:[%s12959_s4 + $0x100] sm:$0xff] }
 0x156   :  { %5233 = vmatpush1.bf16.msra.mxu1 %v3021_v39  ;;  %v2447_v54 = vmul.f32 0.01, %v1909_v45  ;;  %v1912_v31 = vadd.f32 %v1911_v50, %v13021_v26  ;;  %vm2303_vm14 = vcmp.ge.f32.partialorder %v1909_v45, 0.0 }
 0x157   :  { %5234 = vmatprep.subr.bf16.mxu1 %v13013_v18  ;;  %v2450_v36 = vmul.f32 0.01, %v1920_v28  ;;  %vm2306_vm15 = vcmp.ge.f32.partialorder %v1920_v28, 0.0  ;;  %v10625_v13 = vsel %vm2305_vm13, %v1917_v11, %v2449_v63 }
 0x158   :  { %3198 = vperm.xlu1 %8748, %v3080_v41   ;;  %v2448_v8 = vmul.f32 0.01, %v1912_v31  ;;  %vm2304_vm1 = vcmp.ge.f32.partialorder %v1912_v31, 0.0  ;;  %v2591_v27 = vsel %vm2303_vm14, %v1909_v45, %v2447_v54  ;;  %v8839_v41 = vld [vmem:[%s12958_s3 + $0x120] ss:$36 sps:$4 sm:$0xff]  }
 0x159   :  { %3193 = vperm.xlu0 %8747, %v3079_v43   ;;  %v10627_v38 = vsel %vm2306_vm15, %v1920_v28, %v2450_v36  ;;  %v10691_v43 = vpop.permute.xlu0 %833  ;;  %v13029_v54 = vld [vmem:[#allocation15_spill] sm:$0xff] }
 0x15a   :  { %5235 = vmatpush1.bf16.msra.mxu1 %v3022_v55  ;;  %v8180_v25 = vpop.f32.mrb[64].mxu0  ;;  %v2592_v35 = vsel %vm2304_vm1, %v1912_v31, %v2448_v8  ;;  %v3026_v17 = vpack.c.bf16 %v10627_v38, %v10625_v13  ;;  %v8843_v31 = vld [vmem:[%s12958_s3 + $0x16c] ss:$36 sps:$4 sm:$0xff]   ;;  %v3102_v13 = vld [vmem:[%s12959_s4 + $0x118] sm:$0xff] }
 0x15b   :  { %4972 = vmatmul.mubr.bf16.gmra.mrb[152].mxu0 %v8830_v52  ;;  %5236 = vmatprep.subr.bf16.mxu1 %v13013_v18  ;;  %v1933_v37 = vadd.f32 %v8180_v25, %v13022_v58  ;;  %v1924_v49 = vpop.f32.mrb[65].mxu0  ;;  %v3025_v46 = vpack.c.bf16 %v2592_v35, %v2591_v27  ;;  %v16_v52 = vstv %s12960_s10  ;;  %v8834_v36 = vld [vmem:[%s12958_s3 + $0x8] ss:$36 sps:$4 sm:$0xff]   ;;  %v3117_v25 = vld [vmem:[%s12959_s4 + $0x190] sm:$0xff] }
 0x15c   :  { %4979 = vmatprep.mubr.bf16.mxu0 %v8831_v30  ;;  %3288 = vperm.xlu1 %8748, %v3098_v7   ;;  %v1925_v40 = vadd.f32 %v1924_v49, %v13023_v59  ;;  %v8181_v4 = vpop.f32.mrb[66].mxu0  ;;  %17 = vst [vmem:[#allocation2] sm:$0x1] %v16_v52  ;;  %v10704_v30 = vpop.permute.xlu1 %838  ;;  %v8840_v58 = vld [vmem:[%s12958_s3 + $0x54] ss:$36 sps:$4 sm:$0xff]  }
 0x15d   :  { %3283 = vperm.xlu0 %8747, %v3097_v61   ;;  %v2453_v29 = vmul.f32 0.01, %v1933_v37  ;;  %v1936_v39 = vadd.f32 %v8181_v4, %v13024_v22  ;;  %v1927_v2 = vpop.f32.mrb[67].mxu0  ;;  %vm2309_vm2 = vcmp.ge.f32.partialorder %v1933_v37, 0.0  ;;  %v3118_v61 = vld [vmem:[%s12959_s4 + $0x198] sm:$0xff]  ;;  %v13031_v22 = vld [vmem:[#allocation20_spill] sm:$0xff] }
 0x15e   :  { %5237 = vmatpush1.bf16.msra.mxu1 %v3023_v51  ;;  %v2451_v60 = vmul.f32 0.01, %v1925_v40  ;;  %v1928_v3 = vadd.f32 %v1927_v2, %v13025_v21  ;;  %vm2307_vm3 = vcmp.ge.f32.partialorder %v1925_v40, 0.0  ;;  %v3100_v51 = vld [vmem:[%s12959_s4 + $0x108] sm:$0xff]  ;;  %v13032_v2 = vld [vmem:[#allocation21_spill] sm:$0xff] }
 0x15f   :  { %5238 = vmatprep.subr.bf16.mxu1 %v13013_v18  ;;  %vm2310_vm4 = vcmp.ge.f32.partialorder %v1936_v39, 0.0  ;;  %v2454_v55 = vmul.f32 0.01, %v1936_v39  ;;  %v10658_v0 = vsel %vm2309_vm2, %v1933_v37, %v2453_v29  ;;  %v3101_v21 = vld [vmem:[%s12959_s4 + $0x110] sm:$0xff] }
 0x160   :  { %3208 = vperm.xlu1 %8748, %v3082_v48   ;;  %vm2308_vm0 = vcmp.ge.f32.partialorder %v1928_v3, 0.0  ;;  %v2452_v1 = vmul.f32 0.01, %v1928_v3  ;;  %v10670_v15 = vsel %vm2307_vm3, %v1925_v40, %v2451_v60  ;;  %v13030_v40 = vld [vmem:[#allocation22_spill] sm:$0xff] }
 0x161   :  { %3203 = vperm.xlu0 %8747, %v3081_v23   ;;  %v10660_v14 = vsel %vm2310_vm4, %v1936_v39, %v2454_v55  ;;  %v10747_v55 = vpop.permute.xlu1 %848 }
 0x162   :  { %5239 = vmatpush1.bf16.msra.mxu1 %v3024_v12  ;;  %v10672_v42 = vsel %vm2308_vm0, %v1928_v3, %v2452_v1  ;;  %v8184_v24 = vpop.f32.mrb[68].mxu0  ;;  %v3028_v33 = vpack.c.bf16 %v10660_v14, %v10658_v0  ;;  %v13033_v1 = vld [vmem:[#allocation19_spill] sm:$0xff] }
 0x163   :  { %4980 = vmatmul.mubr.bf16.gmra.mrb[156].mxu0 %v8833_v57  ;;  %5240 = vmatprep.subr.bf16.mxu1 %v13013_v18  ;;  %v1949_v11 = vadd.f32 %v8184_v24, %v13026_v32  ;;  %v1940_v6 = vpop.f32.mrb[69].mxu0  ;;  %v3027_v44 = vpack.c.bf16 %v10672_v42, %v10670_v15  ;;  %v8845_v57 = vld [vmem:[%s12958_s3 + $0x168] ss:$36 sps:$4 sm:$0xff]   ;;  %v8842_v42 = vld [vmem:[%s12958_s3 + $0x50] ss:$36 sps:$4 sm:$0xff]  }
 0x164   :  { %4987 = vmatprep.mubr.bf16.mxu0 %v8837_v53  ;;  %3378 = vperm.xlu1 %8748, %v3116_v34   ;;  %v1941_v12 = vadd.f32 %v1940_v6, %v13027_v47  ;;  %v8185_v56 = vpop.f32.mrb[70].mxu0  ;;  %v3120_v32 = vld [vmem:[%s12959_s4 + $0x1a8] sm:$0xff] }
 0x165   :  { %3373 = vperm.xlu0 %8747, %v3115_v20   ;;  %v2457_v45 = vmul.f32 0.01, %v1949_v11  ;;  %v1952_v63 = vadd.f32 %v8185_v56, %v13028_v19  ;;  %v1943_v28 = vpop.f32.mrb[71].mxu0  ;;  %vm2313_vm5 = vcmp.ge.f32.partialorder %v1949_v11, 0.0  ;;  %v8849_v20 = vld [vmem:[%s12958_s3 + $0x1b4] ss:$36 sps:$4 sm:$0xff]   ;;  %v10789_v14 = vpop.permute.xlu1 %858 }
 0x166   :  { %5241 = vmatpush1.bf16.msra.mxu1 %v3025_v46  ;;  %v2455_v50 = vmul.f32 0.01, %v1941_v12  ;;  %v1944_v26 = vadd.f32 %v1943_v28, %v13029_v54  ;;  %vm2311_vm6 = vcmp.ge.f32.partialorder %v1941_v12, 0.0 }
 0x167   :  { %5242 = vmatprep.subr.bf16.mxu1 %v13013_v18  ;;  %vm2314_vm7 = vcmp.ge.f32.partialorder %v1952_v63, 0.0  ;;  %v2458_v7 = vmul.f32 0.01, %v1952_v63  ;;  %v10713_v27 = vsel %vm2313_vm5, %v1949_v11, %v2457_v45  ;;  %v3119_v11 = vld [vmem:[%s12959_s4 + $0x1a0] sm:$0xff] }
 0x168   :  { %3298 = vperm.xlu1 %8748, %v3100_v51   ;;  %vm2312_vm8 = vcmp.ge.f32.partialorder %v1944_v26, 0.0  ;;  %v2456_v8 = vmul.f32 0.01, %v1944_v26  ;;  %v10724_v37 = vsel %vm2311_vm6, %v1941_v12, %v2455_v50 }
 0x169   :  { %3293 = vperm.xlu0 %8747, %v3099_v10   ;;  %v10715_v35 = vsel %vm2314_vm7, %v1952_v63, %v2458_v7  ;;  %v13034_v63 = vld [vmem:[#allocation26_spill] sm:$0xff] }
 0x16a   :  { %5243 = vmatpush1.bf16.msra.mxu1 %v3026_v17  ;;  %v10726_v49 = vsel %vm2312_vm8, %v1944_v26, %v2456_v8  ;;  %v8188_v46 = vpop.f32.mrb[72].mxu0  ;;  %v3030_v59 = vpack.c.bf16 %v10715_v35, %v10713_v27  ;;  %v10737_v17 = vpop.permute.xlu0 %843  ;;  %v8851_v8 = vld [vmem:[%s12958_s3 + $0x1b0] ss:$36 sps:$4 sm:$0xff]   ;;  %v3106_v27 = vld [vmem:[%s12959_s4 + $0x138] sm:$0xff] }
 0x16b   :  { %4988 = vmatmul.mubr.bf16.gmra.mrb[160].mxu0 %v8839_v41  ;;  %5501 = vmatprep.subr.bf16.mxu1 %v13013_v18  ;;  %v1965_v4 = vadd.f32 %v8188_v46, %v13030_v40  ;;  %v1956_v29 = vpop.f32.mrb[73].mxu0  ;;  %v3029_v38 = vpack.c.bf16 %v10726_v49, %v10724_v37  ;;  %v3104_v41 = vld [vmem:[%s12959_s4 + $0x128] sm:$0xff]  ;;  %v8855_v37 = vld [vmem:[%s12958_s3 + $0x1fc] ss:$36 sps:$4 sm:$0xff]  }
 0x16c   :  { %4995 = vmatprep.mubr.bf16.mxu0 %v8843_v31  ;;  %3388 = vperm.xlu1 %8748, %v3118_v61   ;;  %v1957_v39 = vadd.f32 %v1956_v29, %v13031_v22  ;;  %v8189_v48 = vpop.f32.mrb[74].mxu0  ;;  %v13036_v31 = vld [vmem:[#allocation25_spill] sm:$0xff] }
 0x16d   :  { %3383 = vperm.xlu0 %8747, %v3117_v25   ;;  %5245 = vmatmul.mubr.bf16.vlgmr.msra.gmra.mrb[0].mxu1 %v8834_v36  ;;  %v2461_v23 = vmul.f32 0.01, %v1965_v4  ;;  %v1968_v60 = vadd.f32 %v8189_v48, %v13032_v2  ;;  %v1959_v3 = vpop.f32.mrb[75].mxu0  ;;  %vm2317_vm9 = vcmp.ge.f32.partialorder %v1965_v4, 0.0  ;;  %v3103_v36 = vld [vmem:[%s12959_s4 + $0x120] sm:$0xff]  ;;  %v3122_v40 = vld [vmem:[%s12959_s4 + $0x1b8] sm:$0xff]  ;;  %v10823_v48 = vpop.permute.xlu1 %868 }
 0x16e   :  { %5502 = vmatpush1.bf16.msra.mxu1 %v3027_v44  ;;  %v2459_v53 = vmul.f32 0.01, %v1957_v39  ;;  %5252 = vmatprep.mubr.bf16.mxu1 %v8840_v58  ;;  %v1960_v34 = vadd.f32 %v1959_v3, %v13033_v1  ;;  %vm2315_vm10 = vcmp.ge.f32.partialorder %v1957_v39, 0.0  ;;  %v8846_v44 = vld [vmem:[%s12958_s3 + $0x9c] ss:$36 sps:$4 sm:$0xff]   ;;  %v10771_v47 = vpop.permute.xlu0 %853 }
 0x16f   :  { %5503 = vmatprep.subr.bf16.mxu1 %v13013_v18  ;;  %vm2318_vm11 = vcmp.ge.f32.partialorder %v1968_v60, 0.0  ;;  %v2462_v15 = vmul.f32 0.01, %v1968_v60  ;;  %v10764_v6 = vsel %vm2317_vm9, %v1965_v4, %v2461_v23  ;;  %v13037_v25 = vld [vmem:[#allocation23_spill] sm:$0xff]  ;;  %v8848_v46 = vld [vmem:[%s12958_s3 + $0x98] ss:$36 sps:$4 sm:$0xff]  }
 0x170   :  { %3308 = vperm.xlu1 %8748, %v3102_v13   ;;  %vm2316_vm12 = vcmp.ge.f32.partialorder %v1960_v34, 0.0  ;;  %v2460_v24 = vmul.f32 0.01, %v1960_v34  ;;  %v10776_v12 = vsel %vm2315_vm10, %v1957_v39, %v2459_v53  ;;  %v3121_v4 = vld [vmem:[%s12959_s4 + $0x1b0] sm:$0xff]  ;;  %v13038_v3 = vld [vmem:[#allocation30_spill] sm:$0xff] }
 0x171   :  { %3303 = vperm.xlu0 %8747, %v3101_v21   ;;  %v10766_v51 = vsel %vm2318_vm11, %v1968_v60, %v2462_v15  ;;  %v13040_v15 = vld [vmem:[#allocation29_spill] sm:$0xff] }
 0x172   :  { %5504 = vmatpush1.bf16.msra.mxu1 %v3028_v33  ;;  %v10778_v56 = vsel %vm2316_vm12, %v1960_v34, %v2460_v24  ;;  %v8192_v45 = vpop.f32.mrb[76].mxu0  ;;  %v3032_v19 = vpack.c.bf16 %v10766_v51, %v10764_v6  ;;  %v13035_v33 = vld [vmem:[#allocation24_spill] sm:$0xff]  ;;  %v10813_v29 = vpop.permute.xlu0 %863 }
 0x173   :  { %4996 = vmatmul.mubr.bf16.gmra.mrb[164].mxu0 %v8845_v57  ;;  %5505 = vmatprep.subr.bf16.mxu1 %v13013_v18  ;;  %v1981_v10 = vadd.f32 %v8192_v45, %v13034_v63  ;;  %v1972_v28 = vpop.f32.mrb[77].mxu0  ;;  %v3031_v0 = vpack.c.bf16 %v10778_v56, %v10776_v12  ;;  %v3105_v24 = vld [vmem:[%s12959_s4 + $0x130] sm:$0xff]  ;;  %v13041_v56 = vld [vmem:[#allocation27_spill] sm:$0xff] }
 0x174   :  { %5003 = vmatprep.mubr.bf16.mxu0 %v8849_v20  ;;  %3398 = vperm.xlu1 %8748, %v3120_v32   ;;  %v1973_v50 = vadd.f32 %v1972_v28, %v13035_v33  ;;  %v8193_v54 = vpop.f32.mrb[78].mxu0  ;;  %v8861_v63 = vld [vmem:[%s12958_s3 + $0x244] ss:$36 sps:$4 sm:$0xff]   ;;  %v10866_v33 = vpop.permute.xlu1 %878 }
 0x175   :  { %3393 = vperm.xlu0 %8747, %v3119_v11   ;;  %5253 = vmatmul.mubr.bf16.gmra.mrb[4].mxu1 %v8842_v42  ;;  %v2465_v26 = vmul.f32 0.01, %v1981_v10  ;;  %v1984_v52 = vadd.f32 %v8193_v54, %v13036_v31  ;;  %v1975_v7 = vpop.f32.mrb[79].mxu0  ;;  %vm2321_vm13 = vcmp.ge.f32.partialorder %v1981_v10, 0.0  ;;  %v8857_v11 = vld [vmem:[%s12958_s3 + $0x1f8] ss:$36 sps:$4 sm:$0xff]  }
 0x176   :  { %5506 = vmatpush1.bf16.msra.mxu1 %v3029_v38  ;;  %v2463_v61 = vmul.f32 0.01, %v1973_v50  ;;  %5260 = vmatprep.mubr.bf16.mxu1 %v8846_v44  ;;  %v1976_v58 = vadd.f32 %v1975_v7, %v13037_v25  ;;  %vm2319_vm14 = vcmp.ge.f32.partialorder %v1973_v50, 0.0  ;;  %v8852_v38 = vld [vmem:[%s12958_s3 + $0xe4] ss:$36 sps:$4 sm:$0xff]   ;;  %v10850_v44 = vpop.permute.xlu0 %873 }
 0x177   :  { %5507 = vmatprep.subr.bf16.mxu1 %v13013_v18  ;;  %vm2322_vm15 = vcmp.ge.f32.partialorder %v1984_v52, 0.0  ;;  %v2466_v49 = vmul.f32 0.01, %v1984_v52  ;;  %v10819_v22 = vsel %vm2321_vm13, %v1981_v10, %v2465_v26  ;;  %v8854_v28 = vld [vmem:[%s12958_s3 + $0xe0] ss:$36 sps:$4 sm:$0xff]  }
 0x178   :  { %3318 = vperm.xlu1 %8748, %v3104_v41   ;;  %vm2320_vm1 = vcmp.ge.f32.partialorder %v1976_v58, 0.0  ;;  %v2464_v13 = vmul.f32 0.01, %v1976_v58  ;;  %v10829_v23 = vsel %vm2319_vm14, %v1973_v50, %v2463_v61  ;;  %v3124_v41 = vld [vmem:[%s12959_s4 + $0x1c8] sm:$0xff]  ;;  %v13042_v61 = vld [vmem:[#allocation34_spill] sm:$0xff] }
 0x179   :  { %3313 = vperm.xlu0 %8747, %v3103_v36   ;;  %v10821_v39 = vsel %vm2322_vm15, %v1984_v52, %v2466_v49  ;;  %v8858_v54 = vld [vmem:[%s12958_s3 + $0x12c] ss:$36 sps:$4 sm:$0xff]  }
 0x17a   :  { %5508 = vmatpush1.bf16.msra.mxu1 %v3030_v59  ;;  %v10831_v2 = vsel %vm2320_vm1, %v1976_v58, %v2464_v13  ;;  %v8196_v60 = vpop.f32.mrb[80].mxu0  ;;  %v3034_v21 = vpack.c.bf16 %v10821_v39, %v10819_v22  ;;  %v13039_v59 = vld [vmem:[#allocation28_spill] sm:$0xff]  ;;  %v10892_v51 = vpop.permute.xlu0 %883 }
 0x17b   :  { %5004 = vmatmul.mubr.bf16.gmra.mrb[168].mxu0 %v8851_v8  ;;  %5509 = vmatprep.subr.bf16.mxu1 %v13013_v18  ;;  %v1997_v57 = vadd.f32 %v8196_v60, %v13038_v3  ;;  %v1988_v53 = vpop.f32.mrb[81].mxu0  ;;  %v3033_v35 = vpack.c.bf16 %v10831_v2, %v10829_v23  ;;  %v8863_v2 = vld [vmem:[%s12958_s3 + $0x240] ss:$36 sps:$4 sm:$0xff]   ;;  %v10902_v60 = vpop.permute.xlu1 %888 }
 0x17c   :  { %5011 = vmatprep.mubr.bf16.mxu0 %v8855_v37  ;;  %3408 = vperm.xlu1 %8748, %v3122_v40   ;;  %v1989_v1 = vadd.f32 %v1988_v53, %v13039_v59  ;;  %v8197_v34 = vpop.f32.mrb[82].mxu0  ;;  %v3108_v37 = vld [vmem:[%s12959_s4 + $0x148] sm:$0xff] }
 0x17d   :  { %3403 = vperm.xlu0 %8747, %v3121_v4   ;;  %5261 = vmatmul.mubr.bf16.gmra.mrb[8].mxu1 %v8848_v46  ;;  %v2469_v20 = vmul.f32 0.01, %v1997_v57  ;;  %v2000_v42 = vadd.f32 %v8197_v34, %v13040_v15  ;;  %v1991_v32 = vpop.f32.mrb[83].mxu0  ;;  %vm2325_vm2 = vcmp.ge.f32.partialorder %v1997_v57, 0.0  ;;  %v13044_v4 = vld [vmem:[#allocation33_spill] sm:$0xff] }
 0x17e   :  { %5510 = vmatpush1.bf16.msra.mxu1 %v3031_v0  ;;  %v2467_v12 = vmul.f32 0.01, %v1989_v1  ;;  %5268 = vmatprep.mubr.bf16.mxu1 %v8852_v38  ;;  %v1992_v45 = vadd.f32 %v1991_v32, %v13041_v56  ;;  %vm2323_vm3 = vcmp.ge.f32.partialorder %v1989_v1, 0.0  ;;  %v3123_v0 = vld [vmem:[%s12959_s4 + $0x1c0] sm:$0xff]  ;;  %v3125_v34 = vld [vmem:[%s12959_s4 + $0x1d0] sm:$0xff]  ;;  %v10926_v32 = vpop.permute.xlu0 %893 }
 0x17f   :  { %5511 = vmatprep.subr.bf16.mxu1 %v13013_v18  ;;  %vm2326_vm4 = vcmp.ge.f32.partialorder %v2000_v42, 0.0  ;;  %v2470_v10 = vmul.f32 0.01, %v2000_v42  ;;  %v10872_v26 = vsel %vm2325_vm2, %v1997_v57, %v2469_v20  ;;  %v3107_v38 = vld [vmem:[%s12959_s4 + $0x140] sm:$0xff]  ;;  %v8864_v15 = vld [vmem:[%s12958_s3 + $0x174] ss:$36 sps:$4 sm:$0xff]   ;;  %v10944_v39 = vpop.permute.xlu1 %898 }
 0x180   :  { %3328 = vperm.xlu1 %8748, %v3106_v27   ;;  %vm2324_vm0 = vcmp.ge.f32.partialorder %v1992_v45, 0.0  ;;  %v2468_v50 = vmul.f32 0.01, %v1992_v45  ;;  %v10879_v52 = vsel %vm2323_vm3, %v1989_v1, %v2467_v12  ;;  %v13045_v57 = vld [vmem:[#allocation31_spill] sm:$0xff]  ;;  %v8867_v27 = vld [vmem:[%s12958_s3 + $0x28c] ss:$36 sps:$4 sm:$0xff]  }
 0x181   :  { %3323 = vperm.xlu0 %8747, %v3105_v24   ;;  %v10874_v31 = vsel %vm2326_vm4, %v2000_v42, %v2470_v10  ;;  %v8860_v1 = vld [vmem:[%s12958_s3 + $0x128] ss:$36 sps:$4 sm:$0xff]  }
 0x182   :  { %5512 = vmatpush1.bf16.msra.mxu1 %v3032_v19  ;;  %v10881_v36 = vsel %vm2324_vm0, %v1992_v45, %v2468_v50  ;;  %v8200_v7 = vpop.f32.mrb[84].mxu0  ;;  %v3036_v8 = vpack.c.bf16 %v10874_v31, %v10872_v26  ;;  %v13043_v19 = vld [vmem:[#allocation32_spill] sm:$0xff] }
 0x183   :  { %5012 = vmatmul.mubr.bf16.gmra.mrb[172].mxu0 %v8857_v11  ;;  %5513 = vmatprep.subr.bf16.mxu1 %v13013_v18  ;;  %v2013_v25 = vadd.f32 %v8200_v7, %v13042_v61  ;;  %v2004_v58 = vpop.f32.mrb[85].mxu0  ;;  %v3035_v6 = vpack.c.bf16 %v10881_v36, %v10879_v52  ;;  %v13048_v52 = vld [vmem:[#allocation37_spill] sm:$0xff]  ;;  %v13051_v31 = vld [vmem:[#allocation40_spill] sm:$0xff] }
 0x184   :  { %5019 = vmatprep.mubr.bf16.mxu0 %v8861_v63  ;;  %3418 = vperm.xlu1 %8748, %v3124_v41   ;;  %v2005_v49 = vadd.f32 %v2004_v58, %v13043_v19  ;;  %v8201_v46 = vpop.f32.mrb[86].mxu0  ;;  %v13046_v63 = vld [vmem:[#allocation38_spill] sm:$0xff]  ;;  %v3109_v7 = vld [vmem:[%s12959_s4 + $0x150] sm:$0xff] }
 0x185   :  { %3413 = vperm.xlu0 %8747, %v3123_v0   ;;  %5269 = vmatmul.mubr.bf16.gmra.mrb[12].mxu1 %v8854_v28  ;;  %v2473_v40 = vmul.f32 0.01, %v2013_v25  ;;  %v2016_v13 = vadd.f32 %v8201_v46, %v13044_v4  ;;  %v2007_v23 = vpop.f32.mrb[87].mxu0  ;;  %vm2329_vm5 = vcmp.ge.f32.partialorder %v2013_v25, 0.0  ;;  %v3110_v41 = vld [vmem:[%s12959_s4 + $0x158] sm:$0xff]  ;;  %v10962_v4 = vpop.permute.xlu0 %903 }
 0x186   :  { %5514 = vmatpush1.bf16.msra.mxu1 %v3033_v35  ;;  %v2471_v3 = vmul.f32 0.01, %v2005_v49  ;;  %5276 = vmatprep.mubr.bf16.mxu1 %v8858_v54  ;;  %v2008_v53 = vadd.f32 %v2007_v23, %v13045_v57  ;;  %vm2327_vm6 = vcmp.ge.f32.partialorder %v2005_v49, 0.0  ;;  %v3126_v35 = vld [vmem:[%s12959_s4 + $0x1d8] sm:$0xff] }
 0x187   :  { %5515 = vmatprep.subr.bf16.mxu1 %v13013_v18  ;;  %vm2330_vm7 = vcmp.ge.f32.partialorder %v2016_v13, 0.0  ;;  %v2474_v59 = vmul.f32 0.01, %v2016_v13  ;;  %v10922_v42 = vsel %vm2329_vm5, %v2013_v25, %v2473_v40  ;;  %v8869_v25 = vld [vmem:[%s12958_s3 + $0x288] ss:$36 sps:$4 sm:$0xff]  }
 0x188   :  { %3338 = vperm.xlu1 %8748, %v3108_v37   ;;  %vm2328_vm8 = vcmp.ge.f32.partialorder %v2008_v53, 0.0  ;;  %v2472_v20 = vmul.f32 0.01, %v2008_v53  ;;  %v10931_v11 = vsel %vm2327_vm6, %v2005_v49, %v2471_v3  ;;  %v13049_v37 = vld [vmem:[#allocation35_spill] sm:$0xff]  ;;  %v8873_v49 = vld [vmem:[%s12958_s3 + $0x2d4] ss:$36 sps:$4 sm:$0xff]   ;;  %v10975_v3 = vpop.permute.xlu1 %908 }
 0x189   :  { %3333 = vperm.xlu0 %8747, %v3107_v38   ;;  %v10924_v24 = vsel %vm2330_vm7, %v2016_v13, %v2474_v59  ;;  %v8866_v40 = vld [vmem:[%s12958_s3 + $0x170] ss:$36 sps:$4 sm:$0xff]   ;;  %v3128_v13 = vld [vmem:[%s12959_s4 + $0x1e8] sm:$0xff]  ;;  %v8870_v59 = vld [vmem:[%s12958_s3 + $0x1bc] ss:$36 sps:$4 sm:$0xff]  }
 0x18a   :  { %5516 = vmatpush1.bf16.msra.mxu1 %v3034_v21  ;;  %v10933_v12 = vsel %vm2328_vm8, %v2008_v53, %v2472_v20  ;;  %v8204_v56 = vpop.f32.mrb[88].mxu0  ;;  %v3038_v45 = vpack.c.bf16 %v10924_v24, %v10922_v42  ;;  %v13047_v21 = vld [vmem:[#allocation36_spill] sm:$0xff] }
 0x18b   :  { %5020 = vmatmul.mubr.bf16.gmra.mrb[176].mxu0 %v8863_v2  ;;  %5517 = vmatprep.subr.bf16.mxu1 %v13013_v18  ;;  %v2029_v10 = vadd.f32 %v8204_v56, %v13046_v63  ;;  %v2020_v28 = vpop.f32.mrb[89].mxu0  ;;  %v3037_v22 = vpack.c.bf16 %v10933_v12, %v10931_v11  ;;  %v3127_v2 = vld [vmem:[%s12959_s4 + $0x1e0] sm:$0xff]  ;;  %v13052_v12 = vld [vmem:[#allocation41_spill] sm:$0xff]  ;;  %v3112_v63 = vld [vmem:[%s12959_s4 + $0x168] sm:$0xff] }
 0x18c   :  { %5027 = vmatprep.mubr.bf16.mxu0 %v8867_v27  ;;  %3428 = vperm.xlu1 %8748, %v3126_v35   ;;  %v2021_v0 = vadd.f32 %v2020_v28, %v13047_v21  ;;  %v8205_v50 = vpop.f32.mrb[90].mxu0  ;;  %v13050_v35 = vld [vmem:[#allocation42_spill] sm:$0xff] }
 0x18d   :  { %3423 = vperm.xlu0 %8747, %v3125_v34   ;;  %5277 = vmatmul.mubr.bf16.gmra.mrb[16].mxu1 %v8860_v1  ;;  %v2477_v54 = vmul.f32 0.01, %v2029_v10  ;;  %v2032_v36 = vadd.f32 %v8205_v50, %v13048_v52  ;;  %v2023_v61 = vpop.f32.mrb[91].mxu0  ;;  %vm2333_vm9 = vcmp.ge.f32.partialorder %v2029_v10, 0.0 }
 0x18e   :  { %5518 = vmatpush1.bf16.msra.mxu1 %v3035_v6  ;;  %v2475_v58 = vmul.f32 0.01, %v2021_v0  ;;  %5284 = vmatprep.mubr.bf16.mxu1 %v8864_v15  ;;  %v2024_v19 = vadd.f32 %v2023_v61, %v13049_v37  ;;  %vm2331_vm10 = vcmp.ge.f32.partialorder %v2021_v0, 0.0  ;;  %v3130_v37 = vld [vmem:[%s12959_s4 + $0x1f8] sm:$0xff] }
 0x18f   :  { %5519 = vmatprep.subr.bf16.mxu1 %v13013_v18  ;;  %vm2334_vm11 = vcmp.ge.f32.partialorder %v2032_v36, 0.0  ;;  %v2478_v46 = vmul.f32 0.01, %v2032_v36  ;;  %v10968_v38 = vsel %vm2333_vm9, %v2029_v10, %v2477_v54  ;;  %v3111_v10 = vld [vmem:[%s12959_s4 + $0x160] sm:$0xff]  ;;  %v8875_v54 = vld [vmem:[%s12958_s3 + $0x2d0] ss:$36 sps:$4 sm:$0xff]  }
 0x190   :  { %3348 = vperm.xlu1 %8748, %v3110_v41   ;;  %vm2332_vm12 = vcmp.ge.f32.partialorder %v2024_v19, 0.0  ;;  %v2476_v6 = vmul.f32 0.01, %v2024_v19  ;;  %v10980_v57 = vsel %vm2331_vm10, %v2021_v0, %v2475_v58  ;;  %v11001_v41 = vpop.permute.xlu0 %913  ;;  %v13053_v0 = vld [vmem:[#allocation39_spill] sm:$0xff]  ;;  %v8872_v58 = vld [vmem:[%s12958_s3 + $0x1b8] ss:$36 sps:$4 sm:$0xff]  }
 0x191   :  { %3343 = vperm.xlu0 %8747, %v3109_v7   ;;  %v10970_v23 = vsel %vm2334_vm11, %v2032_v36, %v2478_v46  ;;  %v8879_v36 = vld [vmem:[%s12958_s3 + $0x31c] ss:$36 sps:$4 sm:$0xff]   ;;  %v11011_v7 = vpop.permute.xlu1 %918 }
 0x192   :  { %5520 = vmatpush1.bf16.msra.mxu1 %v3036_v8  ;;  %v10982_v53 = vsel %vm2332_vm12, %v2024_v19, %v2476_v6  ;;  %v8208_v27 = vpop.f32.mrb[92].mxu0  ;;  %v3040_v1 = vpack.c.bf16 %v10970_v23, %v10968_v38  ;;  %v3129_v19 = vld [vmem:[%s12959_s4 + $0x1f0] sm:$0xff]  ;;  %v8876_v6 = vld [vmem:[%s12958_s3 + $0x204] ss:$36 sps:$4 sm:$0xff]  }
 0x193   :  { %5028 = vmatmul.mubr.bf16.gmra.mrb[180].mxu0 %v8869_v25  ;;  %5521 = vmatprep.subr.bf16.mxu1 %v13013_v18  ;;  %v2045_v34 = vadd.f32 %v8208_v27, %v13050_v35  ;;  %v2036_v20 = vpop.f32.mrb[93].mxu0  ;;  %v3039_v26 = vpack.c.bf16 %v10982_v53, %v10980_v57  ;;  %v3113_v35 = vld [vmem:[%s12959_s4 + $0x170] sm:$0xff] }
 0x194   :  { %5035 = vmatprep.mubr.bf16.mxu0 %v8873_v49  ;;  %3438 = vperm.xlu1 %8748, %v3128_v13   ;;  %v2037_v8 = vadd.f32 %v2036_v20, %v13051_v31  ;;  %v8209_v15 = vpop.f32.mrb[94].mxu0  ;;  %v11042_v24 = vpop.permute.xlu0 %923 }
 0x195   :  { %3433 = vperm.xlu0 %8747, %v3127_v2   ;;  %5285 = vmatmul.mubr.bf16.gmra.mrb[20].mxu1 %v8866_v40  ;;  %v2481_v11 = vmul.f32 0.01, %v2045_v34  ;;  %v2048_v56 = vadd.f32 %v8209_v15, %v13052_v12  ;;  %v2039_v28 = vpop.f32.mrb[95].mxu0  ;;  %vm2337_vm13 = vcmp.ge.f32.partialorder %v2045_v34, 0.0  ;;  %v11052_v20 = vpop.permute.xlu1 %928  ;;  %v8885_v15 = vld [vmem:[%s12958_s3 + $0x364] ss:$36 sps:$4 sm:$0xff]  }
 0x196   :  { %5522 = vmatpush1.bf16.msra.mxu1 %v3037_v22  ;;  %v2479_v21 = vmul.f32 0.01, %v2037_v8  ;;  %5292 = vmatprep.mubr.bf16.mxu1 %v8870_v59  ;;  %v2040_v50 = vadd.f32 %v2039_v28, %v13053_v0  ;;  %vm2335_vm14 = vcmp.ge.f32.partialorder %v2037_v8, 0.0  ;;  %v8878_v12 = vld [vmem:[%s12958_s3 + $0x200] ss:$36 sps:$4 sm:$0xff]  }
 0x197   :  { %5523 = vmatprep.subr.bf16.mxu1 %v13013_v18  ;;  %vm2338_vm15 = vcmp.ge.f32.partialorder %v2048_v56, 0.0  ;;  %v2482_v52 = vmul.f32 0.01, %v2048_v56  ;;  %v11013_v61 = vsel %vm2337_vm13, %v2045_v34, %v2481_v11 }
 0x198   :  { %3358 = vperm.xlu1 %8748, %v3112_v63   ;;  %vm2336_vm1 = vcmp.ge.f32.partialorder %v2040_v50, 0.0  ;;  %v2480_v22 = vmul.f32 0.01, %v2040_v50  ;;  %v11029_v49 = vsel %vm2335_vm14, %v2037_v8, %v2479_v21  ;;  %v6624_v63 = vld [vmem:[%s12961_s6] sm:$0xff] }
 0x199   :  { %3353 = vperm.xlu0 %8747, %v3111_v10   ;;  %v11015_v25 = vsel %vm2338_vm15, %v2048_v56, %v2482_v52  ;;  %v6625_v56 = vld [vmem:[%s12961_s6 + $0x8] sm:$0xff]  ;;  %v11075_v10 = vpop.permute.xlu0 %933  ;;  %v11093_v23 = vpop.permute.xlu1 %938 }
 0x19a   :  { %5524 = vmatpush1.bf16.msra.mxu1 %v3038_v45  ;;  %v11031_v46 = vsel %vm2336_vm1, %v2040_v50, %v2480_v22  ;;  %v8212_v40 = vpop.f32.mrb[96].mxu0  ;;  %v3042_v13 = vpack.c.bf16 %v11015_v25, %v11013_v61  ;;  %v8882_v50 = vld [vmem:[%s12958_s3 + $0x24c] ss:$36 sps:$4 sm:$0xff]  }
 0x19b   :  { %5036 = vmatmul.mubr.bf16.gmra.mrb[184].mxu0 %v8875_v54  ;;  %5525 = vmatprep.subr.bf16.mxu1 %v13013_v18  ;;  %v2061_v2 = vadd.f32 %v8212_v40, %v10653_v16  ;;  %v2052_v57 = vpop.f32.mrb[97].mxu0  ;;  %v3041_v42 = vpack.c.bf16 %v11031_v46, %v11029_v49  ;;  %v3114_v16 = vld [vmem:[%s12959_s4 + $0x178] sm:$0xff]  ;;  %v8887_v40 = vld [vmem:[%s12958_s3 + $0x360] ss:$36 sps:$4 sm:$0xff]  }
 0x19c   :  { %5043 = vmatprep.mubr.bf16.mxu0 %v8879_v36  ;;  %3448 = vperm.xlu1 %8748, %v3130_v37   ;;  %v2053_v45 = vadd.f32 %v2052_v57, %v10629_v5  ;;  %v8213_v53 = vpop.f32.mrb[98].mxu0 }
 0x19d   :  { %3443 = vperm.xlu0 %8747, %v3129_v19   ;;  %5293 = vmatmul.mubr.bf16.gmra.mrb[24].mxu1 %v8872_v58  ;;  %v2485_v27 = vmul.f32 0.01, %v2061_v2  ;;  %v2064_v59 = vadd.f32 %v8213_v53, %v10665_v9  ;;  %v2055_v34 = vpop.f32.mrb[99].mxu0  ;;  %vm2341_vm2 = vcmp.ge.f32.partialorder %v2061_v2, 0.0  ;;  %v8881_v9 = vld [vmem:[%s12958_s3 + $0x318] ss:$36 sps:$4 sm:$0xff]  }
 0x19e   :  { %5526 = vmatpush1.bf16.msra.mxu1 %v3039_v26  ;;  %v2483_v31 = vmul.f32 0.01, %v2053_v45  ;;  %5300 = vmatprep.mubr.bf16.mxu1 %v8876_v6  ;;  %v2056_v5 = vadd.f32 %v2055_v34, %v10635_v62  ;;  %vm2339_vm3 = vcmp.ge.f32.partialorder %v2053_v45, 0.0  ;;  %v6626_v19 = vld [vmem:[%s12961_s6 + $0x10] sm:$0xff]  ;;  %v6629_v53 = vld [vmem:[%s12961_s6 + $0x28] sm:$0xff] }
 0x19f   :  { %5527 = vmatprep.subr.bf16.mxu1 %v13013_v18  ;;  %vm2342_vm4 = vcmp.ge.f32.partialorder %v2064_v59, 0.0  ;;  %v2486_v8 = vmul.f32 0.01, %v2064_v59  ;;  %v11062_v11 = vsel %vm2341_vm2, %v2061_v2, %v2485_v27  ;;  %v8891_v6 = vld [vmem:[%s12958_s3 + $0x3ac] ss:$36 sps:$4 sm:$0xff]   ;;  %v11111_v2 = vpop.permute.xlu0 %943  ;;  %v6628_v27 = vld [vmem:[%s12961_s6 + $0x20] sm:$0xff] }
 0x1a0   :  { %3368 = vperm.xlu1 %8748, %v3114_v16   ;;  %vm2340_vm0 = vcmp.ge.f32.partialorder %v2056_v5, 0.0  ;;  %v2484_v26 = vmul.f32 0.01, %v2056_v5  ;;  %v11080_v28 = vsel %vm2339_vm3, %v2053_v45, %v2483_v31  ;;  %v8884_v45 = vld [vmem:[%s12958_s3 + $0x248] ss:$36 sps:$4 sm:$0xff]  }
 0x1a1   :  { %3363 = vperm.xlu0 %8747, %v3113_v35   ;;  %v11064_v62 = vsel %vm2342_vm4, %v2064_v59, %v2486_v8  ;;  %v11126_v59 = vpop.permute.xlu1 %948  ;;  %v8888_v31 = vld [vmem:[%s12958_s3 + $0x294] ss:$36 sps:$4 sm:$0xff]  }
 0x1a2   :  { %5528 = vmatpush1.bf16.msra.mxu1 %v3040_v1  ;;  %v11082_v21 = vsel %vm2340_vm0, %v2056_v5, %v2484_v26  ;;  %v8216_v0 = vpop.f32.mrb[100].mxu0 }
 0x1a3   :  { %5044 = vmatmul.mubr.bf16.gmra.mrb[188].mxu0 %v8881_v9  ;;  %5529 = vmatprep.subr.bf16.mxu1 %v13013_v18  ;;  %v2077_v52 = vadd.f32 %v8216_v0, %v10737_v17  ;;  %v2068_v36 = vpop.f32.mrb[101].mxu0  ;;  %v6627_v17 = vld [vmem:[%s12961_s6 + $0x18] sm:$0xff] }
 0x1a4   :  { %5051 = vmatprep.mubr.bf16.mxu0 %v8885_v15  ;;  %6647 = vperm.xlu1 %8748, %v6625_v56   ;;  %v2069_v1 = vadd.f32 %v2068_v36, %v10691_v43  ;;  %v8217_v22 = vpop.f32.mrb[102].mxu0 }
 0x1a5   :  { %6642 = vperm.xlu0 %8747, %v6624_v63   ;;  %5301 = vmatmul.mubr.bf16.gmra.mrb[28].mxu1 %v8878_v12  ;;  %v2489_v58 = vmul.f32 0.01, %v2077_v52  ;;  %v2080_v37 = vadd.f32 %v8217_v22, %v10747_v55  ;;  %v2071_v49 = vpop.f32.mrb[103].mxu0  ;;  %vm2345_vm5 = vcmp.ge.f32.partialorder %v2077_v52, 0.0  ;;  %v6630_v12 = vld [vmem:[%s12961_s6 + $0x30] sm:$0xff]  ;;  %v11153_v63 = vpop.permute.xlu0 %953 }
 0x1a6   :  { %5530 = vmatpush1.bf16.msra.mxu1 %v3041_v42  ;;  %v2487_v46 = vmul.f32 0.01, %v2069_v1  ;;  %5308 = vmatprep.mubr.bf16.mxu1 %v8882_v50  ;;  %v2072_v43 = vadd.f32 %v2071_v49, %v10704_v30  ;;  %vm2343_vm6 = vcmp.ge.f32.partialorder %v2069_v1, 0.0  ;;  %v11162_v36 = vpop.permute.xlu1 %958 }
 0x1a7   :  { %5531 = vmatprep.subr.bf16.mxu1 %v13013_v18  ;;  %vm2346_vm7 = vcmp.ge.f32.partialorder %v2080_v37, 0.0  ;;  %v2490_v55 = vmul.f32 0.01, %v2080_v37  ;;  %v11113_v30 = vsel %vm2345_vm5, %v2077_v52, %v2489_v58  ;;  %v8897_v52 = vld [vmem:[%s12958_s3 + $0x3f4] ss:$36 sps:$4 sm:$0xff]  }
 0x1a8   :  { %6657 = vperm.xlu1 %8748, %v6627_v17   ;;  %vm2344_vm8 = vcmp.ge.f32.partialorder %v2072_v43, 0.0  ;;  %v2488_v57 = vmul.f32 0.01, %v2072_v43  ;;  %v11132_v16 = vsel %vm2343_vm6, %v2069_v1, %v2487_v46  ;;  %v8890_v58 = vld [vmem:[%s12958_s3 + $0x290] ss:$36 sps:$4 sm:$0xff]   ;;  %v6632_v17 = vld [vmem:[%s12961_s6 + $0x40] sm:$0xff] }
 0x1a9   :  { %6652 = vperm.xlu0 %8747, %v6626_v19   ;;  %v11115_v42 = vsel %vm2346_vm7, %v2080_v37, %v2490_v55  ;;  %v6633_v37 = vld [vmem:[%s12961_s6 + $0x48] sm:$0xff] }
 0x1aa   :  { %5532 = vmatpush1.bf16.msra.mxu1 %v3042_v13  ;;  %v11134_v35 = vsel %vm2344_vm8, %v2072_v43, %v2488_v57  ;;  %v8220_v34 = vpop.f32.mrb[104].mxu0  ;;  %v8894_v43 = vld [vmem:[%s12958_s3 + $0x2dc] ss:$36 sps:$4 sm:$0xff]  }
 0x1ab   :  { %5052 = vmatmul.mubr.bf16.gmra.mrb[192].mxu0 %v8887_v40  ;;  %v2093_v9 = vadd.f32 %v8220_v34, %v10813_v29  ;;  %v2084_v8 = vpop.f32.mrb[105].mxu0  ;;  %5790 = vmatprep.subr.bf16.mxu1 %v13013_v18  ;;  %v6631_v29 = vld [vmem:[%s12961_s6 + $0x38] sm:$0xff] }
 0x1ac   :  { %5059 = vmatprep.mubr.bf16.mxu0 %v8891_v6  ;;  %6667 = vperm.xlu1 %8748, %v6629_v53   ;;  %v2085_v25 = vadd.f32 %v2084_v8, %v10771_v47  ;;  %v8221_v13 = vpop.f32.mrb[106].mxu0 }
 0x1ad   :  { %6662 = vperm.xlu0 %8747, %v6628_v27   ;;  %5309 = vmatmul.mubr.bf16.gmra.mrb[32].mxu1 %v8884_v45  ;;  %v2493_v15 = vmul.f32 0.01, %v2093_v9  ;;  %v2096_v26 = vadd.f32 %v8221_v13, %v10823_v48  ;;  %v2087_v56 = vpop.f32.mrb[107].mxu0  ;;  %vm2349_vm9 = vcmp.ge.f32.partialorder %v2093_v9, 0.0  ;;  %v8893_v48 = vld [vmem:[%s12958_s3 + $0x3a8] ss:$36 sps:$4 sm:$0xff]   ;;  %v11189_v45 = vpop.permute.xlu0 %963 }
 0x1ae   :  { %v2491_v0 = vmul.f32 0.01, %v2085_v25  ;;  %5316 = vmatprep.mubr.bf16.mxu1 %v8888_v31  ;;  %v2088_v47 = vadd.f32 %v2087_v56, %v10789_v14  ;;  %vm2347_vm10 = vcmp.ge.f32.partialorder %v2085_v25, 0.0 }
 0x1af   :  { %vm2350_vm11 = vcmp.ge.f32.partialorder %v2096_v26, 0.0  ;;  %v2494_v50 = vmul.f32 0.01, %v2096_v26  ;;  %v11164_v22 = vsel %vm2349_vm9, %v2093_v9, %v2493_v15  ;;  %v6634_v9 = vld [vmem:[%s12961_s6 + $0x50] sm:$0xff] }
 0x1b0   :  { %6677 = vperm.xlu1 %8748, %v6631_v29   ;;  %vm2348_vm12 = vcmp.ge.f32.partialorder %v2088_v47, 0.0  ;;  %v2492_v1 = vmul.f32 0.01, %v2088_v47  ;;  %v11177_v19 = vsel %vm2347_vm10, %v2085_v25, %v2491_v0  ;;  %v11199_v25 = vpop.permute.xlu1 %968  ;;  %v6637_v0 = vld [vmem:[%s12961_s6 + $0x68] sm:$0xff] }
 0x1b1   :  { %6672 = vperm.xlu0 %8747, %v6630_v12   ;;  %v11166_v14 = vsel %vm2350_vm11, %v2096_v26, %v2494_v50  ;;  %v8903_v26 = vld [vmem:[%s12958_s3 + $0x43c] ss:$36 sps:$4 sm:$0xff]  }
 0x1b2   :  { %v11179_v49 = vsel %vm2348_vm12, %v2088_v47, %v2492_v1  ;;  %v8224_v46 = vpop.f32.mrb[108].mxu0  ;;  %v6636_v47 = vld [vmem:[%s12961_s6 + $0x60] sm:$0xff] }
 0x1b3   :  { %5060 = vmatmul.mubr.bf16.gmra.mrb[196].mxu0 %v8893_v48  ;;  %v2109_v55 = vadd.f32 %v8224_v46, %v10892_v51  ;;  %v2100_v6 = vpop.f32.mrb[109].mxu0  ;;  %v6635_v51 = vld [vmem:[%s12961_s6 + $0x58] sm:$0xff]  ;;  %v11221_v48 = vpop.permute.xlu0 %973 }
 0x1b4   :  { %5067 = vmatprep.mubr.bf16.mxu0 %v8897_v52  ;;  %6687 = vperm.xlu1 %8748, %v6633_v37   ;;  %v2101_v53 = vadd.f32 %v2100_v6, %v10850_v44  ;;  %v8225_v27 = vpop.f32.mrb[110].mxu0 }
 0x1b5   :  { %6682 = vperm.xlu0 %8747, %v6632_v17   ;;  %5317 = vmatmul.mubr.bf16.gmra.mrb[36].mxu1 %v8890_v58  ;;  %v2497_v34 = vmul.f32 0.01, %v2109_v55  ;;  %v2112_v31 = vadd.f32 %v8225_v27, %v10902_v60  ;;  %v2103_v8 = vpop.f32.mrb[111].mxu0  ;;  %vm2353_vm13 = vcmp.ge.f32.partialorder %v2109_v55, 0.0  ;;  %v8899_v60 = vld [vmem:[%s12958_s3 + $0x3f0] ss:$36 sps:$4 sm:$0xff]  }
 0x1b6   :  { %v2495_v13 = vmul.f32 0.01, %v2101_v53  ;;  %5324 = vmatprep.mubr.bf16.mxu1 %v8894_v43  ;;  %v2104_v44 = vadd.f32 %v2103_v8, %v10866_v33  ;;  %vm2351_vm14 = vcmp.ge.f32.partialorder %v2101_v53, 0.0  ;;  %v8896_v33 = vld [vmem:[%s12958_s3 + $0x2d8] ss:$36 sps:$4 sm:$0xff]  }
 0x1b7   :  { %vm2354_vm15 = vcmp.ge.f32.partialorder %v2112_v31, 0.0  ;;  %v2498_v15 = vmul.f32 0.01, %v2112_v31  ;;  %v11208_v12 = vsel %vm2353_vm13, %v2109_v55, %v2497_v34  ;;  %v8900_v58 = vld [vmem:[%s12958_s3 + $0x324] ss:$36 sps:$4 sm:$0xff]   ;;  %v11235_v55 = vpop.permute.xlu1 %978 }
 0x1b8   :  { %6697 = vperm.xlu1 %8748, %v6635_v51   ;;  %vm2352_vm1 = vcmp.ge.f32.partialorder %v2104_v44, 0.0  ;;  %v2496_v29 = vmul.f32 0.01, %v2104_v44  ;;  %v11223_v50 = vsel %vm2351_vm14, %v2101_v53, %v2495_v13  ;;  %v8909_v13 = vld [vmem:[%s12958_s3 + $0x484] ss:$36 sps:$4 sm:$0xff]  }
 0x1b9   :  { %6692 = vperm.xlu0 %8747, %v6634_v9   ;;  %v11210_v56 = vsel %vm2354_vm15, %v2112_v31, %v2498_v15  ;;  %v6638_v31 = vld [vmem:[%s12961_s6 + $0x70] sm:$0xff] }
 0x1ba   :  { %v11225_v52 = vsel %vm2352_vm1, %v2104_v44, %v2496_v29  ;;  %v8228_v1 = vpop.f32.mrb[112].mxu0  ;;  %v11252_v44 = vpop.permute.xlu0 %983  ;;  %v7139_v29 = vld [vmem:[%s12962_s8 + $0x8] sm:$0xff] }
 0x1bb   :  { %5068 = vmatmul.mubr.bf16.gmra.mrb[200].mxu0 %v8899_v60  ;;  %v2125_v17 = vadd.f32 %v8228_v1, %v10962_v4  ;;  %v2116_v46 = vpop.f32.mrb[113].mxu0  ;;  %v6639_v4 = vld [vmem:[%s12961_s6 + $0x78] sm:$0xff] }
 0x1bc   :  { %5075 = vmatprep.mubr.bf16.mxu0 %v8903_v26  ;;  %6707 = vperm.xlu1 %8748, %v6637_v0   ;;  %v2117_v6 = vadd.f32 %v2116_v46, %v10926_v32  ;;  %v8229_v53 = vpop.f32.mrb[114].mxu0  ;;  %v8905_v32 = vld [vmem:[%s12958_s3 + $0x438] ss:$36 sps:$4 sm:$0xff]   ;;  %v8902_v26 = vld [vmem:[%s12958_s3 + $0x320] ss:$36 sps:$4 sm:$0xff]   ;;  %v11267_v0 = vpop.permute.xlu1 %988 }
 0x1bd   :  { %6702 = vperm.xlu0 %8747, %v6636_v47   ;;  %5325 = vmatmul.mubr.bf16.gmra.mrb[40].mxu1 %v8896_v33  ;;  %v2501_v27 = vmul.f32 0.01, %v2125_v17  ;;  %v2128_v34 = vadd.f32 %v8229_v53, %v10975_v3  ;;  %v2119_v51 = vpop.f32.mrb[115].mxu0  ;;  %vm2357_vm2 = vcmp.ge.f32.partialorder %v2125_v17, 0.0  ;;  %v7138_v33 = vld [vmem:[%s12962_s8] sm:$0xff] }
 0x1be   :  { %v2499_v9 = vmul.f32 0.01, %v2117_v6  ;;  %5332 = vmatprep.mubr.bf16.mxu1 %v8900_v58  ;;  %v2120_v8 = vadd.f32 %v2119_v51, %v10944_v39  ;;  %vm2355_vm3 = vcmp.ge.f32.partialorder %v2117_v6, 0.0 }
 0x1bf   :  { %vm2358_vm4 = vcmp.ge.f32.partialorder %v2128_v34, 0.0  ;;  %v2502_v3 = vmul.f32 0.01, %v2128_v34  ;;  %v11254_v15 = vsel %vm2357_vm2, %v2125_v17, %v2501_v27  ;;  %v8906_v17 = vld [vmem:[%s12958_s3 + $0x36c] ss:$36 sps:$4 sm:$0xff]  }
 0x1c0   :  { %6717 = vperm.xlu1 %8748, %v6639_v4   ;;  %vm2356_vm0 = vcmp.ge.f32.partialorder %v2120_v8, 0.0  ;;  %v2500_v60 = vmul.f32 0.01, %v2120_v8  ;;  %v11269_v47 = vsel %vm2355_vm3, %v2117_v6, %v2499_v9  ;;  %v7141_v9 = vld [vmem:[%s12962_s8 + $0x18] sm:$0xff] }
 0x1c1   :  { %6712 = vperm.xlu0 %8747, %v6638_v31   ;;  %v11256_v39 = vsel %vm2358_vm4, %v2128_v34, %v2502_v3 }
 0x1c2   :  { %v11271_v1 = vsel %vm2356_vm0, %v2120_v8, %v2500_v60  ;;  %v8232_v58 = vpop.f32.mrb[116].mxu0  ;;  %v8915_v60 = vld [vmem:[%s12958_s3 + $0x4cc] ss:$36 sps:$4 sm:$0xff]  }
 0x1c3   :  { %5076 = vmatmul.mubr.bf16.gmra.mrb[204].mxu0 %v8905_v32  ;;  %v2141_v53 = vadd.f32 %v8232_v58, %v11042_v24  ;;  %v2132_v27 = vpop.f32.mrb[117].mxu0  ;;  %v7140_v24 = vld [vmem:[%s12962_s8 + $0x10] sm:$0xff]  ;;  %v11289_v32 = vpop.permute.xlu0 %993  ;;  %v8908_v58 = vld [vmem:[%s12958_s3 + $0x368] ss:$36 sps:$4 sm:$0xff]  }
 0x1c4   :  { %5083 = vmatprep.mubr.bf16.mxu0 %v8909_v13  ;;  %7153 = vperm.xlu1 %8748, %v7139_v29   ;;  %v2133_v6 = vadd.f32 %v2132_v27, %v11001_v41  ;;  %v8233_v4 = vpop.f32.mrb[118].mxu0  ;;  %v7299_v27 = vld [vmem:[%s12963_s9] sm:$0xff] }
 0x1c5   :  { %7148 = vperm.xlu0 %8747, %v7138_v33   ;;  %5333 = vmatmul.mubr.bf16.gmra.mrb[44].mxu1 %v8902_v26  ;;  %v2505_v31 = vmul.f32 0.01, %v2141_v53  ;;  %v2144_v51 = vadd.f32 %v8233_v4, %v11052_v20  ;;  %v2135_v8 = vpop.f32.mrb[119].mxu0  ;;  %vm2361_vm5 = vcmp.ge.f32.partialorder %v2141_v53, 0.0  ;;  %v8911_v20 = vld [vmem:[%s12958_s3 + $0x480] ss:$36 sps:$4 sm:$0xff]   ;;  %v11298_v26 = vpop.permute.xlu1 %998 }
 0x1c6   :  { %v2503_v3 = vmul.f32 0.01, %v2133_v6  ;;  %5340 = vmatprep.mubr.bf16.mxu1 %v8906_v17  ;;  %v2136_v41 = vadd.f32 %v2135_v8, %v11011_v7  ;;  %vm2359_vm6 = vcmp.ge.f32.partialorder %v2133_v6, 0.0  ;;  %v7300_v17 = vld [vmem:[%s12963_s9 + $0x8] sm:$0xff] }
 0x1c7   :  { %vm2362_vm7 = vcmp.ge.f32.partialorder %v2144_v51, 0.0  ;;  %v2506_v13 = vmul.f32 0.01, %v2144_v51  ;;  %v11300_v33 = vsel %vm2361_vm5, %v2141_v53, %v2505_v31  ;;  %v8912_v31 = vld [vmem:[%s12958_s3 + $0x3b4] ss:$36 sps:$4 sm:$0xff]  }
 0x1c8   :  { %7163 = vperm.xlu1 %8748, %v7141_v9   ;;  %vm2360_vm8 = vcmp.ge.f32.partialorder %v2136_v41, 0.0  ;;  %v2504_v29 = vmul.f32 0.01, %v2136_v41  ;;  %v11313_v4 = vsel %vm2359_vm6, %v2133_v6, %v2503_v3 }
 0x1c9   :  { %7158 = vperm.xlu0 %8747, %v7140_v24   ;;  %v11302_v7 = vsel %vm2362_vm7, %v2144_v51, %v2506_v13  ;;  %v11325_v13 = vpop.permute.xlu0 %1003 }
 0x1ca   :  { %v11315_v9 = vsel %vm2360_vm8, %v2136_v41, %v2504_v29  ;;  %v8236_v53 = vpop.f32.mrb[120].mxu0 }
 0x1cb   :  { %5084 = vmatmul.mubr.bf16.gmra.mrb[208].mxu0 %v8911_v20  ;;  %v2157_v24 = vadd.f32 %v8236_v53, %v11111_v2  ;;  %v2148_v6 = vpop.f32.mrb[121].mxu0  ;;  %v7301_v20 = vld [vmem:[%s12963_s9 + $0x10] sm:$0xff]  ;;  %v7142_v2 = vld [vmem:[%s12962_s8 + $0x20] sm:$0xff] }
 0x1cc   :  { %5091 = vmatprep.mubr.bf16.mxu0 %v8915_v60  ;;  %7314 = vperm.xlu1 %8748, %v7300_v17   ;;  %v2149_v3 = vadd.f32 %v2148_v6, %v11075_v10  ;;  %v8237_v41 = vpop.f32.mrb[122].mxu0  ;;  %v11334_v60 = vpop.permute.xlu1 %1008  ;;  %v8917_v10 = vld [vmem:[%s12958_s3 + $0x4c8] ss:$36 sps:$4 sm:$0xff]   ;;  %v8921_v6 = vld [vmem:[%s12958_s3 + $0x514] ss:$36 sps:$4 sm:$0xff]  }
 0x1cd   :  { %7309 = vperm.xlu0 %8747, %v7299_v27   ;;  %5341 = vmatmul.mubr.bf16.gmra.mrb[48].mxu1 %v8908_v58  ;;  %v2509_v29 = vmul.f32 0.01, %v2157_v24  ;;  %v2160_v17 = vadd.f32 %v8237_v41, %v11126_v59  ;;  %v2151_v27 = vpop.f32.mrb[123].mxu0  ;;  %vm2365_vm9 = vcmp.ge.f32.partialorder %v2157_v24, 0.0  ;;  %v8914_v59 = vld [vmem:[%s12958_s3 + $0x3b0] ss:$36 sps:$4 sm:$0xff]  }
 0x1ce   :  { %5348 = vmatprep.mubr.bf16.mxu1 %v8912_v31  ;;  %v2507_v58 = vmul.f32 0.01, %v2149_v3  ;;  %v2152_v53 = vadd.f32 %v2151_v27, %v11093_v23  ;;  %vm2363_vm10 = vcmp.ge.f32.partialorder %v2149_v3, 0.0  ;;  %v7302_v41 = vld [vmem:[%s12963_s9 + $0x18] sm:$0xff]  ;;  %v7143_v23 = vld [vmem:[%s12962_s8 + $0x28] sm:$0xff]  ;;  %v11353_v27 = vpop.permute.xlu0 %1013 }
 0x1cf   :  { %vm2366_vm11 = vcmp.ge.f32.partialorder %v2160_v17, 0.0  ;;  %v2510_v51 = vmul.f32 0.01, %v2160_v17  ;;  %v11355_v8 = vsel %vm2365_vm9, %v2157_v24, %v2509_v29 }
 0x1d0   :  { %7319 = vperm.xlu1 %8748, %v7301_v20   ;;  %vm2364_vm12 = vcmp.ge.f32.partialorder %v2152_v53, 0.0  ;;  %v2508_v31 = vmul.f32 0.01, %v2152_v53  ;;  %v8918_v20 = vld [vmem:[%s12958_s3 + $0x3fc] ss:$36 sps:$4 sm:$0xff]   ;;  %v11370_v29 = vpop.permute.xlu1 %1018 }
 0x1d1   :  { %7168 = vperm.xlu0 %8747, %v7142_v2   ;;  %v11357_v46 = vsel %vm2366_vm11, %v2160_v17, %v2510_v51  ;;  %v11363_v2 = vsel %vm2363_vm10, %v2149_v3, %v2507_v58 }
 0x1d2   :  { %v8240_v34 = vpop.f32.mrb[124].mxu0  ;;  %v11365_v37 = vsel %vm2364_vm12, %v2152_v53, %v2508_v31 }
 0x1d3   :  { %5092 = vmatmul.mubr.bf16.gmra.mrb[212].mxu0 %v8917_v10  ;;  %v2173_v43 = vadd.f32 %v8240_v34, %v11189_v45  ;;  %v2164_v51 = vpop.f32.mrb[125].mxu0  ;;  %v7303_v45 = vld [vmem:[%s12963_s9 + $0x20] sm:$0xff]  ;;  %v7144_v34 = vld [vmem:[%s12962_s8 + $0x30] sm:$0xff] }
 0x1d4   :  { %5099 = vmatprep.mubr.bf16.mxu0 %v8921_v6  ;;  %7324 = vperm.xlu1 %8748, %v7302_v41   ;;  %v2165_v3 = vadd.f32 %v2164_v51, %v11153_v63  ;;  %v8241_v10 = vpop.f32.mrb[126].mxu0  ;;  %v8927_v41 = vld [vmem:[%s12958_s3 + $0x55c] ss:$36 sps:$4 sm:$0xff]  }
 0x1d5   :  { %7173 = vperm.xlu0 %8747, %v7143_v23   ;;  %5349 = vmatmul.mubr.bf16.gmra.mrb[52].mxu1 %v8914_v59  ;;  %v2513_v58 = vmul.f32 0.01, %v2173_v43  ;;  %v2176_v53 = vadd.f32 %v8241_v10, %v11199_v25  ;;  %v2167_v6 = vpop.f32.mrb[127].mxu0  ;;  %v8923_v59 = vld [vmem:[%s12958_s3 + $0x510] ss:$36 sps:$4 sm:$0xff]   ;;  %vm2369_vm13 = vcmp.ge.f32.partialorder %v2173_v43, 0.0  ;;  %v11389_v23 = vpop.permute.xlu0 %1023 }
 0x1d6   :  { %5356 = vmatprep.mubr.bf16.mxu1 %v8918_v20  ;;  %v2511_v63 = vmul.f32 0.01, %v2165_v3  ;;  %v2168_v31 = vadd.f32 %v2167_v6, %v11162_v36  ;;  %vm2367_vm14 = vcmp.ge.f32.partialorder %v2165_v3, 0.0  ;;  %v8920_v25 = vld [vmem:[%s12958_s3 + $0x3f8] ss:$36 sps:$4 sm:$0xff]   ;;  %v7304_v36 = vld [vmem:[%s12963_s9 + $0x28] sm:$0xff]  ;;  %v11400_v6 = vpop.permute.xlu1 %1028 }
 0x1d7   :  { %vm2370_vm15 = vcmp.ge.f32.partialorder %v2176_v53, 0.0  ;;  %v2514_v20 = vmul.f32 0.01, %v2176_v53  ;;  %v7145_v10 = vld [vmem:[%s12962_s8 + $0x38] sm:$0xff]  ;;  %v11403_v24 = vsel %vm2369_vm13, %v2173_v43, %v2513_v58 }
 0x1d8   :  { %7329 = vperm.xlu1 %8748, %v7303_v45   ;;  %vm2368_vm1 = vcmp.ge.f32.partialorder %v2168_v31, 0.0  ;;  %v2512_v51 = vmul.f32 0.01, %v2168_v31  ;;  %13054 = vst [vmem:[#allocation6_spill] sm:$0xff] %v11403_v24  ;;  %v11411_v40 = vsel %vm2367_vm14, %v2165_v3, %v2511_v63  ;;  %v7306_v3 = vld [vmem:[%s12963_s9 + $0x38] sm:$0xff] }
 0x1d9   :  { %7178 = vperm.xlu0 %8747, %v7144_v34   ;;  %v11405_v17 = vsel %vm2370_vm15, %v2176_v53, %v2514_v20  ;;  %v8924_v34 = vld [vmem:[%s12958_s3 + $0x444] ss:$36 sps:$4 sm:$0xff]   ;;  %13056 = vst [vmem:[#allocation5_spill] sm:$0xff] %v11411_v40  ;;  %v11427_v63 = vpop.permute.xlu0 %1033 }
 0x1da   :  { %13055 = vst [vmem:[#allocation4_spill] sm:$0xff] %v11405_v17  ;;  %v8244_v45 = vpop.f32.mrb[128].mxu0  ;;  %v11413_v57 = vsel %vm2368_vm1, %v2168_v31, %v2512_v51 }
 0x1db   :  { %5100 = vmatmul.mubr.bf16.gmra.mrb[216].mxu0 %v8923_v59  ;;  %13057 = vst [vmem:[#allocation3_spill] sm:$0xff] %v11413_v57  ;;  %v2189_v5 = vadd.f32 %v8244_v45, %v11252_v44  ;;  %v2180_v58 = vpop.f32.mrb[129].mxu0  ;;  %v7305_v44 = vld [vmem:[%s12963_s9 + $0x30] sm:$0xff]  ;;  %v11437_v45 = vpop.permute.xlu1 %1038 }
 0x1dc   :  { %5107 = vmatprep.mubr.bf16.mxu0 %v8927_v41  ;;  %7334 = vperm.xlu1 %8748, %v7304_v36   ;;  %v2181_v59 = vadd.f32 %v2180_v58, %v11221_v48  ;;  %v8245_v20 = vpop.f32.mrb[130].mxu0  ;;  %v8929_v48 = vld [vmem:[%s12958_s3 + $0x558] ss:$36 sps:$4 sm:$0xff]  }
 0x1dd   :  { %7183 = vperm.xlu0 %8747, %v7145_v10   ;;  %5357 = vmatmul.mubr.bf16.gmra.mrb[56].mxu1 %v8920_v25  ;;  %v2517_v31 = vmul.f32 0.01, %v2189_v5  ;;  %v2192_v41 = vadd.f32 %v8245_v20, %v11267_v0  ;;  %v2183_v51 = vpop.f32.mrb[131].mxu0  ;;  %v8933_v10 = vld [vmem:[%s12958_s3 + $0x5a4] ss:$36 sps:$4 sm:$0xff]   ;;  %vm2373_vm2 = vcmp.ge.f32.partialorder %v2189_v5, 0.0 }
 0x1de   :  { %5364 = vmatprep.mubr.bf16.mxu1 %v8924_v34  ;;  %v2515_v25 = vmul.f32 0.01, %v2181_v59  ;;  %v2184_v36 = vadd.f32 %v2183_v51, %v11235_v55  ;;  %v8926_v0 = vld [vmem:[%s12958_s3 + $0x440] ss:$36 sps:$4 sm:$0xff]   ;;  %vm2371_vm3 = vcmp.ge.f32.partialorder %v2181_v59, 0.0 }
 0x1df   :  { %v2518_v58 = vmul.f32 0.01, %v2192_v41  ;;  %vm2374_vm4 = vcmp.ge.f32.partialorder %v2192_v41, 0.0  ;;  %v7368_v20 = vld [vmem:[#allocation2] sm:$0x1]  ;;  %v2661_v43 = vsel %vm2373_vm2, %v2189_v5, %v2517_v31 }
 0x1e0   :  { %7344 = vperm.xlu1 %8748, %v7306_v3   ;;  %v2516_v34 = vmul.f32 0.01, %v2184_v36  ;;  %vm2372_vm0 = vcmp.ge.f32.partialorder %v2184_v36, 0.0  ;;  %v8930_v51 = vld [vmem:[%s12958_s3 + $0x48c] ss:$36 sps:$4 sm:$0xff]   ;;  %v2659_v54 = vsel %vm2371_vm3, %v2181_v59, %v2515_v25 }
 0x1e1   :  { %7339 = vperm.xlu0 %8747, %v7305_v44   ;;  %v2662_v53 = vsel %vm2374_vm4, %v2192_v41, %v2518_v58  ;;  %v11446_v44 = vpop.permute.xlu0 %1043 }
 0x1e2   :  { %v2660_v38 = vsel %vm2372_vm0, %v2184_v36, %v2516_v34  ;;  %v3060_v3 = vpack.c.bf16 %v2662_v53, %v2661_v43 }
 0x1e3   :  { %5108 = vmatmul.mubr.bf16.gmra.mrb[220].mxu0 %v8929_v48  ;;  %v8248_v55 = vpop.f32.mrb[132].mxu0  ;;  %v3059_v17 = vpack.c.bf16 %v2660_v38, %v2659_v54  ;;  %v8939_v54 = vld [vmem:[%s12958_s3 + $0x5ec] ss:$36 sps:$4 sm:$0xff]  }
 0x1e4   :  { %v2205_v61 = vadd.f32 %v8248_v55, %v11325_v13  ;;  %5115 = vmatprep.mubr.bf16.mxu0 %v8933_v10  ;;  %v2196_v24 = vpop.f32.mrb[133].mxu0  ;;  %v8935_v13 = vld [vmem:[%s12958_s3 + $0x5a0] ss:$36 sps:$4 sm:$0xff]  }
 0x1e5   :  { %7371 = vperm.xlu0 %8747, %v7368_v20   ;;  %5365 = vmatmul.mubr.bf16.gmra.mrb[60].mxu1 %v8926_v0  ;;  %v2197_v48 = vadd.f32 %v2196_v24, %v11289_v32  ;;  %v8249_v40 = vpop.f32.mrb[134].mxu0 }
 0x1e6   :  { %v2521_v57 = vmul.f32 0.01, %v2205_v61  ;;  %5372 = vmatprep.mubr.bf16.mxu1 %v8930_v51  ;;  %v2208_v5 = vadd.f32 %v8249_v40, %v11334_v60  ;;  %v2199_v31 = vpop.f32.mrb[135].mxu0  ;;  %8258 = vmatprep.subr.bf16.mxu0 %v3059_v17  ;;  %vm2377_vm6 = vcmp.ge.f32.partialorder %v2205_v61, 0.0  ;;  %v8932_v40 = vld [vmem:[%s12958_s3 + $0x488] ss:$36 sps:$4 sm:$0xff]  }
 0x1e7   :  { %v2519_v43 = vmul.f32 0.01, %v2197_v48  ;;  %v2200_v53 = vadd.f32 %v2199_v31, %v11298_v26  ;;  %8259 = vmatpush3.bf16.msra.mxu0 %v3059_v17  ;;  %vm2375_vm5 = vcmp.ge.f32.partialorder %v2197_v48, 0.0  ;;  %v8936_v26 = vld [vmem:[%s12958_s3 + $0x4d4] ss:$36 sps:$4 sm:$0xff]  }
 0x1e8   :  { %v2522_v38 = vmul.f32 0.01, %v2208_v5  ;;  %8260 = vmatprep.subr.bf16.mxu0 %v3060_v3  ;;  %vm2378_vm7 = vcmp.ge.f32.partialorder %v2208_v5, 0.0  ;;  %v2665_v17 = vsel %vm2377_vm6, %v2205_v61, %v2521_v57  ;;  %v8941_v61 = vld [vmem:[%s12958_s3 + $0x5e8] ss:$36 sps:$4 sm:$0xff]  }
 0x1e9   :  { %v2520_v32 = vmul.f32 0.01, %v2200_v53  ;;  %vm2376_vm8 = vcmp.ge.f32.partialorder %v2200_v53, 0.0  ;;  %v2663_v24 = vsel %vm2375_vm5, %v2197_v48, %v2519_v43 }
 0x1ea   :  { %v2666_v59 = vsel %vm2378_vm7, %v2208_v5, %v2522_v38 }
 0x1eb   :  { %5116 = vmatmul.mubr.bf16.gmra.mrb[224].mxu0 %v8935_v13  ;;  %v8252_v60 = vpop.f32.mrb[136].mxu0  ;;  %v2664_v25 = vsel %vm2376_vm8, %v2200_v53, %v2520_v32  ;;  %v3062_v36 = vpack.c.bf16 %v2666_v59, %v2665_v17 }
 0x1ec   :  { %v2221_v41 = vadd.f32 %v8252_v60, %v11389_v23  ;;  %8261 = vmatpush3.bf16.msra.mxu0 %v3060_v3  ;;  %5123 = vmatprep.mubr.bf16.mxu0 %v8939_v54  ;;  %v2212_v10 = vpop.f32.mrb[137].mxu0  ;;  %v3061_v58 = vpack.c.bf16 %v2664_v25, %v2663_v24  ;;  %v1049_v60 = vpop.permute.xlu1 %1048 }
 0x1ed   :  { %5373 = vmatmul.mubr.bf16.gmra.mrb[64].mxu1 %v8932_v40  ;;  %v2213_v0 = vadd.f32 %v2212_v10, %v11353_v27  ;;  %v8253_v34 = vpop.f32.mrb[138].mxu0  ;;  %v8945_v27 = vld [vmem:[%s12958_s3 + $0x634] ss:$36 sps:$4 sm:$0xff]   ;;  %v8951_v10 = vld [vmem:[%s12958_s3 + $0x67c] ss:$36 sps:$4 sm:$0xff]  }
 0x1ee   :  { %v2525_v20 = vmul.f32 0.01, %v2221_v41  ;;  %5380 = vmatprep.mubr.bf16.mxu1 %v8936_v26  ;;  %v2224_v55 = vadd.f32 %v8253_v34, %v11400_v6  ;;  %v2215_v51 = vpop.f32.mrb[139].mxu0  ;;  %8262 = vmatprep.subr.bf16.mxu0 %v3061_v58  ;;  %vm2381_vm10 = vcmp.ge.f32.partialorder %v2221_v41, 0.0  ;;  %v8938_v6 = vld [vmem:[%s12958_s3 + $0x4d0] ss:$36 sps:$4 sm:$0xff]  }
 0x1ef   :  { %v2523_v57 = vmul.f32 0.01, %v2213_v0  ;;  %v2216_v23 = vadd.f32 %v2215_v51, %v11370_v29  ;;  %vm2379_vm9 = vcmp.ge.f32.partialorder %v2213_v0, 0.0  ;;  %v8942_v29 = vld [vmem:[%s12958_s3 + $0x51c] ss:$36 sps:$4 sm:$0xff]  }
 0x1f0   :  { %8263 = vmatpush3.bf16.msra.mxu0 %v3061_v58  ;;  %v2526_v3 = vmul.f32 0.01, %v2224_v55  ;;  %vm2382_vm11 = vcmp.ge.f32.partialorder %v2224_v55, 0.0  ;;  %v2669_v13 = vsel %vm2381_vm10, %v2221_v41, %v2525_v20  ;;  %v8944_v58 = vld [vmem:[%s12958_s3 + $0x518] ss:$36 sps:$4 sm:$0xff]  }
 0x1f1   :  { %8264 = vmatprep.subr.bf16.mxu0 %v3062_v36  ;;  %v2524_v48 = vmul.f32 0.01, %v2216_v23  ;;  %vm2380_vm12 = vcmp.ge.f32.partialorder %v2216_v23, 0.0  ;;  %v2667_v31 = vsel %vm2379_vm9, %v2213_v0, %v2523_v57 }
 0x1f2   :  { %v2670_v43 = vsel %vm2382_vm11, %v2224_v55, %v2526_v3  ;;  %v8950_v3 = vld [vmem:[%s12958_s3 + $0x560] ss:$36 sps:$4 sm:$0xff]  }
 0x1f3   :  { %5124 = vmatmul.mubr.bf16.gmra.mrb[228].mxu0 %v8941_v61  ;;  %v8256_v5 = vpop.f32.mrb[140].mxu0  ;;  %v2668_v54 = vsel %vm2380_vm12, %v2216_v23, %v2524_v48  ;;  %v3064_v38 = vpack.c.bf16 %v2670_v43, %v2669_v13  ;;  %v8953_v23 = vld [vmem:[%s12958_s3 + $0x678] ss:$36 sps:$4 sm:$0xff]   ;;  %v8959_v48 = vld [vmem:[%s12958_s3 + $0x6c0] ss:$36 sps:$4 sm:$0xff]  }
 0x1f4   :  { %v2237_v53 = vadd.f32 %v8256_v5, %v11446_v44  ;;  %8265 = vmatpush3.bf16.msra.mxu0 %v3062_v36  ;;  %5131 = vmatprep.mubr.bf16.mxu0 %v8945_v27  ;;  %v2228_v40 = vpop.f32.mrb[141].mxu0  ;;  %v3063_v32 = vpack.c.bf16 %v2668_v54, %v2667_v31  ;;  %v8947_v44 = vld [vmem:[%s12958_s3 + $0x630] ss:$36 sps:$4 sm:$0xff]   ;;  %v8957_v27 = vld [vmem:[%s12958_s3 + $0x6c4] ss:$36 sps:$4 sm:$0xff]  }
 0x1f5   :  { %5381 = vmatmul.mubr.bf16.gmra.mrb[68].mxu1 %v8938_v6  ;;  %v2229_v26 = vadd.f32 %v2228_v40, %v11427_v63  ;;  %v8257_v24 = vpop.f32.mrb[142].mxu0  ;;  %v8954_v6 = vld [vmem:[%s12958_s3 + $0x5ac] ss:$36 sps:$4 sm:$0xff]   ;;  %v8960_v31 = vld [vmem:[%s12958_s3 + $0x5f4] ss:$36 sps:$4 sm:$0xff]  }
 0x1f6   :  { %v2529_v17 = vmul.f32 0.01, %v2237_v53  ;;  %5388 = vmatprep.mubr.bf16.mxu1 %v8942_v29  ;;  %v2240_v59 = vadd.f32 %v8257_v24, %v1049_v60  ;;  %v2231_v25 = vpop.f32.mrb[143].mxu0  ;;  %8266 = vmatprep.subr.bf16.mxu0 %v3063_v32  ;;  %vm2385_vm13 = vcmp.ge.f32.partialorder %v2237_v53, 0.0  ;;  %v8963_v5 = vld [vmem:[%s12958_s3 + $0x70c] ss:$36 sps:$4 sm:$0xff]  }
 0x1f7   :  { %v2527_v41 = vmul.f32 0.01, %v2229_v26  ;;  %v2232_v36 = vadd.f32 %v2231_v25, %v11437_v45  ;;  %vm2383_vm14 = vcmp.ge.f32.partialorder %v2229_v26, 0.0  ;;  %v8948_v45 = vld [vmem:[%s12958_s3 + $0x564] ss:$36 sps:$4 sm:$0xff]  }
 0x1f8   :  { %8267 = vmatpush3.bf16.msra.mxu0 %v3063_v32  ;;  %v2530_v63 = vmul.f32 0.01, %v2240_v59  ;;  %vm2386_vm15 = vcmp.ge.f32.partialorder %v2240_v59, 0.0  ;;  %v2673_v34 = vsel %vm2385_vm13, %v2237_v53, %v2529_v17  ;;  %v8956_v29 = vld [vmem:[%s12958_s3 + $0x5a8] ss:$36 sps:$4 sm:$0xff]  }
 0x1f9   :  { %8268 = vmatprep.subr.bf16.mxu0 %v3064_v38  ;;  %v2528_v0 = vmul.f32 0.01, %v2232_v36  ;;  %vm2384_vm1 = vcmp.ge.f32.partialorder %v2232_v36, 0.0  ;;  %v2671_v55 = vsel %vm2383_vm14, %v2229_v26, %v2527_v41  ;;  %v8965_v13 = vld [vmem:[%s12958_s3 + $0x708] ss:$36 sps:$4 sm:$0xff]  }
 0x1fa   :  { %v2674_v20 = vsel %vm2386_vm15, %v2240_v59, %v2530_v63  ;;  %v8969_v43 = vld [vmem:[%s12958_s3 + $0x754] ss:$36 sps:$4 sm:$0xff]   ;;  %v8966_v54 = vld [vmem:[%s12958_s3 + $0x63c] ss:$36 sps:$4 sm:$0xff]   ;;  %v8972_v60 = vld [vmem:[%s12958_s3 + $0x684] ss:$36 sps:$4 sm:$0xff]  }
 0x1fb   :  { %5132 = vmatmul.mubr.bf16.gmra.mrb[232].mxu0 %v8947_v44  ;;  %v2672_v51 = vsel %vm2384_vm1, %v2232_v36, %v2528_v0  ;;  %v3066_v61 = vpack.c.bf16 %v2674_v20, %v2673_v34  ;;  %v8962_v53 = vld [vmem:[%s12958_s3 + $0x5f0] ss:$36 sps:$4 sm:$0xff]   ;;  %v8975_v40 = vld [vmem:[%s12958_s3 + $0x79c] ss:$36 sps:$4 sm:$0xff]   ;;  %v8983_v59 = vld [vmem:[%s12958_s3 + $0x7e4] ss:$36 sps:$4 sm:$0xff]  }
 0x1fc   :  { %8269 = vmatpush3.bf16.msra.mxu0 %v3064_v38  ;;  %5139 = vmatprep.mubr.bf16.mxu0 %v8951_v10  ;;  %v3065_v57 = vpack.c.bf16 %v2672_v51, %v2671_v55  ;;  %v8971_v38 = vld [vmem:[%s12958_s3 + $0x750] ss:$36 sps:$4 sm:$0xff]   ;;  %v8968_v32 = vld [vmem:[%s12958_s3 + $0x638] ss:$36 sps:$4 sm:$0xff]   ;;  %v8974_v44 = vld [vmem:[%s12958_s3 + $0x680] ss:$36 sps:$4 sm:$0xff]  }
 0x1fd   :  { %5389 = vmatmul.mubr.bf16.gmra.mrb[72].mxu1 %v8944_v58  ;;  %v8977_v17 = vld [vmem:[%s12958_s3 + $0x798] ss:$36 sps:$4 sm:$0xff]   ;;  %v8978_v36 = vld [vmem:[%s12958_s3 + $0x6cc] ss:$36 sps:$4 sm:$0xff]   ;;  %v8981_v58 = vld [vmem:[%s12958_s3 + $0x7e0] ss:$36 sps:$4 sm:$0xff]  }
 0x1fe   :  { %5396 = vmatprep.mubr.bf16.mxu1 %v8948_v45  ;;  %8270 = vmatprep.subr.bf16.mxu0 %v3065_v57  ;;  %v8989_v0 = vld [vmem:[%s12958_s3 + $0x82c] ss:$36 sps:$4 sm:$0xff]   ;;  %v8984_v55 = vld [vmem:[%s12958_s3 + $0x714] ss:$36 sps:$4 sm:$0xff]  }
 0x1ff   :  { %v8980_v34 = vld [vmem:[%s12958_s3 + $0x6c8] ss:$36 sps:$4 sm:$0xff]  }
 0x200   :  { %8271 = vmatpush3.bf16.msra.mxu0 %v3065_v57  ;;  %v8987_v57 = vld [vmem:[%s12958_s3 + $0x828] ss:$36 sps:$4 sm:$0xff]  }
 0x201   :  { %8272 = vmatprep.subr.bf16.mxu0 %v3066_v61 }
 0x203   :  { %5140 = vmatmul.mubr.bf16.gmra.mrb[236].mxu0 %v8953_v23  ;;  %v8995_v23 = vld [vmem:[%s12958_s3 + $0x874] ss:$36 sps:$4 sm:$0xff]  }
 0x204   :  { %8273 = vmatpush3.bf16.msra.mxu0 %v3066_v61  ;;  %5147 = vmatprep.mubr.bf16.mxu0 %v8957_v27 }
 0x205   :  { %5397 = vmatmul.mubr.bf16.gmra.mrb[76].mxu1 %v8950_v3  ;;  %v8986_v3 = vld [vmem:[%s12958_s3 + $0x710] ss:$36 sps:$4 sm:$0xff]  }
 0x206   :  { %5404 = vmatprep.mubr.bf16.mxu1 %v8954_v6 }
 0x20b   :  { %5148 = vmatmul.mubr.bf16.gmra.mrb[240].mxu0 %v8959_v48  ;;  %v8990_v48 = vld [vmem:[%s12958_s3 + $0x75c] ss:$36 sps:$4 sm:$0xff]  }
 0x20c   :  { %5155 = vmatprep.mubr.bf16.mxu0 %v8963_v5 }
 0x20d   :  { %5405 = vmatmul.mubr.bf16.gmra.mrb[80].mxu1 %v8956_v29 }
 0x20e   :  { %5412 = vmatprep.mubr.bf16.mxu1 %v8960_v31  ;;  %v8993_v31 = vld [vmem:[%s12958_s3 + $0x870] ss:$36 sps:$4 sm:$0xff]  }
 0x213   :  { %5156 = vmatmul.mubr.bf16.gmra.mrb[244].mxu0 %v8965_v13  ;;  %v9001_v13 = vld [vmem:[%s12958_s3 + $0x8bc] ss:$36 sps:$4 sm:$0xff]  }
 0x214   :  { %5163 = vmatprep.mubr.bf16.mxu0 %v8969_v43 }
 0x215   :  { %5413 = vmatmul.mubr.bf16.gmra.mrb[84].mxu1 %v8962_v53  ;;  %v8992_v53 = vld [vmem:[%s12958_s3 + $0x758] ss:$36 sps:$4 sm:$0xff]  }
 0x216   :  { %5420 = vmatprep.mubr.bf16.mxu1 %v8966_v54 }
 0x21b   :  { %5164 = vmatmul.mubr.bf16.gmra.mrb[248].mxu0 %v8971_v38  ;;  %v8996_v38 = vld [vmem:[%s12958_s3 + $0x7a4] ss:$36 sps:$4 sm:$0xff]  }
 0x21c   :  { %5171 = vmatprep.mubr.bf16.mxu0 %v8975_v40 }
 0x21d   :  { %5421 = vmatmul.mubr.bf16.gmra.mrb[88].mxu1 %v8968_v32 }
 0x21e   :  { %v11542_v26 = vpop.f32.mrb[144].mxu0  ;;  %5428 = vmatprep.mubr.bf16.mxu1 %v8972_v60  ;;  %v8999_v60 = vld [vmem:[%s12958_s3 + $0x8b8] ss:$36 sps:$4 sm:$0xff]  }
 0x21f   :  { %v4959_v24 = vpop.f32.mrb[145].mxu0 }
 0x220   :  { %v11550_v25 = vpop.f32.mrb[146].mxu0 }
 0x221   :  { %v4962_v41 = vpop.f32.mrb[147].mxu0 }
 0x223   :  { %5172 = vmatmul.mubr.bf16.gmra.mrb[252].mxu0 %v8977_v17  ;;  %v8998_v17 = vld [vmem:[%s12958_s3 + $0x7a0] ss:$36 sps:$4 sm:$0xff]  }
 0x224   :  { %5179 = vmatprep.mubr.bf16.mxu0 %v8983_v59 }
 0x225   :  { %5429 = vmatmul.mubr.bf16.gmra.mrb[92].mxu1 %v8974_v44  ;;  %v9002_v44 = vld [vmem:[%s12958_s3 + $0x7ec] ss:$36 sps:$4 sm:$0xff]  }
 0x226   :  { %v11558_v10 = vpop.f32.mrb[148].mxu0  ;;  %5436 = vmatprep.mubr.bf16.mxu1 %v8978_v36 }
 0x227   :  { %v4967_v63 = vpop.f32.mrb[149].mxu0 }
 0x228   :  { %v11566_v45 = vpop.f32.mrb[150].mxu0 }
 0x229   :  { %v4970_v20 = vpop.f32.mrb[151].mxu0 }
 0x22b   :  { %5180 = vmatmul.mubr.bf16.gmra.mrb[0].mxu0 %v8981_v58  ;;  %v9004_v58 = vld [vmem:[%s12958_s3 + $0x7e8] ss:$36 sps:$4 sm:$0xff]  }
 0x22c   :  { %5187 = vmatprep.mubr.bf16.mxu0 %v8989_v0 }
 0x22d   :  { %5437 = vmatmul.mubr.bf16.gmra.mrb[96].mxu1 %v8980_v34  ;;  %v9005_v34 = vld [vmem:[%s12958_s3 + $0x834] ss:$36 sps:$4 sm:$0xff]  }
 0x22e   :  { %v11574_v51 = vpop.f32.mrb[152].mxu0  ;;  %5444 = vmatprep.mubr.bf16.mxu1 %v8984_v55 }
 0x22f   :  { %v4975_v61 = vpop.f32.mrb[153].mxu0 }
 0x230   :  { %v11582_v27 = vpop.f32.mrb[154].mxu0 }
 0x231   :  { %v4978_v6 = vpop.f32.mrb[155].mxu0 }
 0x233   :  { %5188 = vmatmul.mubr.bf16.gmra.mrb[4].mxu0 %v8987_v57  ;;  %v9007_v57 = vld [vmem:[%s12958_s3 + $0x830] ss:$36 sps:$4 sm:$0xff]  }
 0x234   :  { %5195 = vmatprep.mubr.bf16.mxu0 %v8995_v23 }
 0x235   :  { %5445 = vmatmul.mubr.bf16.gmra.mrb[100].mxu1 %v8986_v3  ;;  %v9008_v3 = vld [vmem:[%s12958_s3 + $0x87c] ss:$36 sps:$4 sm:$0xff]  }
 0x236   :  { %v11590_v5 = vpop.f32.mrb[156].mxu0  ;;  %5452 = vmatprep.mubr.bf16.mxu1 %v8990_v48 }
 0x237   :  { %v4983_v29 = vpop.f32.mrb[157].mxu0 }
 0x238   :  { %v11598_v43 = vpop.f32.mrb[158].mxu0 }
 0x239   :  { %v4986_v54 = vpop.f32.mrb[159].mxu0 }
 0x23b   :  { %5196 = vmatmul.mubr.bf16.gmra.mrb[8].mxu0 %v8993_v31  ;;  %v9010_v31 = vld [vmem:[%s12958_s3 + $0x878] ss:$36 sps:$4 sm:$0xff]  }
 0x23c   :  { %5203 = vmatprep.mubr.bf16.mxu0 %v9001_v13 }
 0x23d   :  { %5453 = vmatmul.mubr.bf16.gmra.mrb[104].mxu1 %v8992_v53  ;;  %v9011_v53 = vld [vmem:[%s12958_s3 + $0x8c4] ss:$36 sps:$4 sm:$0xff]  }
 0x23e   :  { %v11606_v40 = vpop.f32.mrb[160].mxu0  ;;  %5460 = vmatprep.mubr.bf16.mxu1 %v8996_v38 }
 0x23f   :  { %v4991_v32 = vpop.f32.mrb[161].mxu0 }
 0x240   :  { %v11611_v24 = vpop.f32.mrb[162].mxu0 }
 0x241   :  { %v4994_v59 = vpop.f32.mrb[163].mxu0 }
 0x242   :  { %v9016_v59 = vld [vmem:[%s12958_s3 + $0x14] ss:$36 sps:$4 sm:$0xff]  }
 0x243   :  { %5204 = vmatmul.mubr.bf16.gmra.mrb[12].mxu0 %v8999_v60  ;;  %v9013_v60 = vld [vmem:[%s12958_s3 + $0x8c0] ss:$36 sps:$4 sm:$0xff]  }
 0x245   :  { %5461 = vmatmul.mubr.bf16.gmra.mrb[108].mxu1 %v8998_v17 }
 0x246   :  { %v11619_v41 = vpop.f32.mrb[164].mxu0  ;;  %5468 = vmatprep.mubr.bf16.mxu1 %v9002_v44 }
 0x247   :  { %v4999_v36 = vpop.f32.mrb[165].mxu0 }
 0x248   :  { %v11621_v63 = vpop.f32.mrb[166].mxu0 }
 0x249   :  { %v5002_v0 = vpop.f32.mrb[167].mxu0 }
 0x24d   :  { %5469 = vmatmul.mubr.bf16.gmra.mrb[112].mxu1 %v9004_v58 }
 0x24e   :  { %v11629_v20 = vpop.f32.mrb[168].mxu0  ;;  %5476 = vmatprep.mubr.bf16.mxu1 %v9005_v34  ;;  %v9014_v34 = vld [vmem:[%s12958_s3 + $0x10] ss:$36 sps:$4 sm:$0xff]  }
 0x24f   :  { %v5007_v55 = vpop.f32.mrb[169].mxu0 }
 0x250   :  { %v11631_v61 = vpop.f32.mrb[170].mxu0  ;;  %v9017_v55 = vld [vmem:[%s12958_s3 + $0x5c] ss:$36 sps:$4 sm:$0xff]  }
 0x251   :  { %v5010_v23 = vpop.f32.mrb[171].mxu0 }
 0x252   :  { %v13058_v23 = vpack.c.bf16 %v11082_v21, %v11080_v28  ;;  %v9020_v28 = vld [vmem:[%s12958_s3 + $0xa4] ss:$36 sps:$4 sm:$0xff]  }
 0x255   :  { %5477 = vmatmul.mubr.bf16.gmra.mrb[116].mxu1 %v9007_v57 }
 0x256   :  { %v11639_v6 = vpop.f32.mrb[172].mxu0  ;;  %5484 = vmatprep.mubr.bf16.mxu1 %v9008_v3 }
 0x257   :  { %v5015_v48 = vpop.f32.mrb[173].mxu0 }
 0x258   :  { %v11641_v29 = vpop.f32.mrb[174].mxu0 }
 0x259   :  { %v5018_v13 = vpop.f32.mrb[175].mxu0 }
 0x25a   :  { %v9019_v13 = vld [vmem:[%s12958_s3 + $0x58] ss:$36 sps:$4 sm:$0xff]  }
 0x25d   :  { %5485 = vmatmul.mubr.bf16.gmra.mrb[120].mxu1 %v9010_v31 }
 0x25e   :  { %v11649_v54 = vpop.f32.mrb[176].mxu0  ;;  %5492 = vmatprep.mubr.bf16.mxu1 %v9011_v53  ;;  %v13060_v53 = vpack.c.bf16 %v11064_v62, %v11062_v11  ;;  %v9022_v62 = vld [vmem:[%s12958_s3 + $0xa0] ss:$36 sps:$4 sm:$0xff]  }
 0x25f   :  { %v5023_v38 = vpop.f32.mrb[177].mxu0 }
 0x260   :  { %v11651_v32 = vpop.f32.mrb[178].mxu0  ;;  %v13062_v38 = vpack.c.bf16 %v11134_v35, %v11132_v16  ;;  %v9023_v16 = vld [vmem:[%s12958_s3 + $0xec] ss:$36 sps:$4 sm:$0xff]  }
 0x261   :  { %v5026_v17 = vpop.f32.mrb[179].mxu0 }
 0x265   :  { %5493 = vmatmul.mubr.bf16.gmra.mrb[124].mxu1 %v9013_v60 }
 0x266   :  { %v11659_v44 = vpop.f32.mrb[180].mxu0  ;;  %5533 = vmatprep.mubr.bf16.mxu1 %v9016_v59  ;;  %v13064_v59 = vpack.c.bf16 %v11115_v42, %v11113_v30  ;;  %v9025_v42 = vld [vmem:[%s12958_s3 + $0xe8] ss:$36 sps:$4 sm:$0xff]  }
 0x267   :  { %v5031_v36 = vpop.f32.mrb[181].mxu0 }
 0x268   :  { %v11661_v58 = vpop.f32.mrb[182].mxu0  ;;  %v13066_v36 = vpack.c.bf16 %v11179_v49, %v11177_v19  ;;  %v9026_v19 = vld [vmem:[%s12958_s3 + $0x134] ss:$36 sps:$4 sm:$0xff]  }
 0x269   :  { %v5034_v0 = vpop.f32.mrb[183].mxu0 }
 0x26d   :  { %5534 = vmatmul.mubr.bf16.vlgmr.msra.gmra.mrb[0].mxu1 %v9014_v34 }
 0x26e   :  { %v11669_v57 = vpop.f32.mrb[184].mxu0  ;;  %5791 = vmatpush1.bf16.msra.mxu1 %v13058_v23  ;;  %5541 = vmatprep.mubr.bf16.mxu1 %v9017_v55  ;;  %v13068_v55 = vpack.c.bf16 %v11166_v14, %v11164_v22  ;;  %v13070_v23 = vpack.c.bf16 %v11225_v52, %v11223_v50  ;;  %v9028_v14 = vld [vmem:[%s12958_s3 + $0x130] ss:$36 sps:$4 sm:$0xff]   ;;  %v9029_v50 = vld [vmem:[%s12958_s3 + $0x17c] ss:$36 sps:$4 sm:$0xff]  }
 0x26f   :  { %v5039_v3 = vpop.f32.mrb[185].mxu0  ;;  %5792 = vmatprep.subr.bf16.mxu1 %v13013_v18 }
 0x270   :  { %v11675_v48 = vpop.f32.mrb[186].mxu0 }
 0x271   :  { %13059 = vst [vmem:[#allocation10_spill] sm:$0xff] %v11675_v48  ;;  %v5042_v31 = vpop.f32.mrb[187].mxu0 }
 0x272   :  { %5793 = vmatpush1.bf16.msra.mxu1 %v13060_v53  ;;  %v13074_v53 = vpack.c.bf16 %v11271_v1, %v11269_v47  ;;  %v9032_v47 = vld [vmem:[%s12958_s3 + $0x1c4] ss:$36 sps:$4 sm:$0xff]  }
 0x273   :  { %5794 = vmatprep.subr.bf16.mxu1 %v13013_v18 }
 0x275   :  { %5542 = vmatmul.mubr.bf16.gmra.mrb[4].mxu1 %v9019_v13  ;;  %v13072_v13 = vpack.c.bf16 %v11210_v56, %v11208_v12  ;;  %v9031_v56 = vld [vmem:[%s12958_s3 + $0x178] ss:$36 sps:$4 sm:$0xff]  }
 0x276   :  { %v11687_v21 = vpop.f32.mrb[188].mxu0  ;;  %5795 = vmatpush1.bf16.msra.mxu1 %v13062_v38  ;;  %5549 = vmatprep.mubr.bf16.mxu1 %v9020_v28 }
 0x277   :  { %13061 = vst [vmem:[#allocation8_spill] sm:$0xff] %v11687_v21  ;;  %v5047_v60 = vpop.f32.mrb[189].mxu0  ;;  %5796 = vmatprep.subr.bf16.mxu1 %v13013_v18 }
 0x278   :  { %v11693_v17 = vpop.f32.mrb[190].mxu0  ;;  %v13076_v60 = vpack.c.bf16 %v11256_v39, %v11254_v15  ;;  %v9034_v39 = vld [vmem:[%s12958_s3 + $0x1c0] ss:$36 sps:$4 sm:$0xff]  }
 0x279   :  { %13063 = vst [vmem:[#allocation9_spill] sm:$0xff] %v11693_v17  ;;  %v5050_v11 = vpop.f32.mrb[191].mxu0 }
 0x27a   :  { %5797 = vmatpush1.bf16.msra.mxu1 %v13064_v59  ;;  %v13078_v11 = vpack.c.bf16 %v11315_v9, %v11313_v4  ;;  %v9035_v4 = vld [vmem:[%s12958_s3 + $0x20c] ss:$36 sps:$4 sm:$0xff]  }
 0x27b   :  { %5798 = vmatprep.subr.bf16.mxu1 %v13013_v18 }
 0x27d   :  { %5550 = vmatmul.mubr.bf16.gmra.mrb[8].mxu1 %v9022_v62 }
 0x27e   :  { %v11705_v35 = vpop.f32.mrb[192].mxu0  ;;  %5799 = vmatpush1.bf16.msra.mxu1 %v13066_v36  ;;  %5557 = vmatprep.mubr.bf16.mxu1 %v9023_v16  ;;  %v13080_v16 = vpack.c.bf16 %v11302_v7, %v11300_v33  ;;  %v13082_v36 = vpack.c.bf16 %v11365_v37, %v11363_v2  ;;  %v9037_v7 = vld [vmem:[%s12958_s3 + $0x208] ss:$36 sps:$4 sm:$0xff]   ;;  %v9038_v37 = vld [vmem:[%s12958_s3 + $0x254] ss:$36 sps:$4 sm:$0xff]  }
 0x27f   :  { %13065 = vst [vmem:[#allocation7_spill] sm:$0xff] %v11705_v35  ;;  %v5055_v0 = vpop.f32.mrb[193].mxu0  ;;  %5800 = vmatprep.subr.bf16.mxu1 %v13013_v18 }
 0x280   :  { %v11711_v34 = vpop.f32.mrb[194].mxu0 }
 0x281   :  { %13067 = vst [vmem:[#allocation14_spill] sm:$0xff] %v11711_v34  ;;  %v5058_v30 = vpop.f32.mrb[195].mxu0 }
 0x282   :  { %5801 = vmatpush1.bf16.msra.mxu1 %v13068_v55  ;;  %v13086_v55 = vld [vmem:[#allocation3_spill] sm:$0xff] }
 0x283   :  { %5802 = vmatprep.subr.bf16.mxu1 %v13013_v18 }
 0x285   :  { %5558 = vmatmul.mubr.bf16.gmra.mrb[12].mxu1 %v9025_v42  ;;  %v13084_v42 = vpack.c.bf16 %v11357_v46, %v11355_v8  ;;  %v9040_v8 = vld [vmem:[%s12958_s3 + $0x250] ss:$36 sps:$4 sm:$0xff]  }
 0x286   :  { %v11723_v49 = vpop.f32.mrb[196].mxu0  ;;  %5803 = vmatpush1.bf16.msra.mxu1 %v13070_v23  ;;  %5565 = vmatprep.mubr.bf16.mxu1 %v9026_v19  ;;  %v13087_v19 = vld [vmem:[#allocation5_spill] sm:$0xff] }
 0x287   :  { %13069 = vst [vmem:[#allocation12_spill] sm:$0xff] %v11723_v49  ;;  %v5063_v3 = vpop.f32.mrb[197].mxu0  ;;  %5804 = vmatprep.subr.bf16.mxu1 %v13013_v18  ;;  %v13088_v23 = vpack.c.bf16 %v13086_v55, %v13087_v19 }
 0x288   :  { %v11729_v31 = vpop.f32.mrb[198].mxu0 }
 0x289   :  { %13071 = vst [vmem:[#allocation13_spill] sm:$0xff] %v11729_v31  ;;  %v5066_v22 = vpop.f32.mrb[199].mxu0  ;;  %v9210_v31 = vld [vmem:[%s12958_s3 + $0x6d8] ss:$36 sps:$4 sm:$0xff]  }
 0x28a   :  { %5805 = vmatpush1.bf16.msra.mxu1 %v13072_v13  ;;  %v13091_v13 = vld [vmem:[#allocation6_spill] sm:$0xff] }
 0x28b   :  { %5806 = vmatprep.subr.bf16.mxu1 %v13013_v18 }
 0x28d   :  { %5566 = vmatmul.mubr.bf16.gmra.mrb[16].mxu1 %v9028_v14  ;;  %v13090_v14 = vld [vmem:[#allocation4_spill] sm:$0xff] }
 0x28e   :  { %v11741_v52 = vpop.f32.mrb[200].mxu0  ;;  %5807 = vmatpush1.bf16.msra.mxu1 %v13074_v53  ;;  %5573 = vmatprep.mubr.bf16.mxu1 %v9029_v50  ;;  %v13092_v50 = vpack.c.bf16 %v13090_v14, %v13091_v13  ;;  %v9041_v53 = vld [vmem:[%s12958_s3 + $0x29c] ss:$36 sps:$4 sm:$0xff]  }
 0x28f   :  { %13073 = vst [vmem:[#allocation11_spill] sm:$0xff] %v11741_v52  ;;  %v5071_v28 = vpop.f32.mrb[201].mxu0  ;;  %5808 = vmatprep.subr.bf16.mxu1 %v13013_v18 }
 0x290   :  { %v11747_v38 = vpop.f32.mrb[202].mxu0 }
 0x291   :  { %13075 = vst [vmem:[#allocation18_spill] sm:$0xff] %v11747_v38  ;;  %v5074_v12 = vpop.f32.mrb[203].mxu0 }
 0x292   :  { %5809 = vmatpush1.bf16.msra.mxu1 %v13076_v60  ;;  %v9043_v60 = vld [vmem:[%s12958_s3 + $0x298] ss:$36 sps:$4 sm:$0xff]  }
 0x293   :  { %5810 = vmatprep.subr.bf16.mxu1 %v13013_v18 }
 0x295   :  { %5574 = vmatmul.mubr.bf16.gmra.mrb[20].mxu1 %v9031_v56 }
 0x296   :  { %v11759_v1 = vpop.f32.mrb[204].mxu0  ;;  %5811 = vmatpush1.bf16.msra.mxu1 %v13078_v11  ;;  %5581 = vmatprep.mubr.bf16.mxu1 %v9032_v47  ;;  %v9044_v47 = vld [vmem:[%s12958_s3 + $0x2e4] ss:$36 sps:$4 sm:$0xff]  }
 0x297   :  { %13077 = vst [vmem:[#allocation16_spill] sm:$0xff] %v11759_v1  ;;  %v5079_v62 = vpop.f32.mrb[205].mxu0  ;;  %5812 = vmatprep.subr.bf16.mxu1 %v13013_v18 }
 0x298   :  { %v11765_v59 = vpop.f32.mrb[206].mxu0 }
 0x299   :  { %13079 = vst [vmem:[#allocation17_spill] sm:$0xff] %v11765_v59  ;;  %v5082_v15 = vpop.f32.mrb[207].mxu0 }
 0x29a   :  { %5813 = vmatpush1.bf16.msra.mxu1 %v13080_v16  ;;  %v9046_v16 = vld [vmem:[%s12958_s3 + $0x2e0] ss:$36 sps:$4 sm:$0xff]  }
 0x29b   :  { %5814 = vmatprep.subr.bf16.mxu1 %v13013_v18 }
 0x29d   :  { %5582 = vmatmul.mubr.bf16.gmra.mrb[24].mxu1 %v9034_v39 }
 0x29e   :  { %v11777_v9 = vpop.f32.mrb[208].mxu0  ;;  %5815 = vmatpush1.bf16.msra.mxu1 %v13082_v36  ;;  %5589 = vmatprep.mubr.bf16.mxu1 %v9035_v4  ;;  %v9047_v4 = vld [vmem:[%s12958_s3 + $0x32c] ss:$36 sps:$4 sm:$0xff]  }
 0x29f   :  { %13081 = vst [vmem:[#allocation15_spill] sm:$0xff] %v11777_v9  ;;  %v5087_v0 = vpop.f32.mrb[209].mxu0  ;;  %5816 = vmatprep.subr.bf16.mxu1 %v13013_v18  ;;  %v9208_v9 = vld [vmem:[%s12958_s3 + $0x6dc] ss:$36 sps:$4 sm:$0xff]  }
 0x2a0   :  { %v11783_v30 = vpop.f32.mrb[210].mxu0 }
 0x2a1   :  { %13083 = vst [vmem:[#allocation22_spill] sm:$0xff] %v11783_v30  ;;  %v5090_v33 = vpop.f32.mrb[211].mxu0 }
 0x2a2   :  { %5817 = vmatpush1.bf16.msra.mxu1 %v13084_v42  ;;  %v9049_v42 = vld [vmem:[%s12958_s3 + $0x328] ss:$36 sps:$4 sm:$0xff]  }
 0x2a3   :  { %5818 = vmatprep.subr.bf16.mxu1 %v13013_v18 }
 0x2a5   :  { %5590 = vmatmul.mubr.bf16.gmra.mrb[28].mxu1 %v9037_v7 }
 0x2a6   :  { %v11795_v2 = vpop.f32.mrb[212].mxu0  ;;  %5819 = vmatpush1.bf16.msra.mxu1 %v13088_v23  ;;  %5597 = vmatprep.mubr.bf16.mxu1 %v9038_v37  ;;  %v9050_v37 = vld [vmem:[%s12958_s3 + $0x374] ss:$36 sps:$4 sm:$0xff]  }
 0x2a7   :  { %13085 = vst [vmem:[#allocation20_spill] sm:$0xff] %v11795_v2  ;;  %v5095_v3 = vpop.f32.mrb[213].mxu0  ;;  %5820 = vmatprep.subr.bf16.mxu1 %v13013_v18  ;;  %v12290_v2 = vpop.permute.xlu1 %3218 }
 0x2a8   :  { %v11801_v22 = vpop.f32.mrb[214].mxu0 }
 0x2a9   :  { %13089 = vst [vmem:[#allocation21_spill] sm:$0xff] %v11801_v22  ;;  %v5098_v46 = vpop.f32.mrb[215].mxu0  ;;  %v12288_v22 = vpop.permute.xlu0 %3213 }
 0x2aa   :  { %5821 = vmatpush1.bf16.msra.mxu1 %v13092_v50  ;;  %v9052_v46 = vld [vmem:[%s12958_s3 + $0x370] ss:$36 sps:$4 sm:$0xff]  }
 0x2ab   :  { %v3139_v30 = vpop.permute.xlu1 %3138 }
 0x2ad   :  { %5598 = vmatmul.mubr.bf16.gmra.mrb[32].mxu1 %v9040_v8  ;;  %v9053_v8 = vld [vmem:[%s12958_s3 + $0x3bc] ss:$36 sps:$4 sm:$0xff]  }
 0x2ae   :  { %v11812_v28 = vpop.f32.mrb[216].mxu0  ;;  %5605 = vmatprep.mubr.bf16.mxu1 %v9041_v53 }
 0x2af   :  { %13093 = vst [vmem:[#allocation19_spill] sm:$0xff] %v11812_v28  ;;  %v5103_v12 = vpop.f32.mrb[217].mxu0  ;;  %v12308_v52 = vpop.permute.xlu1 %3228 }
 0x2b0   :  { %v11814_v18 = vpop.f32.mrb[218].mxu0  ;;  %v9055_v12 = vld [vmem:[%s12958_s3 + $0x3b8] ss:$36 sps:$4 sm:$0xff]  }
 0x2b1   :  { %13094 = vst [vmem:[#allocation26_spill] sm:$0xff] %v11814_v18  ;;  %v5106_v56 = vpop.f32.mrb[219].mxu0 }
 0x2b2   :  { %v9056_v56 = vld [vmem:[%s12958_s3 + $0x404] ss:$36 sps:$4 sm:$0xff]  }
 0x2b5   :  { %5606 = vmatmul.mubr.bf16.gmra.mrb[36].mxu1 %v9043_v60 }
 0x2b6   :  { %v11822_v11 = vpop.f32.mrb[220].mxu0  ;;  %5613 = vmatprep.mubr.bf16.mxu1 %v9044_v47 }
 0x2b7   :  { %13095 = vst [vmem:[#allocation24_spill] sm:$0xff] %v11822_v11  ;;  %v5111_v62 = vpop.f32.mrb[221].mxu0 }
 0x2b8   :  { %v11824_v15 = vpop.f32.mrb[222].mxu0 }
 0x2b9   :  { %13096 = vst [vmem:[#allocation25_spill] sm:$0xff] %v11824_v15  ;;  %v5114_v39 = vpop.f32.mrb[223].mxu0  ;;  %v9197_v15 = vld [vmem:[%s12958_s3 + $0x600] ss:$36 sps:$4 sm:$0xff]  }
 0x2bd   :  { %5614 = vmatmul.mubr.bf16.gmra.mrb[40].mxu1 %v9046_v16  ;;  %v9058_v16 = vld [vmem:[%s12958_s3 + $0x400] ss:$36 sps:$4 sm:$0xff]  }
 0x2be   :  { %v11832_v36 = vpop.f32.mrb[224].mxu0  ;;  %5621 = vmatprep.mubr.bf16.mxu1 %v9047_v4  ;;  %v9059_v4 = vld [vmem:[%s12958_s3 + $0x44c] ss:$36 sps:$4 sm:$0xff]  }
 0x2bf   :  { %13097 = vst [vmem:[#allocation23_spill] sm:$0xff] %v11832_v36  ;;  %v5119_v0 = vpop.f32.mrb[225].mxu0 }
 0x2c0   :  { %v11834_v33 = vpop.f32.mrb[226].mxu0 }
 0x2c1   :  { %13098 = vst [vmem:[#allocation30_spill] sm:$0xff] %v11834_v33  ;;  %v5122_v7 = vpop.f32.mrb[227].mxu0 }
 0x2c5   :  { %5622 = vmatmul.mubr.bf16.gmra.mrb[44].mxu1 %v9049_v42 }
 0x2c6   :  { %v11842_v55 = vpop.f32.mrb[228].mxu0  ;;  %5629 = vmatprep.mubr.bf16.mxu1 %v9050_v37 }
 0x2c7   :  { %13099 = vst [vmem:[#allocation28_spill] sm:$0xff] %v11842_v55  ;;  %v5127_v19 = vpop.f32.mrb[229].mxu0 }
 0x2c8   :  { %v11844_v23 = vpop.f32.mrb[230].mxu0  ;;  %v9061_v19 = vld [vmem:[%s12958_s3 + $0x448] ss:$36 sps:$4 sm:$0xff]  }
 0x2c9   :  { %13100 = vst [vmem:[#allocation29_spill] sm:$0xff] %v11844_v23  ;;  %v5130_v3 = vpop.f32.mrb[231].mxu0  ;;  %v9189_v23 = vld [vmem:[%s12958_s3 + $0x570] ss:$36 sps:$4 sm:$0xff]  }
 0x2ca   :  { %v9062_v3 = vld [vmem:[%s12958_s3 + $0x494] ss:$36 sps:$4 sm:$0xff]  }
 0x2cd   :  { %5630 = vmatmul.mubr.bf16.gmra.mrb[48].mxu1 %v9052_v46 }
 0x2ce   :  { %v11852_v14 = vpop.f32.mrb[232].mxu0  ;;  %5637 = vmatprep.mubr.bf16.mxu1 %v9053_v8 }
 0x2cf   :  { %13101 = vst [vmem:[#allocation27_spill] sm:$0xff] %v11852_v14  ;;  %v5135_v13 = vpop.f32.mrb[233].mxu0 }
 0x2d0   :  { %v11854_v50 = vpop.f32.mrb[234].mxu0 }
 0x2d1   :  { %13102 = vst [vmem:[#allocation34_spill] sm:$0xff] %v11854_v50  ;;  %v5138_v53 = vpop.f32.mrb[235].mxu0 }
 0x2d5   :  { %5638 = vmatmul.mubr.bf16.gmra.mrb[52].mxu1 %v9055_v12  ;;  %v9064_v12 = vld [vmem:[%s12958_s3 + $0x490] ss:$36 sps:$4 sm:$0xff]  }
 0x2d6   :  { %v11862_v60 = vpop.f32.mrb[236].mxu0  ;;  %5645 = vmatprep.mubr.bf16.mxu1 %v9056_v56  ;;  %v9065_v56 = vld [vmem:[%s12958_s3 + $0x4dc] ss:$36 sps:$4 sm:$0xff]  }
 0x2d7   :  { %13103 = vst [vmem:[#allocation32_spill] sm:$0xff] %v11862_v60  ;;  %v5143_v47 = vpop.f32.mrb[237].mxu0  ;;  %v9179_v60 = vld [vmem:[%s12958_s3 + $0x4e4] ss:$36 sps:$4 sm:$0xff]  }
 0x2d8   :  { %v11864_v62 = vpop.f32.mrb[238].mxu0 }
 0x2d9   :  { %13104 = vst [vmem:[#allocation33_spill] sm:$0xff] %v11864_v62  ;;  %v5146_v39 = vpop.f32.mrb[239].mxu0  ;;  %v9176_v62 = vld [vmem:[%s12958_s3 + $0x498] ss:$36 sps:$4 sm:$0xff]  }
 0x2da   :  { %v9113_v39 = vld [vmem:[%s12958_s3 + $0x20] ss:$36 sps:$4 sm:$0xff]  }
 0x2db   :  { %8274 = vmatprep.mubr.bf16.mxu0 %v9113_v39  ;;  %v9070_v39 = vld [vmem:[%s12958_s3 + $0x520] ss:$36 sps:$4 sm:$0xff]  }
 0x2dd   :  { %5646 = vmatmul.mubr.bf16.gmra.mrb[56].mxu1 %v9058_v16  ;;  %v9114_v16 = vld [vmem:[%s12958_s3 + $0x68] ss:$36 sps:$4 sm:$0xff]  }
 0x2de   :  { %v11872_v0 = vpop.f32.mrb[240].mxu0  ;;  %5653 = vmatprep.mubr.bf16.mxu1 %v9059_v4  ;;  %8275 = vmatmul.mubr.bf16.vlgmr.msra.gmra.mrb[16].mxu0 %v9114_v16  ;;  %v9071_v16 = vld [vmem:[%s12958_s3 + $0x56c] ss:$36 sps:$4 sm:$0xff]  }
 0x2df   :  { %13105 = vst [vmem:[#allocation31_spill] sm:$0xff] %v11872_v0  ;;  %v5151_v7 = vpop.f32.mrb[241].mxu0 }
 0x2e0   :  { %v11874_v42 = vpop.f32.mrb[242].mxu0 }
 0x2e1   :  { %13106 = vst [vmem:[#allocation38_spill] sm:$0xff] %v11874_v42  ;;  %v5154_v37 = vpop.f32.mrb[243].mxu0 }
 0x2e5   :  { %5654 = vmatmul.mubr.bf16.gmra.mrb[60].mxu1 %v9061_v19  ;;  %v9067_v19 = vld [vmem:[%s12958_s3 + $0x4d8] ss:$36 sps:$4 sm:$0xff]  }
 0x2e6   :  { %v11882_v46 = vpop.f32.mrb[244].mxu0  ;;  %5661 = vmatprep.mubr.bf16.mxu1 %v9062_v3  ;;  %v9068_v3 = vld [vmem:[%s12958_s3 + $0x524] ss:$36 sps:$4 sm:$0xff]  }
 0x2e7   :  { %13107 = vst [vmem:[#allocation36_spill] sm:$0xff] %v11882_v46  ;;  %v5159_v8 = vpop.f32.mrb[245].mxu0  ;;  %v9171_v46 = vld [vmem:[%s12958_s3 + $0x454] ss:$36 sps:$4 sm:$0xff]  }
 0x2e8   :  { %v11884_v13 = vpop.f32.mrb[246].mxu0 }
 0x2e9   :  { %13108 = vst [vmem:[#allocation37_spill] sm:$0xff] %v11884_v13  ;;  %v5162_v53 = vpop.f32.mrb[247].mxu0  ;;  %v9168_v13 = vld [vmem:[%s12958_s3 + $0x408] ss:$36 sps:$4 sm:$0xff]  }
 0x2ed   :  { %5662 = vmatmul.mubr.bf16.gmra.mrb[64].mxu1 %v9064_v12 }
 0x2ee   :  { %v11892_v47 = vpop.f32.mrb[248].mxu0  ;;  %5669 = vmatprep.mubr.bf16.mxu1 %v9065_v56 }
 0x2ef   :  { %13109 = vst [vmem:[#allocation35_spill] sm:$0xff] %v11892_v47  ;;  %v5167_v4 = vpop.f32.mrb[249].mxu0 }
 0x2f0   :  { %v11900_v7 = vpop.f32.mrb[250].mxu0 }
 0x2f1   :  { %13110 = vst [vmem:[#allocation42_spill] sm:$0xff] %v11900_v7  ;;  %v5170_v37 = vpop.f32.mrb[251].mxu0 }
 0x2f2   :  { %v9121_v37 = vld [vmem:[%s12958_s3 + $0xb0] ss:$36 sps:$4 sm:$0xff]  }
 0x2f3   :  { %8278 = vmatprep.mubr.bf16.mxu0 %v9121_v37  ;;  %v9076_v37 = vld [vmem:[%s12958_s3 + $0x5b0] ss:$36 sps:$4 sm:$0xff]  }
 0x2f5   :  { %5670 = vmatmul.mubr.bf16.gmra.mrb[68].mxu1 %v9067_v19  ;;  %v9122_v19 = vld [vmem:[%s12958_s3 + $0xf8] ss:$36 sps:$4 sm:$0xff]  }
 0x2f6   :  { %v11908_v8 = vpop.f32.mrb[252].mxu0  ;;  %5677 = vmatprep.mubr.bf16.mxu1 %v9068_v3  ;;  %8279 = vmatmul.mubr.bf16.gmra.mrb[20].mxu0 %v9122_v19  ;;  %v9077_v19 = vld [vmem:[%s12958_s3 + $0x5fc] ss:$36 sps:$4 sm:$0xff]  }
 0x2f7   :  { %13111 = vst [vmem:[#allocation40_spill] sm:$0xff] %v11908_v8  ;;  %v5175_v53 = vpop.f32.mrb[253].mxu0 }
 0x2f8   :  { %v11910_v12 = vpop.f32.mrb[254].mxu0 }
 0x2f9   :  { %13112 = vst [vmem:[#allocation41_spill] sm:$0xff] %v11910_v12  ;;  %v5178_v56 = vpop.f32.mrb[255].mxu0 }
 0x2fd   :  { %5678 = vmatmul.mubr.bf16.gmra.mrb[72].mxu1 %v9070_v39  ;;  %v9073_v39 = vld [vmem:[%s12958_s3 + $0x568] ss:$36 sps:$4 sm:$0xff]  }
 0x2fe   :  { %v11918_v4 = vpop.f32.mrb[0].mxu0  ;;  %5685 = vmatprep.mubr.bf16.mxu1 %v9071_v16 }
 0x2ff   :  { %13113 = vst [vmem:[#allocation39_spill] sm:$0xff] %v11918_v4  ;;  %v5183_v3 = vpop.f32.mrb[1].mxu0  ;;  %v9074_v4 = vld [vmem:[%s12958_s3 + $0x5b4] ss:$36 sps:$4 sm:$0xff]  }
 0x300   :  { %v11926_v53 = vpop.f32.mrb[2].mxu0 }
 0x301   :  { %13114 = vst [vmem:[#allocation3_spill] sm:$0xff] %v11926_v53  ;;  %v5186_v56 = vpop.f32.mrb[3].mxu0 }
 0x305   :  { %5686 = vmatmul.mubr.bf16.gmra.mrb[76].mxu1 %v9073_v39  ;;  %v9129_v39 = vld [vmem:[%s12958_s3 + $0x140] ss:$36 sps:$4 sm:$0xff]  }
 0x306   :  { %v11934_v12 = vpop.f32.mrb[4].mxu0  ;;  %5693 = vmatprep.mubr.bf16.mxu1 %v9074_v4  ;;  %8282 = vmatprep.mubr.bf16.mxu0 %v9129_v39  ;;  %v9083_v39 = vld [vmem:[%s12958_s3 + $0x68c] ss:$36 sps:$4 sm:$0xff]  }
 0x307   :  { %13115 = vst [vmem:[#allocation5_spill] sm:$0xff] %v11934_v12  ;;  %v5191_v8 = vpop.f32.mrb[5].mxu0 }
 0x308   :  { %v11936_v3 = vpop.f32.mrb[6].mxu0  ;;  %v9130_v8 = vld [vmem:[%s12958_s3 + $0x188] ss:$36 sps:$4 sm:$0xff]  }
 0x309   :  { %13116 = vst [vmem:[#allocation4_spill] sm:$0xff] %v11936_v3  ;;  %v5194_v16 = vpop.f32.mrb[7].mxu0  ;;  %8283 = vmatmul.mubr.bf16.gmra.mrb[24].mxu0 %v9130_v8  ;;  %v9137_v8 = vld [vmem:[%s12958_s3 + $0x1d0] ss:$36 sps:$4 sm:$0xff]  }
 0x30a   :  { %8286 = vmatprep.mubr.bf16.mxu0 %v9137_v8  ;;  %v9089_v8 = vld [vmem:[%s12958_s3 + $0x71c] ss:$36 sps:$4 sm:$0xff]  }
 0x30d   :  { %5694 = vmatmul.mubr.bf16.gmra.mrb[80].mxu1 %v9076_v37  ;;  %v9079_v37 = vld [vmem:[%s12958_s3 + $0x5f8] ss:$36 sps:$4 sm:$0xff]  }
 0x30e   :  { %v11944_v56 = vpop.f32.mrb[8].mxu0  ;;  %5701 = vmatprep.mubr.bf16.mxu1 %v9077_v19 }
 0x30f   :  { %13117 = vst [vmem:[#allocation6_spill] sm:$0xff] %v11944_v56  ;;  %v5199_v4 = vpop.f32.mrb[9].mxu0  ;;  %v9080_v56 = vld [vmem:[%s12958_s3 + $0x644] ss:$36 sps:$4 sm:$0xff]  }
 0x310   :  { %v11952_v16 = vpop.f32.mrb[10].mxu0 }
 0x311   :  { %13118 = vst [vmem:[#allocation43_spill] sm:$0xff] %v11952_v16  ;;  %v5202_v3 = vpop.f32.mrb[11].mxu0  ;;  %v9166_v16 = vld [vmem:[%s12958_s3 + $0x40c] ss:$36 sps:$4 sm:$0xff]  }
 0x312   :  { %v9082_v3 = vld [vmem:[%s12958_s3 + $0x640] ss:$36 sps:$4 sm:$0xff]  }
 0x315   :  { %5702 = vmatmul.mubr.bf16.gmra.mrb[84].mxu1 %v9079_v37  ;;  %v9086_v37 = vld [vmem:[%s12958_s3 + $0x6d4] ss:$36 sps:$4 sm:$0xff]  }
 0x316   :  { %v11960_v12 = vpop.f32.mrb[12].mxu0  ;;  %5709 = vmatprep.mubr.bf16.mxu1 %v9080_v56  ;;  %v9085_v56 = vld [vmem:[%s12958_s3 + $0x688] ss:$36 sps:$4 sm:$0xff]  }
 0x317   :  { %13119 = vst [vmem:[#allocation44_spill] sm:$0xff] %v11960_v12  ;;  %v5207_v53 = vpop.f32.mrb[13].mxu0  ;;  %v9165_v12 = vld [vmem:[%s12958_s3 + $0x3c0] ss:$36 sps:$4 sm:$0xff]  }
 0x318   :  { %v11962_v4 = vpop.f32.mrb[14].mxu0  ;;  %v9138_v53 = vld [vmem:[%s12958_s3 + $0x218] ss:$36 sps:$4 sm:$0xff]  }
 0x319   :  { %13120 = vst [vmem:[#allocation45_spill] sm:$0xff] %v11962_v4  ;;  %v5210_v19 = vpop.f32.mrb[15].mxu0  ;;  %8287 = vmatmul.mubr.bf16.gmra.mrb[28].mxu0 %v9138_v53  ;;  %v9091_v53 = vld [vmem:[%s12958_s3 + $0x718] ss:$36 sps:$4 sm:$0xff]  }
 0x31a   :  { %v9142_v19 = vld [vmem:[%s12958_s3 + $0x260] ss:$36 sps:$4 sm:$0xff]  }
 0x31b   :  { %8290 = vmatprep.mubr.bf16.mxu0 %v9142_v19  ;;  %v9095_v19 = vld [vmem:[%s12958_s3 + $0x7ac] ss:$36 sps:$4 sm:$0xff]  }
 0x31d   :  { %5710 = vmatmul.mubr.bf16.gmra.mrb[88].mxu1 %v9082_v3  ;;  %v9143_v3 = vld [vmem:[%s12958_s3 + $0x2a8] ss:$36 sps:$4 sm:$0xff]  }
 0x31e   :  { %5717 = vmatprep.mubr.bf16.mxu1 %v9083_v39  ;;  %v9088_v39 = vld [vmem:[%s12958_s3 + $0x6d0] ss:$36 sps:$4 sm:$0xff]  }
 0x321   :  { %8291 = vmatmul.mubr.bf16.gmra.mrb[32].mxu0 %v9143_v3  ;;  %v9153_v3 = vld [vmem:[%s12958_s3 + $0x2f0] ss:$36 sps:$4 sm:$0xff]  }
 0x322   :  { %8294 = vmatprep.mubr.bf16.mxu0 %v9153_v3  ;;  %v9162_v3 = vld [vmem:[%s12958_s3 + $0x3c8] ss:$36 sps:$4 sm:$0xff]  }
 0x325   :  { %5718 = vmatmul.mubr.bf16.gmra.mrb[92].mxu1 %v9085_v56  ;;  %v9092_v56 = vld [vmem:[%s12958_s3 + $0x764] ss:$36 sps:$4 sm:$0xff]  }
 0x326   :  { %5725 = vmatprep.mubr.bf16.mxu1 %v9086_v37  ;;  %v9094_v37 = vld [vmem:[%s12958_s3 + $0x760] ss:$36 sps:$4 sm:$0xff]  }
 0x32d   :  { %5726 = vmatmul.mubr.bf16.gmra.mrb[96].mxu1 %v9088_v39  ;;  %v9154_v39 = vld [vmem:[%s12958_s3 + $0x338] ss:$36 sps:$4 sm:$0xff]  }
 0x32e   :  { %5733 = vmatprep.mubr.bf16.mxu1 %v9089_v8  ;;  %8295 = vmatmul.mubr.bf16.gmra.mrb[36].mxu0 %v9154_v39  ;;  %v9097_v8 = vld [vmem:[%s12958_s3 + $0x7a8] ss:$36 sps:$4 sm:$0xff]   ;;  %v9103_v39 = vld [vmem:[%s12958_s3 + $0x838] ss:$36 sps:$4 sm:$0xff]  }
 0x335   :  { %5734 = vmatmul.mubr.bf16.gmra.mrb[100].mxu1 %v9091_v53  ;;  %v9098_v53 = vld [vmem:[%s12958_s3 + $0x7f4] ss:$36 sps:$4 sm:$0xff]  }
 0x336   :  { %5741 = vmatprep.mubr.bf16.mxu1 %v9092_v56  ;;  %v9100_v56 = vld [vmem:[%s12958_s3 + $0x7f0] ss:$36 sps:$4 sm:$0xff]  }
 0x33d   :  { %5742 = vmatmul.mubr.bf16.gmra.mrb[104].mxu1 %v9094_v37  ;;  %v9101_v37 = vld [vmem:[%s12958_s3 + $0x83c] ss:$36 sps:$4 sm:$0xff]  }
 0x33e   :  { %5749 = vmatprep.mubr.bf16.mxu1 %v9095_v19  ;;  %v9161_v19 = vld [vmem:[%s12958_s3 + $0x380] ss:$36 sps:$4 sm:$0xff]  }
 0x33f   :  { %8298 = vmatprep.mubr.bf16.mxu0 %v9161_v19  ;;  %v9170_v19 = vld [vmem:[%s12958_s3 + $0x458] ss:$36 sps:$4 sm:$0xff]  }
 0x340   :  { %8299 = vmatmul.mubr.bf16.gmra.mrb[40].mxu0 %v9162_v3  ;;  %v9109_v3 = vld [vmem:[%s12958_s3 + $0x8c8] ss:$36 sps:$4 sm:$0xff]  }
 0x345   :  { %5750 = vmatmul.mubr.bf16.gmra.mrb[108].mxu1 %v9097_v8  ;;  %v9104_v8 = vld [vmem:[%s12958_s3 + $0x884] ss:$36 sps:$4 sm:$0xff]  }
 0x346   :  { %5757 = vmatprep.mubr.bf16.mxu1 %v9098_v53  ;;  %v9106_v53 = vld [vmem:[%s12958_s3 + $0x880] ss:$36 sps:$4 sm:$0xff]  }
 0x34d   :  { %5758 = vmatmul.mubr.bf16.gmra.mrb[112].mxu1 %v9100_v56  ;;  %v9107_v56 = vld [vmem:[%s12958_s3 + $0x8cc] ss:$36 sps:$4 sm:$0xff]  }
 0x34e   :  { %5765 = vmatprep.mubr.bf16.mxu1 %v9101_v37  ;;  %v9169_v37 = vld [vmem:[%s12958_s3 + $0x410] ss:$36 sps:$4 sm:$0xff]  }
 0x34f   :  { %8302 = vmatprep.mubr.bf16.mxu0 %v9169_v37  ;;  %v9178_v37 = vld [vmem:[%s12958_s3 + $0x4e8] ss:$36 sps:$4 sm:$0xff]  }
 0x350   :  { %8303 = vmatmul.mubr.bf16.gmra.mrb[44].mxu0 %v9170_v19  ;;  %v9117_v19 = vld [vmem:[%s12958_s3 + $0x60] ss:$36 sps:$4 sm:$0xff]  }
 0x355   :  { %5766 = vmatmul.mubr.bf16.gmra.mrb[116].mxu1 %v9103_v39  ;;  %v9112_v39 = vld [vmem:[%s12958_s3 + $0x1c] ss:$36 sps:$4 sm:$0xff]  }
 0x356   :  { %5773 = vmatprep.mubr.bf16.mxu1 %v9104_v8  ;;  %v9110_v8 = vld [vmem:[%s12958_s3 + $0x18] ss:$36 sps:$4 sm:$0xff]  }
 0x35d   :  { %5774 = vmatmul.mubr.bf16.gmra.mrb[120].mxu1 %v9106_v53  ;;  %v9115_v53 = vld [vmem:[%s12958_s3 + $0x64] ss:$36 sps:$4 sm:$0xff]  }
 0x35e   :  { %5781 = vmatprep.mubr.bf16.mxu1 %v9107_v56  ;;  %v9177_v56 = vld [vmem:[%s12958_s3 + $0x4a0] ss:$36 sps:$4 sm:$0xff]  }
 0x35f   :  { %8306 = vmatprep.mubr.bf16.mxu0 %v9177_v56  ;;  %v9186_v56 = vld [vmem:[%s12958_s3 + $0x578] ss:$36 sps:$4 sm:$0xff]  }
 0x360   :  { %8307 = vmatmul.mubr.bf16.gmra.mrb[48].mxu0 %v9178_v37  ;;  %v9125_v37 = vld [vmem:[%s12958_s3 + $0xf0] ss:$36 sps:$4 sm:$0xff]  }
 0x365   :  { %5782 = vmatmul.mubr.bf16.gmra.mrb[124].mxu1 %v9109_v3  ;;  %v9118_v3 = vld [vmem:[%s12958_s3 + $0xac] ss:$36 sps:$4 sm:$0xff]  }
 0x366   :  { %5822 = vmatprep.mubr.bf16.mxu1 %v9112_v39  ;;  %v9120_v39 = vld [vmem:[%s12958_s3 + $0xa8] ss:$36 sps:$4 sm:$0xff]  }
 0x36d   :  { %5823 = vmatmul.mubr.bf16.vlgmr.msra.gmra.mrb[0].mxu1 %v9110_v8  ;;  %v9123_v8 = vld [vmem:[%s12958_s3 + $0xf4] ss:$36 sps:$4 sm:$0xff]  }
 0x36e   :  { %5830 = vmatprep.mubr.bf16.mxu1 %v9115_v53  ;;  %v9185_v53 = vld [vmem:[%s12958_s3 + $0x530] ss:$36 sps:$4 sm:$0xff]  }
 0x36f   :  { %8310 = vmatprep.mubr.bf16.mxu0 %v9185_v53  ;;  %v9194_v53 = vld [vmem:[%s12958_s3 + $0x608] ss:$36 sps:$4 sm:$0xff]  }
 0x370   :  { %8311 = vmatmul.mubr.bf16.gmra.mrb[52].mxu0 %v9186_v56  ;;  %v9133_v56 = vld [vmem:[%s12958_s3 + $0x180] ss:$36 sps:$4 sm:$0xff]  }
 0x375   :  { %5831 = vmatmul.mubr.bf16.gmra.mrb[4].mxu1 %v9117_v19  ;;  %v9126_v19 = vld [vmem:[%s12958_s3 + $0x13c] ss:$36 sps:$4 sm:$0xff]  }
 0x376   :  { %5838 = vmatprep.mubr.bf16.mxu1 %v9118_v3  ;;  %v9128_v3 = vld [vmem:[%s12958_s3 + $0x138] ss:$36 sps:$4 sm:$0xff]  }
 0x37d   :  { %5839 = vmatmul.mubr.bf16.gmra.mrb[8].mxu1 %v9120_v39  ;;  %v9131_v39 = vld [vmem:[%s12958_s3 + $0x184] ss:$36 sps:$4 sm:$0xff]  }
 0x37e   :  { %5846 = vmatprep.mubr.bf16.mxu1 %v9123_v8  ;;  %v9193_v8 = vld [vmem:[%s12958_s3 + $0x5c0] ss:$36 sps:$4 sm:$0xff]  }
 0x37f   :  { %8314 = vmatprep.mubr.bf16.mxu0 %v9193_v8  ;;  %v9202_v8 = vld [vmem:[%s12958_s3 + $0x698] ss:$36 sps:$4 sm:$0xff]  }
 0x380   :  { %8315 = vmatmul.mubr.bf16.gmra.mrb[56].mxu0 %v9194_v53  ;;  %v9141_v53 = vld [vmem:[%s12958_s3 + $0x210] ss:$36 sps:$4 sm:$0xff]  }
 0x385   :  { %5847 = vmatmul.mubr.bf16.gmra.mrb[12].mxu1 %v9125_v37  ;;  %v9134_v37 = vld [vmem:[%s12958_s3 + $0x1cc] ss:$36 sps:$4 sm:$0xff]  }
 0x386   :  { %5854 = vmatprep.mubr.bf16.mxu1 %v9126_v19  ;;  %v9136_v19 = vld [vmem:[%s12958_s3 + $0x1c8] ss:$36 sps:$4 sm:$0xff]  }
 0x38d   :  { %5855 = vmatmul.mubr.bf16.gmra.mrb[16].mxu1 %v9128_v3  ;;  %v9139_v3 = vld [vmem:[%s12958_s3 + $0x214] ss:$36 sps:$4 sm:$0xff]  }
 0x38e   :  { %5862 = vmatprep.mubr.bf16.mxu1 %v9131_v39  ;;  %v9201_v39 = vld [vmem:[%s12958_s3 + $0x650] ss:$36 sps:$4 sm:$0xff]  }
 0x38f   :  { %8318 = vmatprep.mubr.bf16.mxu0 %v9201_v39  ;;  %v9147_v39 = vld [vmem:[%s12958_s3 + $0x2a4] ss:$36 sps:$4 sm:$0xff]  }
 0x390   :  { %8319 = vmatmul.mubr.bf16.gmra.mrb[60].mxu0 %v9202_v8  ;;  %v9149_v8 = vld [vmem:[%s12958_s3 + $0x2a0] ss:$36 sps:$4 sm:$0xff]  }
 0x395   :  { %5863 = vmatmul.mubr.bf16.gmra.mrb[20].mxu1 %v9133_v56  ;;  %v9144_v56 = vld [vmem:[%s12958_s3 + $0x25c] ss:$36 sps:$4 sm:$0xff]  }
 0x396   :  { %5870 = vmatprep.mubr.bf16.mxu1 %v9134_v37  ;;  %v9206_v37 = vld [vmem:[%s12958_s3 + $0x6e0] ss:$36 sps:$4 sm:$0xff]  }
 0x397   :  { %8322 = vmatprep.mubr.bf16.mxu0 %v9206_v37  ;;  %v9215_v37 = vld [vmem:[%s12958_s3 + $0x7b8] ss:$36 sps:$4 sm:$0xff]  }
 0x39d   :  { %5871 = vmatmul.mubr.bf16.gmra.mrb[24].mxu1 %v9136_v19  ;;  %v9207_v19 = vld [vmem:[%s12958_s3 + $0x728] ss:$36 sps:$4 sm:$0xff]  }
 0x39e   :  { %5878 = vmatprep.mubr.bf16.mxu1 %v9139_v3  ;;  %8323 = vmatmul.mubr.bf16.gmra.mrb[64].mxu0 %v9207_v19  ;;  %v9146_v3 = vld [vmem:[%s12958_s3 + $0x258] ss:$36 sps:$4 sm:$0xff]   ;;  %v9152_v19 = vld [vmem:[%s12958_s3 + $0x2e8] ss:$36 sps:$4 sm:$0xff]  }
 0x3a5   :  { %5879 = vmatmul.mubr.bf16.gmra.mrb[28].mxu1 %v9141_v53  ;;  %v9150_v53 = vld [vmem:[%s12958_s3 + $0x2ec] ss:$36 sps:$4 sm:$0xff]  }
 0x3a6   :  { %5886 = vmatprep.mubr.bf16.mxu1 %v9144_v56  ;;  %v9214_v56 = vld [vmem:[%s12958_s3 + $0x770] ss:$36 sps:$4 sm:$0xff]  }
 0x3a7   :  { %8326 = vmatprep.mubr.bf16.mxu0 %v9214_v56 }
 0x3a8   :  { %8327 = vmatmul.mubr.bf16.gmra.mrb[68].mxu0 %v9215_v37 }
 0x3ad   :  { %5887 = vmatmul.mubr.bf16.gmra.mrb[32].mxu1 %v9146_v3  ;;  %v9155_v3 = vld [vmem:[%s12958_s3 + $0x334] ss:$36 sps:$4 sm:$0xff]  }
 0x3ae   :  { %5894 = vmatprep.mubr.bf16.mxu1 %v9147_v39  ;;  %v9157_v39 = vld [vmem:[%s12958_s3 + $0x330] ss:$36 sps:$4 sm:$0xff]  }
 0x3b5   :  { %5895 = vmatmul.mubr.bf16.gmra.mrb[36].mxu1 %v9149_v8  ;;  %v9158_v8 = vld [vmem:[%s12958_s3 + $0x37c] ss:$36 sps:$4 sm:$0xff]  }
 0x3b6   :  { %5902 = vmatprep.mubr.bf16.mxu1 %v9150_v53  ;;  %v12162_v53 = vpop.f32.mrb[16].mxu0 }
 0x3b7   :  { %v12164_v56 = vpop.f32.mrb[17].mxu0 }
 0x3b8   :  { %v12166_v37 = vpop.f32.mrb[18].mxu0 }
 0x3b9   :  { %v12168_v4 = vpop.f32.mrb[19].mxu0 }
 0x3bd   :  { %5903 = vmatmul.mubr.bf16.gmra.mrb[40].mxu1 %v9152_v19  ;;  %v9160_v19 = vld [vmem:[%s12958_s3 + $0x378] ss:$36 sps:$4 sm:$0xff]  }
 0x3be   :  { %5910 = vmatprep.mubr.bf16.mxu1 %v9155_v3  ;;  %v9163_v3 = vld [vmem:[%s12958_s3 + $0x3c4] ss:$36 sps:$4 sm:$0xff]  }
 0x3c5   :  { %5911 = vmatmul.mubr.bf16.gmra.mrb[44].mxu1 %v9157_v39  ;;  %v9222_v39 = vld [vmem:[%s12958_s3 + $0x800] ss:$36 sps:$4 sm:$0xff]  }
 0x3c6   :  { %5918 = vmatprep.mubr.bf16.mxu1 %v9158_v8  ;;  %v9223_v8 = vld [vmem:[%s12958_s3 + $0x848] ss:$36 sps:$4 sm:$0xff]   ;;  %8330 = vmatprep.mubr.bf16.mxu0 %v9222_v39  ;;  %v9173_v39 = vld [vmem:[%s12958_s3 + $0x450] ss:$36 sps:$4 sm:$0xff]  }
 0x3c7   :  { %8331 = vmatmul.mubr.bf16.gmra.mrb[72].mxu0 %v9223_v8  ;;  %v9174_v8 = vld [vmem:[%s12958_s3 + $0x49c] ss:$36 sps:$4 sm:$0xff]  }
 0x3c9   :  { %v12188_v7 = vpop.f32.mrb[20].mxu0 }
 0x3cd   :  { %5919 = vmatmul.mubr.bf16.gmra.mrb[48].mxu1 %v9160_v19  ;;  %v12190_v19 = vpop.f32.mrb[21].mxu0 }
 0x3ce   :  { %5926 = vmatprep.mubr.bf16.mxu1 %v9163_v3  ;;  %v12192_v3 = vpop.f32.mrb[22].mxu0 }
 0x3cf   :  { %v12194_v47 = vpop.f32.mrb[23].mxu0 }
 0x3d5   :  { %5927 = vmatmul.mubr.bf16.gmra.mrb[52].mxu1 %v9165_v12  ;;  %v9230_v12 = vld [vmem:[%s12958_s3 + $0x890] ss:$36 sps:$4 sm:$0xff]  }
 0x3d6   :  { %5934 = vmatprep.mubr.bf16.mxu1 %v9166_v16  ;;  %v9231_v16 = vld [vmem:[%s12958_s3 + $0x8d8] ss:$36 sps:$4 sm:$0xff]   ;;  %8334 = vmatprep.mubr.bf16.mxu0 %v9230_v12  ;;  %v9181_v12 = vld [vmem:[%s12958_s3 + $0x4e0] ss:$36 sps:$4 sm:$0xff]  }
 0x3d7   :  { %8335 = vmatmul.mubr.bf16.gmra.mrb[76].mxu0 %v9231_v16 }
 0x3dc   :  { %v12214_v42 = vpop.f32.mrb[24].mxu0 }
 0x3dd   :  { %5935 = vmatmul.mubr.bf16.gmra.mrb[56].mxu1 %v9168_v13 }
 0x3de   :  { %5942 = vmatprep.mubr.bf16.mxu1 %v9171_v46  ;;  %v12216_v46 = vpop.f32.mrb[25].mxu0 }
 0x3df   :  { %v12218_v13 = vpop.f32.mrb[26].mxu0 }
 0x3e0   :  { %v12220_v0 = vpop.f32.mrb[27].mxu0 }
 0x3e5   :  { %5943 = vmatmul.mubr.bf16.gmra.mrb[60].mxu1 %v9173_v39  ;;  %v9182_v39 = vld [vmem:[%s12958_s3 + $0x52c] ss:$36 sps:$4 sm:$0xff]  }
 0x3e6   :  { %5950 = vmatprep.mubr.bf16.mxu1 %v9174_v8 }
 0x3ec   :  { %v12234_v16 = vpop.f32.mrb[28].mxu0 }
 0x3ed   :  { %5951 = vmatmul.mubr.bf16.gmra.mrb[64].mxu1 %v9176_v62  ;;  %v12236_v8 = vpop.f32.mrb[29].mxu0  ;;  %v9187_v62 = vld [vmem:[%s12958_s3 + $0x574] ss:$36 sps:$4 sm:$0xff]  }
 0x3ee   :  { %5958 = vmatprep.mubr.bf16.mxu1 %v9179_v60  ;;  %v12238_v50 = vpop.f32.mrb[30].mxu0  ;;  %v9184_v60 = vld [vmem:[%s12958_s3 + $0x528] ss:$36 sps:$4 sm:$0xff]  }
 0x3ef   :  { %v12240_v14 = vpop.f32.mrb[31].mxu0 }
 0x3f5   :  { %5959 = vmatmul.mubr.bf16.gmra.mrb[68].mxu1 %v9181_v12  ;;  %v12251_v12 = vpop.f32.mrb[32].mxu0 }
 0x3f6   :  { %5966 = vmatprep.mubr.bf16.mxu1 %v9182_v39  ;;  %v9190_v39 = vld [vmem:[%s12958_s3 + $0x5bc] ss:$36 sps:$4 sm:$0xff]   ;;  %v12256_v55 = vpop.f32.mrb[33].mxu0 }
 0x3f7   :  { %v12258_v33 = vpop.f32.mrb[34].mxu0 }
 0x3f8   :  { %v12260_v36 = vpop.f32.mrb[35].mxu0 }
 0x3fd   :  { %5967 = vmatmul.mubr.bf16.gmra.mrb[72].mxu1 %v9184_v60  ;;  %v9192_v60 = vld [vmem:[%s12958_s3 + $0x5b8] ss:$36 sps:$4 sm:$0xff]  }
 0x3fe   :  { %5974 = vmatprep.mubr.bf16.mxu1 %v9187_v62  ;;  %v9195_v62 = vld [vmem:[%s12958_s3 + $0x604] ss:$36 sps:$4 sm:$0xff]  }
 0x405   :  { %5975 = vmatmul.mubr.bf16.gmra.mrb[76].mxu1 %v9189_v23  ;;  %v9198_v23 = vld [vmem:[%s12958_s3 + $0x64c] ss:$36 sps:$4 sm:$0xff]  }
 0x406   :  { %5982 = vmatprep.mubr.bf16.mxu1 %v9190_v39  ;;  %v12274_v39 = vpop.f32.mrb[36].mxu0 }
 0x407   :  { %13121 = vst [vmem:[#allocation46_spill] sm:$0xff] %v12274_v39  ;;  %v12276_v11 = vpop.f32.mrb[37].mxu0  ;;  %v9218_v39 = vld [vmem:[%s12958_s3 + $0x768] ss:$36 sps:$4 sm:$0xff]  }
 0x408   :  { %13122 = vst [vmem:[#allocation47_spill] sm:$0xff] %v12276_v11  ;;  %v12278_v18 = vpop.f32.mrb[38].mxu0  ;;  %v9221_v11 = vld [vmem:[%s12958_s3 + $0x7b0] ss:$36 sps:$4 sm:$0xff]  }
 0x409   :  { %13123 = vst [vmem:[#allocation48_spill] sm:$0xff] %v12278_v18  ;;  %v12280_v28 = vpop.f32.mrb[39].mxu0 }
 0x40a   :  { %13124 = vst [vmem:[#allocation49_spill] sm:$0xff] %v12280_v28  ;;  %v4961_v28 = vadd.f32 %v11550_v25, %v3139_v30 }
 0x40d   :  { %5983 = vmatmul.mubr.bf16.gmra.mrb[80].mxu1 %v9192_v60  ;;  %v9200_v60 = vld [vmem:[%s12958_s3 + $0x648] ss:$36 sps:$4 sm:$0xff]  }
 0x40e   :  { %5990 = vmatprep.mubr.bf16.mxu1 %v9195_v62  ;;  %v9203_v62 = vld [vmem:[%s12958_s3 + $0x694] ss:$36 sps:$4 sm:$0xff]  }
 0x413   :  { %v12298_v59 = vpop.f32.mrb[40].mxu0 }
 0x414   :  { %13125 = vst [vmem:[#allocation50_spill] sm:$0xff] %v12298_v59  ;;  %v12300_v1 = vpop.f32.mrb[41].mxu0  ;;  %v9211_v59 = vld [vmem:[%s12958_s3 + $0x724] ss:$36 sps:$4 sm:$0xff]  }
 0x415   :  { %5991 = vmatmul.mubr.bf16.gmra.mrb[84].mxu1 %v9197_v15  ;;  %v3134_v15 = vpop.permute.xlu0 %3133  ;;  %13126 = vst [vmem:[#allocation51_spill] sm:$0xff] %v12300_v1  ;;  %v12302_v38 = vpop.f32.mrb[42].mxu0 }
 0x416   :  { %5998 = vmatprep.mubr.bf16.mxu1 %v9198_v23  ;;  %v9205_v23 = vld [vmem:[%s12958_s3 + $0x690] ss:$36 sps:$4 sm:$0xff]   ;;  %13127 = vst [vmem:[#allocation52_spill] sm:$0xff] %v12302_v38 }
 0x417   :  { %v9216_v38 = vld [vmem:[%s12958_s3 + $0x76c] ss:$36 sps:$4 sm:$0xff]  }
 0x41d   :  { %5999 = vmatmul.mubr.bf16.gmra.mrb[88].mxu1 %v9200_v60  ;;  %v12304_v60 = vpop.f32.mrb[43].mxu0 }
 0x41e   :  { %6006 = vmatprep.mubr.bf16.mxu1 %v9203_v62  ;;  %13128 = vst [vmem:[#allocation53_spill] sm:$0xff] %v12304_v60  ;;  %v12306_v62 = vpop.permute.xlu0 %3223 }
 0x422   :  { %v3144_v49 = vpop.permute.xlu0 %3143 }
 0x423   :  { %v12324_v1 = vpop.f32.mrb[44].mxu0 }
 0x424   :  { %13129 = vst [vmem:[#allocation54_spill] sm:$0xff] %v12324_v1  ;;  %v12328_v35 = vpop.f32.mrb[45].mxu0  ;;  %v9219_v1 = vld [vmem:[%s12958_s3 + $0x7b4] ss:$36 sps:$4 sm:$0xff]  }
 0x425   :  { %6007 = vmatmul.mubr.bf16.gmra.mrb[92].mxu1 %v9205_v23  ;;  %v3149_v23 = vpop.permute.xlu1 %3148  ;;  %13130 = vst [vmem:[#allocation55_spill] sm:$0xff] %v12328_v35 }
 0x426   :  { %6014 = vmatprep.mubr.bf16.mxu1 %v9208_v9  ;;  %v9213_v9 = vld [vmem:[%s12958_s3 + $0x720] ss:$36 sps:$4 sm:$0xff]   ;;  %v12322_v60 = vpop.permute.xlu0 %3233 }
 0x429   :  { %v12326_v34 = vpop.permute.xlu1 %3238 }
 0x42a   :  { %v3154_v18 = vpop.permute.xlu0 %3153 }
 0x42d   :  { %6015 = vmatmul.mubr.bf16.gmra.mrb[96].mxu1 %v9210_v31  ;;  %v12330_v31 = vpop.f32.mrb[46].mxu0  ;;  %v3159_v17 = vpop.permute.xlu1 %3158 }
 0x42e   :  { %6022 = vmatprep.mubr.bf16.mxu1 %v9211_v59  ;;  %13131 = vst [vmem:[#allocation56_spill] sm:$0xff] %v12330_v31  ;;  %v12332_v59 = vpop.f32.mrb[47].mxu0  ;;  %v12340_v21 = vpop.permute.xlu0 %3243 }
 0x42f   :  { %13132 = vst [vmem:[#allocation57_spill] sm:$0xff] %v12332_v59  ;;  %13133 = vst [vmem:[#allocation58_spill] sm:$0xff] %v12340_v21 }
 0x431   :  { %v12343_v31 = vpop.permute.xlu1 %3248 }
 0x432   :  { %13134 = vst [vmem:[#allocation59_spill] sm:$0xff] %v12343_v31 }
 0x435   :  { %6023 = vmatmul.mubr.bf16.gmra.mrb[100].mxu1 %v9213_v9  ;;  %v4958_v9 = vadd.f32 %v11542_v26, %v3134_v15  ;;  %v12353_v15 = vpop.f32.mrb[48].mxu0  ;;  %v12358_v30 = vpop.permute.xlu1 %3168 }
 0x436   :  { %6030 = vmatprep.mubr.bf16.mxu1 %v9216_v38  ;;  %13135 = vst [vmem:[#allocation60_spill] sm:$0xff] %v12353_v15  ;;  %v12355_v31 = vpop.f32.mrb[49].mxu0 }
 0x437   :  { %13136 = vst [vmem:[#allocation61_spill] sm:$0xff] %v12355_v31 }
 0x43d   :  { %6031 = vmatmul.mubr.bf16.gmra.mrb[104].mxu1 %v9218_v39 }
 0x43e   :  { %6038 = vmatprep.mubr.bf16.mxu1 %v9219_v1  ;;  %v9224_v1 = vld [vmem:[%s12958_s3 + $0x7fc] ss:$36 sps:$4 sm:$0xff]  }
 0x440   :  { %v5824_v38 = vpop.f32.mrb[0].mxu1 }
 0x441   :  { %v8363_v59 = vadd.f32 %v5824_v38, %v4958_v9  ;;  %v5826_v35 = vpop.f32.mrb[1].mxu1 }
 0x442   :  { %v5827_v48 = vpop.f32.mrb[2].mxu1  ;;  %v3164_v35 = vpop.permute.xlu0 %3163 }
 0x443   :  { %v8365_v39 = vadd.f32 %v5827_v48, %v4961_v28  ;;  %v6114_v21 = vadd.f32 %v8363_v59, %v12164_v56  ;;  %v5829_v26 = vpop.f32.mrb[3].mxu1  ;;  %v4966_v48 = vadd.f32 %v11558_v10, %v3144_v49  ;;  %v12361_v28 = vpop.f32.mrb[50].mxu0 }
 0x444   :  { %13137 = vst [vmem:[#allocation62_spill] sm:$0xff] %v12361_v28  ;;  %v12363_v59 = vpop.f32.mrb[51].mxu0 }
 0x445   :  { %v6432_v9 = vmul.f32 0.01, %v6114_v21  ;;  %v6117_v25 = vadd.f32 %v8365_v39, %v12168_v4  ;;  %6039 = vmatmul.mubr.bf16.gmra.mrb[108].mxu1 %v9221_v11  ;;  %vm6368_vm2 = vcmp.ge.f32.partialorder %v6114_v21, 0.0  ;;  %13138 = vst [vmem:[#allocation63_spill] sm:$0xff] %v12363_v59  ;;  %v4969_v11 = vadd.f32 %v11566_v45, %v3149_v23  ;;  %v9227_v39 = vld [vmem:[%s12958_s3 + $0x844] ss:$36 sps:$4 sm:$0xff]  }
 0x446   :  { %6046 = vmatprep.mubr.bf16.mxu1 %v9224_v1  ;;  %v9226_v1 = vld [vmem:[%s12958_s3 + $0x7f8] ss:$36 sps:$4 sm:$0xff]   ;;  %v9240_v45 = vld [vmem:[%s12964_s5 + $0x4] ss:$16 sps:$4 sm:$0xff]  }
 0x447   :  { %vm6369_vm3 = vcmp.ge.f32.partialorder %v6117_v25, 0.0  ;;  %v6433_v38 = vmul.f32 0.01, %v6117_v25  ;;  %v12365_v26 = vsel %vm6368_vm2, %v6114_v21, %v6432_v9  ;;  %v12378_v21 = vpop.permute.xlu0 %3253  ;;  %6912 = vmatprep.mubr.bf16.mxu0 %v9240_v45 }
 0x448   :  { %v5832_v56 = vpop.f32.mrb[4].mxu1 }
 0x449   :  { %v12367_v15 = vsel %vm6369_vm3, %v6117_v25, %v6433_v38  ;;  %v8367_v31 = vadd.f32 %v5832_v56, %v4966_v48  ;;  %v5834_v4 = vpop.f32.mrb[5].mxu1  ;;  %v12381_v48 = vpop.permute.xlu1 %3258 }
 0x44a   :  { %v5835_v49 = vpop.f32.mrb[6].mxu1  ;;  %v4974_v4 = vadd.f32 %v11574_v51, %v3154_v18  ;;  %v9232_v51 = vld [vmem:[%s12958_s3 + $0x88c] ss:$36 sps:$4 sm:$0xff]  }
 0x44b   :  { %v6122_v9 = vadd.f32 %v8367_v31, %v12162_v53  ;;  %v8369_v25 = vadd.f32 %v5835_v49, %v4969_v11  ;;  %v5837_v38 = vpop.f32.mrb[7].mxu1  ;;  %v3174_v31 = vpop.permute.xlu0 %3173  ;;  %v4977_v11 = vadd.f32 %v11582_v27, %v3159_v17 }
 0x44d   :  { %v6434_v23 = vmul.f32 0.01, %v6122_v9  ;;  %v6125_v56 = vadd.f32 %v8369_v25, %v12166_v37  ;;  %6047 = vmatmul.mubr.bf16.gmra.mrb[112].mxu1 %v9226_v1  ;;  %vm6370_vm4 = vcmp.ge.f32.partialorder %v6122_v9, 0.0  ;;  %v9229_v37 = vld [vmem:[%s12958_s3 + $0x840] ss:$36 sps:$4 sm:$0xff]   ;;  %v3179_v18 = vpop.permute.xlu1 %3178 }
 0x44e   :  { %6054 = vmatprep.mubr.bf16.mxu1 %v9227_v39  ;;  %v9235_v39 = vld [vmem:[%s12958_s3 + $0x8d4] ss:$36 sps:$4 sm:$0xff]  }
 0x44f   :  { %vm6371_vm0 = vcmp.ge.f32.partialorder %v6125_v56, 0.0  ;;  %v6435_v10 = vmul.f32 0.01, %v6125_v56  ;;  %v12389_v49 = vsel %vm6370_vm4, %v6122_v9, %v6434_v23  ;;  %v12402_v9 = vpop.f32.mrb[52].mxu0  ;;  %v12407_v23 = vpop.permute.xlu0 %3263 }
 0x450   :  { %v5840_v53 = vpop.f32.mrb[8].mxu1  ;;  %13139 = vst [vmem:[#allocation64_spill] sm:$0xff] %v12402_v9 }
 0x451   :  { %v12391_v38 = vsel %vm6371_vm0, %v6125_v56, %v6435_v10  ;;  %v8371_v28 = vadd.f32 %v5840_v53, %v4974_v4  ;;  %v5842_v59 = vpop.f32.mrb[9].mxu1  ;;  %v4982_v56 = vadd.f32 %v11590_v5, %v3164_v35  ;;  %v9234_v5 = vld [vmem:[%s12958_s3 + $0x888] ss:$36 sps:$4 sm:$0xff]  }
 0x452   :  { %v5843_v1 = vpop.f32.mrb[10].mxu1  ;;  %v12404_v59 = vpop.f32.mrb[53].mxu0 }
 0x453   :  { %v8373_v27 = vadd.f32 %v5843_v1, %v4977_v11  ;;  %v6130_v17 = vadd.f32 %v8371_v28, %v12190_v19  ;;  %v5845_v10 = vpop.f32.mrb[11].mxu1  ;;  %v12410_v53 = vpop.f32.mrb[54].mxu0  ;;  %v4985_v1 = vadd.f32 %v11598_v43, %v12358_v30 }
 0x454   :  { %13140 = vst [vmem:[#allocation65_spill] sm:$0xff] %v12410_v53  ;;  %v12412_v28 = vpop.f32.mrb[55].mxu0  ;;  %v12414_v11 = vpop.permute.xlu1 %3268  ;;  %v4993_v53 = vadd.f32 %v11611_v24, %v3179_v18 }
 0x455   :  { %v6436_v25 = vmul.f32 0.01, %v6130_v17  ;;  %v6133_v45 = vadd.f32 %v8373_v27, %v12194_v47  ;;  %6055 = vmatmul.mubr.bf16.gmra.mrb[116].mxu1 %v9229_v37  ;;  %vm6372_vm5 = vcmp.ge.f32.partialorder %v6130_v17, 0.0 }
 0x456   :  { %6062 = vmatprep.mubr.bf16.mxu1 %v9232_v51 }
 0x457   :  { %vm6373_vm6 = vcmp.ge.f32.partialorder %v6133_v45, 0.0  ;;  %v6437_v4 = vmul.f32 0.01, %v6133_v45  ;;  %v12418_v47 = vsel %vm6372_vm5, %v6130_v17, %v6436_v25 }
 0x458   :  { %v5848_v19 = vpop.f32.mrb[12].mxu1 }
 0x459   :  { %v12420_v37 = vsel %vm6373_vm6, %v6133_v45, %v6437_v4  ;;  %v8375_v51 = vadd.f32 %v5848_v19, %v4982_v56  ;;  %v5850_v27 = vpop.f32.mrb[13].mxu1  ;;  %v3184_v56 = vpop.permute.xlu0 %3183  ;;  %v4990_v19 = vadd.f32 %v11606_v40, %v3174_v31 }
 0x45a   :  { %v5851_v10 = vpop.f32.mrb[14].mxu1  ;;  %v3189_v4 = vpop.permute.xlu1 %3188 }
 0x45b   :  { %v6138_v43 = vadd.f32 %v8375_v51, %v12188_v7  ;;  %v8377_v30 = vadd.f32 %v5851_v10, %v4985_v1  ;;  %v5853_v17 = vpop.f32.mrb[15].mxu1 }
 0x45d   :  { %v6438_v25 = vmul.f32 0.01, %v6138_v43  ;;  %v6141_v45 = vadd.f32 %v8377_v30, %v12192_v3  ;;  %6063 = vmatmul.mubr.bf16.gmra.mrb[120].mxu1 %v9234_v5  ;;  %vm6374_vm7 = vcmp.ge.f32.partialorder %v6138_v43, 0.0  ;;  %v9237_v3 = vld [vmem:[%s12958_s3 + $0x8d0] ss:$36 sps:$4 sm:$0xff]   ;;  %v12444_v30 = vpop.f32.mrb[56].mxu0  ;;  %v12446_v24 = vpop.permute.xlu0 %3273 }
 0x45e   :  { %6070 = vmatprep.mubr.bf16.mxu1 %v9235_v39  ;;  %13141 = vst [vmem:[#allocation66_spill] sm:$0xff] %v12444_v30  ;;  %v12448_v18 = vpop.f32.mrb[57].mxu0 }
 0x45f   :  { %vm6375_vm8 = vcmp.ge.f32.partialorder %v6141_v45, 0.0  ;;  %v6439_v27 = vmul.f32 0.01, %v6141_v45  ;;  %v12434_v9 = vsel %vm6374_vm7, %v6138_v43, %v6438_v25  ;;  %v4998_v25 = vadd.f32 %v11619_v41, %v3184_v56 }
 0x460   :  { %v5856_v35 = vpop.f32.mrb[16].mxu1 }
 0x461   :  { %v12436_v7 = vsel %vm6375_vm8, %v6141_v45, %v6439_v27  ;;  %v8379_v1 = vadd.f32 %v5856_v35, %v4990_v19  ;;  %v5858_v51 = vpop.f32.mrb[17].mxu1  ;;  %v12450_v35 = vpop.permute.xlu1 %3278  ;;  %v5001_v27 = vadd.f32 %v11621_v63, %v3189_v4 }
 0x462   :  { %v5859_v5 = vpop.f32.mrb[18].mxu1  ;;  %v12454_v45 = vpop.f32.mrb[58].mxu0 }
 0x463   :  { %v8381_v40 = vadd.f32 %v5859_v5, %v4993_v53  ;;  %v6146_v31 = vadd.f32 %v8379_v1, %v12216_v46  ;;  %v5861_v10 = vpop.f32.mrb[19].mxu1  ;;  %13142 = vst [vmem:[#allocation67_spill] sm:$0xff] %v12454_v45  ;;  %v12456_v19 = vpop.f32.mrb[59].mxu0 }
 0x464   :  { %13143 = vst [vmem:[#allocation68_spill] sm:$0xff] %v12456_v19 }
 0x465   :  { %v6440_v43 = vmul.f32 0.01, %v6146_v31  ;;  %v6149_v17 = vadd.f32 %v8381_v40, %v12220_v0  ;;  %6071 = vmatmul.mubr.bf16.gmra.mrb[124].mxu1 %v9237_v3  ;;  %vm6376_vm9 = vcmp.ge.f32.partialorder %v6146_v31, 0.0  ;;  %v3194_v0 = vpop.permute.xlu0 %3193  ;;  %v3199_v56 = vpop.permute.xlu1 %3198 }
 0x466   :  { %v5006_v63 = vadd.f32 %v11629_v20, %v3194_v0 }
 0x467   :  { %vm6377_vm10 = vcmp.ge.f32.partialorder %v6149_v17, 0.0  ;;  %v6441_v53 = vmul.f32 0.01, %v6149_v17  ;;  %v12459_v1 = vsel %vm6376_vm9, %v6146_v31, %v6440_v43 }
 0x468   :  { %v5864_v46 = vpop.f32.mrb[20].mxu1 }
 0x469   :  { %v12461_v51 = vsel %vm6377_vm10, %v6149_v17, %v6441_v53  ;;  %v8383_v5 = vadd.f32 %v5864_v46, %v4998_v25  ;;  %v5866_v10 = vpop.f32.mrb[21].mxu1  ;;  %v12468_v31 = vpop.permute.xlu0 %3283  ;;  %v5009_v25 = vadd.f32 %v11631_v61, %v3199_v56 }
 0x46a   :  { %v5867_v41 = vpop.f32.mrb[22].mxu1  ;;  %v12470_v17 = vpop.permute.xlu1 %3288 }
 0x46b   :  { %v6154_v40 = vadd.f32 %v8383_v5, %v12214_v42  ;;  %v8385_v39 = vadd.f32 %v5867_v41, %v5001_v27  ;;  %v5869_v45 = vpop.f32.mrb[23].mxu1  ;;  %v12480_v10 = vpop.f32.mrb[60].mxu0 }
 0x46c   :  { %v12482_v0 = vpop.f32.mrb[61].mxu0 }
 0x46d   :  { %v6442_v30 = vmul.f32 0.01, %v6154_v40  ;;  %v6157_v19 = vadd.f32 %v8385_v39, %v12218_v13  ;;  %vm6378_vm11 = vcmp.ge.f32.partialorder %v6154_v40, 0.0 }
 0x46f   :  { %vm6379_vm12 = vcmp.ge.f32.partialorder %v6157_v19, 0.0  ;;  %v6443_v4 = vmul.f32 0.01, %v6157_v19  ;;  %v12473_v53 = vsel %vm6378_vm11, %v6154_v40, %v6442_v30  ;;  %v3204_v30 = vpop.permute.xlu0 %3203 }
 0x470   :  { %v5872_v43 = vpop.f32.mrb[24].mxu1  ;;  %v5014_v56 = vadd.f32 %v11639_v6, %v3204_v30 }
 0x471   :  { %v12475_v42 = vsel %vm6379_vm12, %v6157_v19, %v6443_v4  ;;  %v8387_v45 = vadd.f32 %v5872_v43, %v5006_v63  ;;  %v5874_v46 = vpop.f32.mrb[25].mxu1  ;;  %v3209_v19 = vpop.permute.xlu1 %3208 }
 0x472   :  { %v5875_v27 = vpop.f32.mrb[26].mxu1  ;;  %v12486_v63 = vpop.f32.mrb[62].mxu0 }
 0x473   :  { %v8389_v20 = vadd.f32 %v5875_v27, %v5009_v25  ;;  %v6162_v39 = vadd.f32 %v8387_v45, %v12236_v8  ;;  %v5877_v5 = vpop.f32.mrb[27].mxu1  ;;  %v12488_v43 = vpop.f32.mrb[63].mxu0  ;;  %v5017_v8 = vadd.f32 %v11641_v29, %v3209_v19  ;;  %v5022_v29 = vadd.f32 %v11649_v54, %v12288_v22 }
 0x475   :  { %v6444_v41 = vmul.f32 0.01, %v6162_v39  ;;  %v6165_v61 = vadd.f32 %v8389_v20, %v12240_v14  ;;  %vm6380_vm13 = vcmp.ge.f32.partialorder %v6162_v39, 0.0 }
 0x477   :  { %vm6381_vm14 = vcmp.ge.f32.partialorder %v6165_v61, 0.0  ;;  %v6445_v40 = vmul.f32 0.01, %v6165_v61  ;;  %v12491_v25 = vsel %vm6380_vm13, %v6162_v39, %v6444_v41 }
 0x478   :  { %v5880_v4 = vpop.f32.mrb[28].mxu1 }
 0x479   :  { %v12493_v45 = vsel %vm6381_vm14, %v6165_v61, %v6445_v40  ;;  %v8391_v46 = vadd.f32 %v5880_v4, %v5014_v56  ;;  %v5882_v14 = vpop.f32.mrb[29].mxu1  ;;  %v5025_v61 = vadd.f32 %v11651_v32, %v12290_v2  ;;  %v12507_v4 = vpop.f32.mrb[64].mxu0 }
 0x47a   :  { %v6598_v27 = vpack.c.bf16 %v12493_v45, %v12491_v25  ;;  %v5883_v20 = vpop.f32.mrb[30].mxu1 }
 0x47b   :  { %v6170_v6 = vadd.f32 %v8391_v46, %v12234_v16  ;;  %v8393_v5 = vadd.f32 %v5883_v20, %v5017_v8  ;;  %v5885_v30 = vpop.f32.mrb[31].mxu1  ;;  %v12511_v46 = vpop.f32.mrb[65].mxu0 }
 0x47c   :  { %v12515_v2 = vpop.f32.mrb[66].mxu0  ;;  %v5033_v30 = vadd.f32 %v11661_v58, %v12308_v52  ;;  %v5038_v58 = vadd.f32 %v11669_v57, %v12322_v60 }
 0x47d   :  { %v6446_v13 = vmul.f32 0.01, %v6170_v6  ;;  %v6173_v3 = vadd.f32 %v8393_v5, %v12238_v50  ;;  %vm6382_vm15 = vcmp.ge.f32.partialorder %v6170_v6, 0.0 }
 0x47f   :  { %vm6383_vm1 = vcmp.ge.f32.partialorder %v6173_v3, 0.0  ;;  %v6447_v39 = vmul.f32 0.01, %v6173_v3  ;;  %v12503_v19 = vsel %vm6382_vm15, %v6170_v6, %v6446_v13  ;;  %v5030_v13 = vadd.f32 %v11659_v44, %v12306_v62 }
 0x480   :  { %v5888_v41 = vpop.f32.mrb[32].mxu1  ;;  %v13144_v62 = vpack.c.bf16 %v12367_v15, %v12365_v26 }
 0x481   :  { %v12505_v56 = vsel %vm6383_vm1, %v6173_v3, %v6447_v39  ;;  %v8395_v16 = vadd.f32 %v5888_v41, %v5022_v29  ;;  %v5890_v40 = vpop.f32.mrb[33].mxu1  ;;  %v12517_v3 = vpop.f32.mrb[67].mxu0 }
 0x482   :  { %v5891_v8 = vpop.f32.mrb[34].mxu1  ;;  %v6599_v50 = vpack.c.bf16 %v12505_v56, %v12503_v19 }
 0x483   :  { %v6178_v54 = vadd.f32 %v8395_v16, %v12256_v55  ;;  %v8397_v22 = vadd.f32 %v5891_v8, %v5025_v61  ;;  %v5893_v14 = vpop.f32.mrb[35].mxu1 }
 0x485   :  { %v6448_v20 = vmul.f32 0.01, %v6178_v54  ;;  %v6181_v32 = vadd.f32 %v8397_v22, %v12260_v36  ;;  %vm6384_vm2 = vcmp.ge.f32.partialorder %v6178_v54, 0.0 }
 0x487   :  { %vm6385_vm3 = vcmp.ge.f32.partialorder %v6181_v32, 0.0  ;;  %v6449_v6 = vmul.f32 0.01, %v6181_v32  ;;  %v6512_v39 = vsel %vm6384_vm2, %v6178_v54, %v6448_v20  ;;  %v12530_v54 = vpop.f32.mrb[68].mxu0  ;;  %v13145_v20 = vld [vmem:[#allocation10_spill] sm:$0xff] }
 0x488   :  { %v5896_v5 = vpop.f32.mrb[36].mxu1 }
 0x489   :  { %v8399_v55 = vadd.f32 %v5896_v5, %v5030_v13  ;;  %v5898_v29 = vpop.f32.mrb[37].mxu1  ;;  %v6513_v41 = vsel %vm6385_vm3, %v6181_v32, %v6449_v6  ;;  %v5041_v32 = vadd.f32 %v13145_v20, %v12326_v34 }
 0x48a   :  { %v5899_v61 = vpop.f32.mrb[38].mxu1  ;;  %v6600_v36 = vpack.c.bf16 %v6513_v41, %v6512_v39  ;;  %v13147_v39 = vld [vmem:[#allocation49_spill] sm:$0xff] }
 0x48b   :  { %v6186_v16 = vadd.f32 %v8399_v55, %v12251_v12  ;;  %v8401_v40 = vadd.f32 %v5899_v61, %v5033_v30  ;;  %v5901_v8 = vpop.f32.mrb[39].mxu1  ;;  %v12532_v12 = vpop.f32.mrb[69].mxu0  ;;  %v13146_v55 = vld [vmem:[#allocation47_spill] sm:$0xff]  ;;  %v13148_v61 = vpack.c.bf16 %v12391_v38, %v12389_v49 }
 0x48c   :  { %7972 = vmatprep.subr.bf16.mxu0 %v6600_v36  ;;  %v12541_v36 = vpop.f32.mrb[70].mxu0 }
 0x48d   :  { %v6450_v22 = vmul.f32 0.01, %v6186_v16  ;;  %v6189_v44 = vadd.f32 %v8401_v40, %v12258_v33  ;;  %7973 = vmatpush3.bf16.msra.mxu0 %v13144_v62  ;;  %vm6386_vm4 = vcmp.ge.f32.partialorder %v6186_v16, 0.0  ;;  %v12543_v34 = vpop.f32.mrb[71].mxu0  ;;  %v13150_v40 = vld [vmem:[#allocation8_spill] sm:$0xff]  ;;  %v12547_v62 = vpop.permute.xlu0 %3373 }
 0x48f   :  { %vm6387_vm0 = vcmp.ge.f32.partialorder %v6189_v44, 0.0  ;;  %v6451_v52 = vmul.f32 0.01, %v6189_v44  ;;  %v6514_v6 = vsel %vm6386_vm4, %v6186_v16, %v6450_v22  ;;  %v13149_v16 = vld [vmem:[#allocation58_spill] sm:$0xff] }
 0x490   :  { %v5904_v14 = vpop.f32.mrb[40].mxu1  ;;  %v5046_v8 = vadd.f32 %v13150_v40, %v13149_v16 }
 0x491   :  { %v8403_v13 = vadd.f32 %v5904_v14, %v5038_v58  ;;  %v5906_v33 = vpop.f32.mrb[41].mxu1  ;;  %v6515_v5 = vsel %vm6387_vm0, %v6189_v44, %v6451_v52  ;;  %v13151_v58 = vld [vmem:[#allocation59_spill] sm:$0xff]  ;;  %v13152_v52 = vld [vmem:[#allocation9_spill] sm:$0xff]  ;;  %v12558_v16 = vpop.permute.xlu0 %3293 }
 0x492   :  { %v5907_v15 = vpop.f32.mrb[42].mxu1  ;;  %v6601_v26 = vpack.c.bf16 %v6515_v5, %v6514_v6  ;;  %v5049_v14 = vadd.f32 %v13152_v52, %v13151_v58  ;;  %v12551_v6 = vpop.permute.xlu1 %3378  ;;  %v13153_v5 = vld [vmem:[#allocation46_spill] sm:$0xff] }
 0x493   :  { %v8405_v30 = vadd.f32 %v5907_v15, %v5041_v32  ;;  %v6194_v29 = vadd.f32 %v8403_v13, %v13146_v55  ;;  %v5909_v57 = vpop.f32.mrb[43].mxu1 }
 0x494   :  { %7974 = vmatprep.subr.bf16.mxu0 %v6601_v26  ;;  %v13154_v57 = vld [vmem:[#allocation48_spill] sm:$0xff] }
 0x495   :  { %v6452_v60 = vmul.f32 0.01, %v6194_v29  ;;  %v6197_v41 = vadd.f32 %v8405_v30, %v13147_v39  ;;  %7975 = vmatpush3.bf16.msra.mxu0 %v13148_v61  ;;  %vm6388_vm5 = vcmp.ge.f32.partialorder %v6194_v29, 0.0  ;;  %v13155_v61 = vpack.c.bf16 %v12420_v37, %v12418_v47 }
 0x497   :  { %vm6389_vm6 = vcmp.ge.f32.partialorder %v6197_v41, 0.0  ;;  %v6453_v22 = vmul.f32 0.01, %v6197_v41  ;;  %v6516_v49 = vsel %vm6388_vm5, %v6194_v29, %v6452_v60  ;;  %v13156_v29 = vld [vmem:[#allocation7_spill] sm:$0xff] }
 0x498   :  { %v5912_v44 = vpop.f32.mrb[44].mxu1  ;;  %v5054_v60 = vadd.f32 %v13156_v29, %v12378_v21  ;;  %v12567_v21 = vpop.permute.xlu0 %3383 }
 0x499   :  { %v8407_v20 = vadd.f32 %v5912_v44, %v5046_v8  ;;  %v5914_v32 = vpop.f32.mrb[45].mxu1  ;;  %v6517_v38 = vsel %vm6389_vm6, %v6197_v41, %v6453_v22  ;;  %v12562_v8 = vpop.permute.xlu1 %3298  ;;  %v13157_v22 = vld [vmem:[#allocation14_spill] sm:$0xff] }
 0x49a   :  { %v5915_v13 = vpop.f32.mrb[46].mxu1  ;;  %v6602_v33 = vpack.c.bf16 %v6517_v38, %v6516_v49  ;;  %v5057_v44 = vadd.f32 %v13157_v22, %v12381_v48  ;;  %v13158_v49 = vld [vmem:[#allocation51_spill] sm:$0xff] }
 0x49b   :  { %v6202_v15 = vadd.f32 %v8407_v20, %v13153_v5  ;;  %v8409_v26 = vadd.f32 %v5915_v13, %v5049_v14  ;;  %v5917_v30 = vpop.f32.mrb[47].mxu1  ;;  %v13159_v5 = vld [vmem:[#allocation53_spill] sm:$0xff] }
 0x49c   :  { %7976 = vmatprep.subr.bf16.mxu0 %v6602_v33  ;;  %v13160_v30 = vpack.c.bf16 %v12436_v7, %v12434_v9 }
 0x49d   :  { %v6454_v55 = vmul.f32 0.01, %v6202_v15  ;;  %v6205_v39 = vadd.f32 %v8409_v26, %v13154_v57  ;;  %7977 = vmatpush3.bf16.msra.mxu0 %v13155_v61  ;;  %vm6390_vm7 = vcmp.ge.f32.partialorder %v6202_v15, 0.0  ;;  %v12573_v48 = vpop.permute.xlu1 %3388 }
 0x49f   :  { %vm6391_vm8 = vcmp.ge.f32.partialorder %v6205_v39, 0.0  ;;  %v6455_v41 = vmul.f32 0.01, %v6205_v39  ;;  %v6518_v14 = vsel %vm6390_vm7, %v6202_v15, %v6454_v55  ;;  %v13161_v15 = vld [vmem:[#allocation12_spill] sm:$0xff] }
 0x4a0   :  { %v5920_v40 = vpop.f32.mrb[48].mxu1  ;;  %v5062_v55 = vadd.f32 %v13161_v15, %v12407_v23  ;;  %v12587_v23 = vpop.permute.xlu0 %3303 }
 0x4a1   :  { %v8411_v58 = vadd.f32 %v5920_v40, %v5054_v60  ;;  %v5922_v52 = vpop.f32.mrb[49].mxu1  ;;  %v6519_v20 = vsel %vm6391_vm8, %v6205_v39, %v6455_v41  ;;  %v12577_v39 = vpop.f32.mrb[72].mxu0  ;;  %v13162_v60 = vld [vmem:[#allocation13_spill] sm:$0xff] }
 0x4a2   :  { %v5923_v47 = vpop.f32.mrb[50].mxu1  ;;  %v6603_v37 = vpack.c.bf16 %v6519_v20, %v6518_v14  ;;  %v12579_v29 = vpop.f32.mrb[73].mxu0  ;;  %v5065_v41 = vadd.f32 %v13162_v60, %v12414_v11  ;;  %v13163_v20 = vld [vmem:[#allocation50_spill] sm:$0xff] }
 0x4a3   :  { %v8413_v32 = vadd.f32 %v5923_v47, %v5057_v44  ;;  %v6210_v38 = vadd.f32 %v8411_v58, %v13158_v49  ;;  %v5925_v13 = vpop.f32.mrb[51].mxu1  ;;  %v12583_v44 = vpop.f32.mrb[74].mxu0 }
 0x4a4   :  { %7978 = vmatprep.subr.bf16.mxu0 %v6603_v37  ;;  %v12585_v14 = vpop.f32.mrb[75].mxu0  ;;  %v13164_v13 = vld [vmem:[#allocation52_spill] sm:$0xff] }
 0x4a5   :  { %v6456_v33 = vmul.f32 0.01, %v6210_v38  ;;  %v6213_v26 = vadd.f32 %v8413_v32, %v13159_v5  ;;  %7979 = vmatpush3.bf16.msra.mxu0 %v13160_v30  ;;  %vm6392_vm9 = vcmp.ge.f32.partialorder %v6210_v38, 0.0  ;;  %v12596_v30 = vpop.permute.xlu1 %3308 }
 0x4a7   :  { %vm6393_vm10 = vcmp.ge.f32.partialorder %v6213_v26, 0.0  ;;  %v6457_v57 = vmul.f32 0.01, %v6213_v26  ;;  %v6520_v9 = vsel %vm6392_vm9, %v6210_v38, %v6456_v33  ;;  %v13165_v38 = vpack.c.bf16 %v12461_v51, %v12459_v1  ;;  %v13166_v33 = vld [vmem:[#allocation11_spill] sm:$0xff] }
 0x4a8   :  { %v5928_v61 = vpop.f32.mrb[52].mxu1  ;;  %v5070_v5 = vadd.f32 %v13166_v33, %v12446_v24 }
 0x4a9   :  { %v8415_v40 = vadd.f32 %v5928_v61, %v5062_v55  ;;  %v5930_v22 = vpop.f32.mrb[53].mxu1  ;;  %v6521_v7 = vsel %vm6393_vm10, %v6213_v26, %v6457_v57  ;;  %v12598_v55 = vpop.permute.xlu0 %3393  ;;  %v13167_v57 = vld [vmem:[#allocation18_spill] sm:$0xff] }
 0x4aa   :  { %v5931_v58 = vpop.f32.mrb[54].mxu1  ;;  %v6604_v52 = vpack.c.bf16 %v6521_v7, %v6520_v9  ;;  %v5073_v61 = vadd.f32 %v13167_v57, %v12450_v35  ;;  %v13168_v7 = vld [vmem:[#allocation55_spill] sm:$0xff] }
 0x4ab   :  { %v6218_v47 = vadd.f32 %v8415_v40, %v13163_v20  ;;  %v8417_v37 = vadd.f32 %v5931_v58, %v5065_v41  ;;  %v5933_v32 = vpop.f32.mrb[55].mxu1  ;;  %v13169_v20 = vld [vmem:[#allocation57_spill] sm:$0xff] }
 0x4ac   :  { %7980 = vmatprep.subr.bf16.mxu0 %v6604_v52  ;;  %v13170_v32 = vpack.c.bf16 %v12475_v42, %v12473_v53 }
 0x4ad   :  { %v6458_v49 = vmul.f32 0.01, %v6218_v47  ;;  %v6221_v11 = vadd.f32 %v8417_v37, %v13164_v13  ;;  %7981 = vmatpush3.bf16.msra.mxu0 %v13165_v38  ;;  %vm6394_vm11 = vcmp.ge.f32.partialorder %v6218_v47, 0.0  ;;  %v12607_v13 = vpop.permute.xlu1 %3398  ;;  %v12609_v35 = vpop.permute.xlu0 %3313 }
 0x4ae   :  { %v12613_v38 = vpop.f32.mrb[76].mxu0 }
 0x4af   :  { %vm6395_vm12 = vcmp.ge.f32.partialorder %v6221_v11, 0.0  ;;  %v6459_v26 = vmul.f32 0.01, %v6221_v11  ;;  %v6522_v40 = vsel %vm6394_vm11, %v6218_v47, %v6458_v49  ;;  %v13171_v47 = vld [vmem:[#allocation16_spill] sm:$0xff]  ;;  %13172 = vst [vmem:[#allocation10_spill] sm:$0xff] %v12613_v38 }
 0x4b0   :  { %v5936_v15 = vpop.f32.mrb[56].mxu1  ;;  %v5078_v49 = vadd.f32 %v13171_v47, %v12468_v31  ;;  %v13175_v31 = vld [vmem:[#allocation54_spill] sm:$0xff] }
 0x4b1   :  { %v8419_v60 = vadd.f32 %v5936_v15, %v5070_v5  ;;  %v5938_v41 = vpop.f32.mrb[57].mxu1  ;;  %v6523_v22 = vsel %vm6395_vm12, %v6221_v11, %v6459_v26  ;;  %v12615_v5 = vpop.f32.mrb[77].mxu0  ;;  %v13173_v26 = vld [vmem:[#allocation17_spill] sm:$0xff] }
 0x4b2   :  { %v5939_v1 = vpop.f32.mrb[58].mxu1  ;;  %v6605_v51 = vpack.c.bf16 %v6523_v22, %v6522_v40  ;;  %v5081_v15 = vadd.f32 %v13173_v26, %v12470_v17  ;;  %v13177_v17 = vld [vmem:[#allocation15_spill] sm:$0xff] }
 0x4b3   :  { %v8421_v9 = vadd.f32 %v5939_v1, %v5073_v61  ;;  %v6226_v58 = vadd.f32 %v8419_v60, %v13168_v7  ;;  %v5941_v24 = vpop.f32.mrb[59].mxu1  ;;  %v12619_v60 = vpop.f32.mrb[78].mxu0 }
 0x4b4   :  { %7982 = vmatprep.subr.bf16.mxu0 %v6605_v51  ;;  %13174 = vst [vmem:[#allocation47_spill] sm:$0xff] %v12619_v60  ;;  %v12621_v22 = vpop.f32.mrb[79].mxu0  ;;  %v3319_v7 = vpop.permute.xlu1 %3318 }
 0x4b5   :  { %v6460_v52 = vmul.f32 0.01, %v6226_v58  ;;  %v6229_v37 = vadd.f32 %v8421_v9, %v13169_v20  ;;  %7983 = vmatpush3.bf16.msra.mxu0 %v13170_v32  ;;  %vm6396_vm13 = vcmp.ge.f32.partialorder %v6226_v58, 0.0  ;;  %v13176_v20 = vld [vmem:[#allocation56_spill] sm:$0xff] }
 0x4b7   :  { %vm6397_vm14 = vcmp.ge.f32.partialorder %v6229_v37, 0.0  ;;  %v6461_v11 = vmul.f32 0.01, %v6229_v37  ;;  %v6524_v57 = vsel %vm6396_vm13, %v6226_v58, %v6460_v52  ;;  %v5086_v58 = vadd.f32 %v13177_v17, %v12558_v16 }
 0x4b8   :  { %v5944_v33 = vpop.f32.mrb[60].mxu1 }
 0x4b9   :  { %v8423_v53 = vadd.f32 %v5944_v33, %v5078_v49  ;;  %v5946_v42 = vpop.f32.mrb[61].mxu1  ;;  %v6525_v61 = vsel %vm6397_vm14, %v6229_v37, %v6461_v11  ;;  %v12630_v37 = vpop.permute.xlu0 %3403  ;;  %v13178_v49 = vld [vmem:[#allocation22_spill] sm:$0xff] }
 0x4ba   :  { %v5947_v41 = vpop.f32.mrb[62].mxu1  ;;  %v6606_v40 = vpack.c.bf16 %v6525_v61, %v6524_v57  ;;  %v5089_v11 = vadd.f32 %v13178_v49, %v12562_v8  ;;  %v12634_v42 = vpop.permute.xlu1 %3408  ;;  %v13179_v57 = vld [vmem:[#allocation61_spill] sm:$0xff] }
 0x4bb   :  { %v6234_v1 = vadd.f32 %v8423_v53, %v13175_v31  ;;  %v8425_v51 = vadd.f32 %v5947_v41, %v5081_v15  ;;  %v5949_v9 = vpop.f32.mrb[63].mxu1  ;;  %v9238_v41 = vld [vmem:[%s12964_s5] ss:$16 sps:$4 sm:$0xff]  }
 0x4bc   :  { %7984 = vmatprep.subr.bf16.mxu0 %v6606_v40  ;;  %v13180_v31 = vld [vmem:[#allocation63_spill] sm:$0xff]  ;;  %v13181_v9 = vld [vmem:[#allocation20_spill] sm:$0xff] }
 0x4bd   :  { %v6462_v24 = vmul.f32 0.01, %v6234_v1  ;;  %v6237_v32 = vadd.f32 %v8425_v51, %v13176_v20  ;;  %7985 = vmatpush3.bf16.msra.mxu0 %v6598_v27  ;;  %vm6398_vm15 = vcmp.ge.f32.partialorder %v6234_v1, 0.0  ;;  %v3324_v51 = vpop.permute.xlu0 %3323 }
 0x4bf   :  { %vm6399_vm1 = vcmp.ge.f32.partialorder %v6237_v32, 0.0  ;;  %v6463_v52 = vmul.f32 0.01, %v6237_v32  ;;  %v6526_v15 = vsel %vm6398_vm15, %v6234_v1, %v6462_v24  ;;  %v9243_v1 = vld [vmem:[%s12964_s5 + $0x24] ss:$16 sps:$4 sm:$0xff]   ;;  %v5094_v24 = vadd.f32 %v13181_v9, %v12587_v23  ;;  %v13183_v23 = vld [vmem:[#allocation60_spill] sm:$0xff] }
 0x4c0   :  { %v5952_v47 = vpop.f32.mrb[64].mxu1 }
 0x4c1   :  { %v8427_v33 = vadd.f32 %v5952_v47, %v5086_v58  ;;  %v5954_v26 = vpop.f32.mrb[65].mxu1  ;;  %v6527_v53 = vsel %vm6399_vm1, %v6237_v32, %v6463_v52  ;;  %v3329_v32 = vpop.permute.xlu1 %3328  ;;  %v13182_v58 = vld [vmem:[#allocation21_spill] sm:$0xff] }
 0x4c2   :  { %v5955_v25 = vpop.f32.mrb[66].mxu1  ;;  %v6607_v45 = vpack.c.bf16 %v6527_v53, %v6526_v15  ;;  %v5097_v52 = vadd.f32 %v13182_v58, %v12596_v30  ;;  %v12658_v53 = vpop.permute.xlu0 %3413  ;;  %v9241_v30 = vld [vmem:[%s12964_s5 + $0x20] ss:$16 sps:$4 sm:$0xff]  }
 0x4c3   :  { %v8429_v27 = vadd.f32 %v5955_v25, %v5089_v11  ;;  %v6242_v61 = vadd.f32 %v8427_v33, %v13179_v57  ;;  %v5957_v16 = vpop.f32.mrb[67].mxu1  ;;  %v9246_v57 = vld [vmem:[%s12964_s5 + $0x44] ss:$16 sps:$4 sm:$0xff]  }
 0x4c4   :  { %7986 = vmatprep.subr.bf16.mxu0 %v6607_v45  ;;  %v13184_v45 = vld [vmem:[#allocation62_spill] sm:$0xff]  ;;  %v13185_v16 = vld [vmem:[#allocation19_spill] sm:$0xff] }
 0x4c5   :  { %v6464_v40 = vmul.f32 0.01, %v6242_v61  ;;  %v6245_v8 = vadd.f32 %v8429_v27, %v13180_v31  ;;  %7987 = vmatpush3.bf16.msra.mxu0 %v6599_v50  ;;  %vm6400_vm2 = vcmp.ge.f32.partialorder %v6242_v61, 0.0 }
 0x4c6   :  { %v3334_v58 = vpop.permute.xlu0 %3333 }
 0x4c7   :  { %vm6401_vm3 = vcmp.ge.f32.partialorder %v6245_v8, 0.0  ;;  %v6465_v20 = vmul.f32 0.01, %v6245_v8  ;;  %v12651_v47 = vsel %vm6400_vm2, %v6242_v61, %v6464_v40  ;;  %v12667_v61 = vpop.permute.xlu1 %3418 }
 0x4c8   :  { %v5960_v17 = vpop.f32.mrb[68].mxu1  ;;  %6913 = vmatmul.mubr.bf16.vlgmr.msra.gmra.mrb[80].mxu0 %v9238_v41  ;;  %v5102_v41 = vadd.f32 %v13185_v16, %v12609_v35 }
 0x4c9   :  { %v12653_v19 = vsel %vm6401_vm3, %v6245_v8, %v6465_v20  ;;  %v8431_v56 = vadd.f32 %v5960_v17, %v5094_v24  ;;  %v5962_v50 = vpop.f32.mrb[69].mxu1  ;;  %6920 = vmatprep.mubr.bf16.mxu0 %v9243_v1  ;;  %v13186_v8 = vld [vmem:[#allocation26_spill] sm:$0xff] }
 0x4ca   :  { %v5963_v11 = vpop.f32.mrb[70].mxu1  ;;  %v5105_v1 = vadd.f32 %v13186_v8, %v3319_v7  ;;  %v9244_v7 = vld [vmem:[%s12964_s5 + $0x40] ss:$16 sps:$4 sm:$0xff]  }
 0x4cb   :  { %v6250_v33 = vadd.f32 %v8431_v56, %v13183_v23  ;;  %v8433_v26 = vadd.f32 %v5963_v11, %v5097_v52  ;;  %v5965_v15 = vpop.f32.mrb[71].mxu1  ;;  %v3339_v23 = vpop.permute.xlu1 %3338  ;;  %v13196_v56 = vld [vmem:[#allocation66_spill] sm:$0xff] }
 0x4cc   :  { %v9249_v15 = vld [vmem:[%s12964_s5 + $0x64] ss:$16 sps:$4 sm:$0xff]  }
 0x4cd   :  { %v6466_v25 = vmul.f32 0.01, %v6250_v33  ;;  %v6253_v27 = vadd.f32 %v8433_v26, %v13184_v45  ;;  %vm6402_vm4 = vcmp.ge.f32.partialorder %v6250_v33, 0.0 }
 0x4cf   :  { %vm6403_vm0 = vcmp.ge.f32.partialorder %v6253_v27, 0.0  ;;  %v6467_v40 = vmul.f32 0.01, %v6253_v27  ;;  %v12672_v9 = vsel %vm6402_vm4, %v6250_v33, %v6466_v25  ;;  %v12694_v8 = vpop.permute.xlu1 %3428 }
 0x4d0   :  { %v5968_v31 = vpop.f32.mrb[72].mxu1  ;;  %6921 = vmatmul.mubr.bf16.gmra.mrb[84].mxu0 %v9241_v30  ;;  %v13187_v30 = vld [vmem:[#allocation24_spill] sm:$0xff] }
 0x4d1   :  { %v12674_v24 = vsel %vm6403_vm0, %v6253_v27, %v6467_v40  ;;  %v8435_v20 = vadd.f32 %v5968_v31, %v5102_v41  ;;  %v5970_v17 = vpop.f32.mrb[73].mxu1  ;;  %6928 = vmatprep.mubr.bf16.mxu0 %v9246_v57  ;;  %v5110_v25 = vadd.f32 %v13187_v30, %v3324_v51  ;;  %v12687_v27 = vpop.permute.xlu0 %3423  ;;  %v13188_v57 = vld [vmem:[#allocation25_spill] sm:$0xff] }
 0x4d2   :  { %v5971_v52 = vpop.f32.mrb[74].mxu1  ;;  %v5113_v16 = vadd.f32 %v13188_v57, %v3329_v32  ;;  %v9247_v32 = vld [vmem:[%s12964_s5 + $0x60] ss:$16 sps:$4 sm:$0xff]  }
 0x4d3   :  { %v8437_v50 = vadd.f32 %v5971_v52, %v5105_v1  ;;  %v6258_v35 = vadd.f32 %v8435_v20, %v12404_v59  ;;  %v5973_v11 = vpop.f32.mrb[75].mxu1  ;;  %v13189_v20 = vld [vmem:[#allocation64_spill] sm:$0xff]  ;;  %v13192_v57 = vld [vmem:[#allocation30_spill] sm:$0xff] }
 0x4d4   :  { %v13190_v11 = vld [vmem:[#allocation65_spill] sm:$0xff] }
 0x4d5   :  { %v6468_v33 = vmul.f32 0.01, %v6258_v35  ;;  %v6261_v26 = vadd.f32 %v8437_v50, %v12412_v28  ;;  %vm6404_vm5 = vcmp.ge.f32.partialorder %v6258_v35, 0.0 }
 0x4d7   :  { %vm6405_vm6 = vcmp.ge.f32.partialorder %v6261_v26, 0.0  ;;  %v6469_v45 = vmul.f32 0.01, %v6261_v26  ;;  %v12690_v41 = vsel %vm6404_vm5, %v6258_v35, %v6468_v33  ;;  %v9252_v33 = vld [vmem:[%s12964_s5 + $0x84] ss:$16 sps:$4 sm:$0xff]  }
 0x4d8   :  { %v5976_v59 = vpop.f32.mrb[76].mxu1  ;;  %6929 = vmatmul.mubr.bf16.gmra.mrb[88].mxu0 %v9244_v7 }
 0x4d9   :  { %v12692_v40 = vsel %vm6405_vm6, %v6261_v26, %v6469_v45  ;;  %v8439_v28 = vadd.f32 %v5976_v59, %v5110_v25  ;;  %v5978_v31 = vpop.f32.mrb[77].mxu1  ;;  %6936 = vmatprep.mubr.bf16.mxu0 %v9249_v15  ;;  %v3344_v26 = vpop.permute.xlu0 %3343  ;;  %v13191_v15 = vld [vmem:[#allocation23_spill] sm:$0xff] }
 0x4da   :  { %v5979_v1 = vpop.f32.mrb[78].mxu1  ;;  %v5118_v30 = vadd.f32 %v13191_v15, %v3334_v58  ;;  %v3349_v45 = vpop.permute.xlu1 %3348 }
 0x4db   :  { %v6266_v17 = vadd.f32 %v8439_v28, %v13189_v20  ;;  %v8441_v52 = vadd.f32 %v5979_v1, %v5113_v16  ;;  %v5981_v50 = vpop.f32.mrb[79].mxu1  ;;  %v5121_v16 = vadd.f32 %v13192_v57, %v3339_v23  ;;  %v9250_v23 = vld [vmem:[%s12964_s5 + $0x80] ss:$16 sps:$4 sm:$0xff]  }
 0x4dc   :  { %v13195_v57 = vld [vmem:[#allocation29_spill] sm:$0xff] }
 0x4dd   :  { %v6470_v35 = vmul.f32 0.01, %v6266_v17  ;;  %v6269_v7 = vadd.f32 %v8441_v52, %v13190_v11  ;;  %vm6406_vm7 = vcmp.ge.f32.partialorder %v6266_v17, 0.0  ;;  %v12715_v51 = vpop.permute.xlu0 %3433 }
 0x4df   :  { %vm6407_vm8 = vcmp.ge.f32.partialorder %v6269_v7, 0.0  ;;  %v6471_v25 = vmul.f32 0.01, %v6269_v7  ;;  %v12708_v28 = vsel %vm6406_vm7, %v6266_v17, %v6470_v35 }
 0x4e0   :  { %v5984_v59 = vpop.f32.mrb[80].mxu1  ;;  %6937 = vmatmul.mubr.bf16.gmra.mrb[92].mxu0 %v9247_v32  ;;  %v13193_v32 = vld [vmem:[#allocation68_spill] sm:$0xff] }
 0x4e1   :  { %v12710_v31 = vsel %vm6407_vm8, %v6269_v7, %v6471_v25  ;;  %v8443_v1 = vadd.f32 %v5984_v59, %v5118_v30  ;;  %v5986_v20 = vpop.f32.mrb[81].mxu1  ;;  %6944 = vmatprep.mubr.bf16.mxu0 %v9252_v33  ;;  %v9255_v7 = vld [vmem:[%s12964_s5 + $0xa4] ss:$16 sps:$4 sm:$0xff]   ;;  %v12724_v33 = vpop.permute.xlu1 %3438  ;;  %v13194_v30 = vld [vmem:[#allocation28_spill] sm:$0xff] }
 0x4e2   :  { %v5987_v52 = vpop.f32.mrb[82].mxu1  ;;  %v5126_v25 = vadd.f32 %v13194_v30, %v3344_v26 }
 0x4e3   :  { %v8445_v11 = vadd.f32 %v5987_v52, %v5121_v16  ;;  %v6274_v58 = vadd.f32 %v8443_v1, %v12448_v18  ;;  %v5989_v15 = vpop.f32.mrb[83].mxu1  ;;  %v5129_v16 = vadd.f32 %v13195_v57, %v3349_v45  ;;  %v9253_v45 = vld [vmem:[%s12964_s5 + $0xa0] ss:$16 sps:$4 sm:$0xff]  }
 0x4e4   :  { %v3354_v15 = vpop.permute.xlu0 %3353 }
 0x4e5   :  { %v6472_v17 = vmul.f32 0.01, %v6274_v58  ;;  %v6277_v35 = vadd.f32 %v8445_v11, %v13193_v32  ;;  %vm6408_vm9 = vcmp.ge.f32.partialorder %v6274_v58, 0.0  ;;  %v3359_v60 = vpop.permute.xlu1 %3358 }
 0x4e7   :  { %vm6409_vm10 = vcmp.ge.f32.partialorder %v6277_v35, 0.0  ;;  %v6473_v18 = vmul.f32 0.01, %v6277_v35  ;;  %v12728_v1 = vsel %vm6408_vm9, %v6274_v58, %v6472_v17 }
 0x4e8   :  { %v5992_v59 = vpop.f32.mrb[84].mxu1  ;;  %6945 = vmatmul.mubr.bf16.gmra.mrb[96].mxu0 %v9250_v23  ;;  %v13197_v23 = vld [vmem:[#allocation67_spill] sm:$0xff] }
 0x4e9   :  { %v12730_v20 = vsel %vm6409_vm10, %v6277_v35, %v6473_v18  ;;  %v8447_v52 = vadd.f32 %v5992_v59, %v5126_v25  ;;  %v5994_v11 = vpop.f32.mrb[85].mxu1  ;;  %6952 = vmatprep.mubr.bf16.mxu0 %v9255_v7  ;;  %v9258_v35 = vld [vmem:[%s12964_s5 + $0xc4] ss:$16 sps:$4 sm:$0xff]  }
 0x4ea   :  { %v5995_v50 = vpop.f32.mrb[86].mxu1  ;;  %v13198_v7 = vld [vmem:[#allocation27_spill] sm:$0xff] }
 0x4eb   :  { %v6282_v26 = vadd.f32 %v8447_v52, %v13196_v56  ;;  %v8449_v30 = vadd.f32 %v5995_v50, %v5129_v16  ;;  %v5997_v49 = vpop.f32.mrb[87].mxu1  ;;  %v5134_v25 = vadd.f32 %v13198_v7, %v3354_v15  ;;  %v12743_v56 = vpop.permute.xlu0 %3443  ;;  %v13199_v50 = vld [vmem:[#allocation34_spill] sm:$0xff] }
 0x4ec   :  { %v5137_v59 = vadd.f32 %v13199_v50, %v3359_v60  ;;  %v9256_v60 = vld [vmem:[%s12964_s5 + $0xc0] ss:$16 sps:$4 sm:$0xff]  }
 0x4ed   :  { %v6474_v58 = vmul.f32 0.01, %v6282_v26  ;;  %v6285_v17 = vadd.f32 %v8449_v30, %v13197_v23  ;;  %vm6410_vm11 = vcmp.ge.f32.partialorder %v6282_v26, 0.0  ;;  %v12750_v30 = vpop.permute.xlu1 %3448 }
 0x4ef   :  { %vm6411_vm12 = vcmp.ge.f32.partialorder %v6285_v17, 0.0  ;;  %v6475_v18 = vmul.f32 0.01, %v6285_v17  ;;  %v12746_v57 = vsel %vm6410_vm11, %v6282_v26, %v6474_v58  ;;  %v9261_v58 = vld [vmem:[%s12964_s5 + $0xe4] ss:$16 sps:$4 sm:$0xff]  }
 0x4f0   :  { %v6000_v49 = vpop.f32.mrb[88].mxu1  ;;  %6953 = vmatmul.mubr.bf16.gmra.mrb[100].mxu0 %v9253_v45 }
 0x4f1   :  { %v12748_v16 = vsel %vm6411_vm12, %v6285_v17, %v6475_v18  ;;  %v8451_v52 = vadd.f32 %v6000_v49, %v5134_v25  ;;  %v6002_v11 = vpop.f32.mrb[89].mxu1  ;;  %6960 = vmatprep.mubr.bf16.mxu0 %v9258_v35  ;;  %v3364_v17 = vpop.permute.xlu0 %3363  ;;  %v13200_v35 = vld [vmem:[#allocation32_spill] sm:$0xff] }
 0x4f2   :  { %v6003_v23 = vpop.f32.mrb[90].mxu1  ;;  %v5142_v25 = vadd.f32 %v13200_v35, %v3364_v17  ;;  %v3369_v49 = vpop.permute.xlu1 %3368 }
 0x4f3   :  { %v8453_v7 = vadd.f32 %v6003_v23, %v5137_v59  ;;  %v6290_v32 = vadd.f32 %v8451_v52, %v12482_v0  ;;  %v6005_v38 = vpop.f32.mrb[91].mxu1 }
 0x4f4   :  { %v13201_v38 = vld [vmem:[#allocation33_spill] sm:$0xff] }
 0x4f5   :  { %v6476_v26 = vmul.f32 0.01, %v6290_v32  ;;  %v6293_v45 = vadd.f32 %v8453_v7, %v12488_v43  ;;  %vm6412_vm13 = vcmp.ge.f32.partialorder %v6290_v32, 0.0  ;;  %v5145_v50 = vadd.f32 %v13201_v38, %v3369_v49 }
 0x4f7   :  { %vm6413_vm14 = vcmp.ge.f32.partialorder %v6293_v45, 0.0  ;;  %v6477_v18 = vmul.f32 0.01, %v6293_v45  ;;  %v12764_v59 = vsel %vm6412_vm13, %v6290_v32, %v6476_v26  ;;  %v9264_v26 = vld [vmem:[%s12964_s5 + $0xc] ss:$16 sps:$4 sm:$0xff]  }
 0x4f8   :  { %v6008_v0 = vpop.f32.mrb[92].mxu1  ;;  %6961 = vmatmul.mubr.bf16.gmra.mrb[104].mxu0 %v9256_v60  ;;  %v9259_v60 = vld [vmem:[%s12964_s5 + $0xe0] ss:$16 sps:$4 sm:$0xff]  }
 0x4f9   :  { %v12766_v52 = vsel %vm6413_vm14, %v6293_v45, %v6477_v18  ;;  %v8455_v43 = vadd.f32 %v6008_v0, %v5142_v25  ;;  %v6010_v11 = vpop.f32.mrb[93].mxu1  ;;  %6968 = vmatprep.mubr.bf16.mxu0 %v9261_v58  ;;  %v13202_v45 = vld [vmem:[#allocation31_spill] sm:$0xff] }
 0x4fa   :  { %v6614_v23 = vpack.c.bf16 %v12766_v52, %v12764_v59  ;;  %v6011_v7 = vpop.f32.mrb[94].mxu1  ;;  %v5150_v58 = vadd.f32 %v13202_v45, %v12547_v62  ;;  %v9267_v59 = vld [vmem:[%s12964_s5 + $0x2c] ss:$16 sps:$4 sm:$0xff]   ;;  %v9265_v52 = vld [vmem:[%s12964_s5 + $0x28] ss:$16 sps:$4 sm:$0xff]  }
 0x4fb   :  { %v6298_v17 = vadd.f32 %v8455_v43, %v12480_v10  ;;  %v8457_v35 = vadd.f32 %v6011_v7, %v5145_v50  ;;  %v6013_v15 = vpop.f32.mrb[95].mxu1 }
 0x4fc   :  { %v13203_v15 = vld [vmem:[#allocation38_spill] sm:$0xff] }
 0x4fd   :  { %v6478_v49 = vmul.f32 0.01, %v6298_v17  ;;  %v6301_v32 = vadd.f32 %v8457_v35, %v12486_v63  ;;  %vm6414_vm15 = vcmp.ge.f32.partialorder %v6298_v17, 0.0  ;;  %v5153_v18 = vadd.f32 %v13203_v15, %v12551_v6  ;;  %v13204_v6 = vld [vmem:[#allocation36_spill] sm:$0xff] }
 0x4ff   :  { %vm6415_vm1 = vcmp.ge.f32.partialorder %v6301_v32, 0.0  ;;  %v6479_v25 = vmul.f32 0.01, %v6301_v32  ;;  %v12782_v0 = vsel %vm6414_vm15, %v6298_v17, %v6478_v49  ;;  %v5158_v17 = vadd.f32 %v13204_v6, %v12567_v21 }
 0x500   :  { %v6016_v10 = vpop.f32.mrb[96].mxu1  ;;  %6969 = vmatmul.mubr.bf16.gmra.mrb[108].mxu0 %v9259_v60 }
 0x501   :  { %v12784_v38 = vsel %vm6415_vm1, %v6301_v32, %v6479_v25  ;;  %v8459_v63 = vadd.f32 %v6016_v10, %v5150_v58  ;;  %v6018_v50 = vpop.f32.mrb[97].mxu1  ;;  %7009 = vmatprep.mubr.bf16.mxu0 %v9264_v26  ;;  %v13205_v26 = vld [vmem:[#allocation37_spill] sm:$0xff] }
 0x502   :  { %v6019_v43 = vpop.f32.mrb[98].mxu1  ;;  %v6615_v11 = vpack.c.bf16 %v12784_v38, %v12782_v0  ;;  %v5161_v58 = vadd.f32 %v13205_v26, %v12573_v48  ;;  %v13207_v48 = vld [vmem:[#allocation35_spill] sm:$0xff]  ;;  %v9273_v38 = vld [vmem:[%s12964_s5 + $0x6c] ss:$16 sps:$4 sm:$0xff]  }
 0x503   :  { %v6306_v62 = vadd.f32 %v8459_v63, %v12511_v46  ;;  %v8461_v7 = vadd.f32 %v6019_v43, %v5153_v18  ;;  %v6021_v35 = vpop.f32.mrb[99].mxu1  ;;  %v5166_v6 = vadd.f32 %v13207_v48, %v12598_v55  ;;  %v9268_v0 = vld [vmem:[%s12964_s5 + $0x48] ss:$16 sps:$4 sm:$0xff]  }
 0x504   :  { %v13206_v35 = vpack.c.bf16 %v12653_v19, %v12651_v47 }
 0x505   :  { %v6480_v45 = vmul.f32 0.01, %v6306_v62  ;;  %v6309_v60 = vadd.f32 %v8461_v7, %v12517_v3  ;;  %vm6416_vm2 = vcmp.ge.f32.partialorder %v6306_v62, 0.0 }
 0x507   :  { %vm6417_vm3 = vcmp.ge.f32.partialorder %v6309_v60, 0.0  ;;  %v6481_v49 = vmul.f32 0.01, %v6309_v60  ;;  %v6544_v15 = vsel %vm6416_vm2, %v6306_v62, %v6480_v45 }
 0x508   :  { %v6024_v32 = vpop.f32.mrb[100].mxu1 }
 0x509   :  { %v8463_v25 = vadd.f32 %v6024_v32, %v5158_v17  ;;  %v6026_v10 = vpop.f32.mrb[101].mxu1  ;;  %v6545_v50 = vsel %vm6417_vm3, %v6309_v60, %v6481_v49  ;;  %v13208_v60 = vld [vmem:[#allocation42_spill] sm:$0xff] }
 0x50a   :  { %v6027_v46 = vpop.f32.mrb[102].mxu1  ;;  %v6616_v18 = vpack.c.bf16 %v6545_v50, %v6544_v15  ;;  %v13209_v15 = vpack.c.bf16 %v12674_v24, %v12672_v9 }
 0x50b   :  { %v6314_v63 = vadd.f32 %v8463_v25, %v12507_v4  ;;  %v8465_v43 = vadd.f32 %v6027_v46, %v5161_v58  ;;  %v6029_v3 = vpop.f32.mrb[103].mxu1  ;;  %v5169_v4 = vadd.f32 %v13208_v60, %v12607_v13  ;;  %v13210_v13 = vld [vmem:[#allocation40_spill] sm:$0xff] }
 0x50c   :  { %8036 = vmatprep.subr.bf16.mxu0 %v6616_v18  ;;  %v5174_v50 = vadd.f32 %v13210_v13, %v12630_v37  ;;  %v13217_v13 = vld [vmem:[#allocation4_spill] sm:$0xff] }
 0x50d   :  { %v6482_v7 = vmul.f32 0.01, %v6314_v63  ;;  %v6317_v21 = vadd.f32 %v8465_v43, %v12515_v2  ;;  %8037 = vmatpush3.bf16.msra.mxu0 %v13206_v35  ;;  %vm6418_vm4 = vcmp.ge.f32.partialorder %v6314_v63, 0.0 }
 0x50f   :  { %vm6419_vm0 = vcmp.ge.f32.partialorder %v6317_v21, 0.0  ;;  %v6483_v62 = vmul.f32 0.01, %v6317_v21  ;;  %v6546_v32 = vsel %vm6418_vm4, %v6314_v63, %v6482_v7  ;;  %v13211_v63 = vld [vmem:[#allocation41_spill] sm:$0xff] }
 0x510   :  { %v6032_v45 = vpop.f32.mrb[104].mxu1 }
 0x511   :  { %v8467_v17 = vadd.f32 %v6032_v45, %v5166_v6  ;;  %v6034_v49 = vpop.f32.mrb[105].mxu1  ;;  %v6547_v26 = vsel %vm6419_vm0, %v6317_v21, %v6483_v62  ;;  %v13212_v62 = vpack.c.bf16 %v12692_v40, %v12690_v41 }
 0x512   :  { %v6035_v58 = vpop.f32.mrb[106].mxu1  ;;  %v6617_v2 = vpack.c.bf16 %v6547_v26, %v6546_v32 }
 0x513   :  { %v6322_v25 = vadd.f32 %v8467_v17, %v12532_v12  ;;  %v8469_v47 = vadd.f32 %v6035_v58, %v5169_v4  ;;  %v6037_v19 = vpop.f32.mrb[107].mxu1  ;;  %v5177_v12 = vadd.f32 %v13211_v63, %v12634_v42  ;;  %v13213_v42 = vld [vmem:[#allocation39_spill] sm:$0xff] }
 0x514   :  { %8038 = vmatprep.subr.bf16.mxu0 %v6617_v2  ;;  %v5182_v45 = vadd.f32 %v13213_v42, %v12658_v53  ;;  %v13214_v17 = vld [vmem:[#allocation3_spill] sm:$0xff]  ;;  %v13215_v19 = vpack.c.bf16 %v12710_v31, %v12708_v28 }
 0x515   :  { %v6484_v10 = vmul.f32 0.01, %v6322_v25  ;;  %v6325_v55 = vadd.f32 %v8469_v47, %v12543_v34  ;;  %8039 = vmatpush3.bf16.msra.mxu0 %v13209_v15  ;;  %vm6420_vm5 = vcmp.ge.f32.partialorder %v6322_v25, 0.0 }
 0x517   :  { %vm6421_vm6 = vcmp.ge.f32.partialorder %v6325_v55, 0.0  ;;  %v6485_v46 = vmul.f32 0.01, %v6325_v55  ;;  %v6548_v7 = vsel %vm6420_vm5, %v6322_v25, %v6484_v10 }
 0x518   :  { %v6040_v18 = vpop.f32.mrb[108].mxu1 }
 0x519   :  { %v8471_v43 = vadd.f32 %v6040_v18, %v5174_v50  ;;  %v6042_v3 = vpop.f32.mrb[109].mxu1  ;;  %v6549_v21 = vsel %vm6421_vm6, %v6325_v55, %v6485_v46 }
 0x51a   :  { %v6043_v35 = vpop.f32.mrb[110].mxu1  ;;  %v6618_v34 = vpack.c.bf16 %v6549_v21, %v6548_v7  ;;  %v13218_v7 = vpack.c.bf16 %v12730_v20, %v12728_v1 }
 0x51b   :  { %v6330_v48 = vadd.f32 %v8471_v43, %v12530_v54  ;;  %v8473_v9 = vadd.f32 %v6043_v35, %v5177_v12  ;;  %v6045_v24 = vpop.f32.mrb[111].mxu1  ;;  %v5185_v54 = vadd.f32 %v13214_v17, %v12667_v61  ;;  %v13216_v61 = vld [vmem:[#allocation5_spill] sm:$0xff] }
 0x51c   :  { %8040 = vmatprep.subr.bf16.mxu0 %v6618_v34  ;;  %v5190_v10 = vadd.f32 %v13216_v61, %v12687_v27 }
 0x51d   :  { %v6486_v6 = vmul.f32 0.01, %v6330_v48  ;;  %v6333_v37 = vadd.f32 %v8473_v9, %v12541_v36  ;;  %8041 = vmatpush3.bf16.msra.mxu0 %v13212_v62  ;;  %vm6422_vm7 = vcmp.ge.f32.partialorder %v6330_v48, 0.0 }
 0x51f   :  { %vm6423_vm8 = vcmp.ge.f32.partialorder %v6333_v37, 0.0  ;;  %v6487_v60 = vmul.f32 0.01, %v6333_v37  ;;  %v6550_v26 = vsel %vm6422_vm7, %v6330_v48, %v6486_v6  ;;  %v13220_v48 = vld [vmem:[#allocation43_spill] sm:$0xff] }
 0x520   :  { %v6048_v4 = vpop.f32.mrb[112].mxu1 }
 0x521   :  { %v8475_v49 = vadd.f32 %v6048_v4, %v5182_v45  ;;  %v6050_v32 = vpop.f32.mrb[113].mxu1  ;;  %v6551_v58 = vsel %vm6423_vm8, %v6333_v37, %v6487_v60  ;;  %v13221_v60 = vpack.c.bf16 %v12748_v16, %v12746_v57 }
 0x522   :  { %v6051_v2 = vpop.f32.mrb[114].mxu1  ;;  %v6619_v36 = vpack.c.bf16 %v6551_v58, %v6550_v26 }
 0x523   :  { %v6338_v25 = vadd.f32 %v8475_v49, %v12579_v29  ;;  %v8477_v41 = vadd.f32 %v6051_v2, %v5185_v54  ;;  %v6053_v40 = vpop.f32.mrb[115].mxu1  ;;  %v5193_v29 = vadd.f32 %v13217_v13, %v12694_v8  ;;  %v13219_v8 = vld [vmem:[#allocation6_spill] sm:$0xff]  ;;  %v13223_v49 = vld [vmem:[#allocation45_spill] sm:$0xff] }
 0x524   :  { %8042 = vmatprep.subr.bf16.mxu0 %v6619_v36  ;;  %v5198_v21 = vadd.f32 %v13219_v8, %v12715_v51  ;;  %v9279_v13 = vld [vmem:[%s12964_s5 + $0xac] ss:$16 sps:$4 sm:$0xff]  }
 0x525   :  { %v6488_v47 = vmul.f32 0.01, %v6338_v25  ;;  %v6341_v53 = vadd.f32 %v8477_v41, %v12585_v14  ;;  %8043 = vmatpush3.bf16.msra.mxu0 %v13215_v19  ;;  %vm6424_vm9 = vcmp.ge.f32.partialorder %v6338_v25, 0.0 }
 0x527   :  { %vm6425_vm10 = vcmp.ge.f32.partialorder %v6341_v53, 0.0  ;;  %v6489_v55 = vmul.f32 0.01, %v6341_v53  ;;  %v6552_v18 = vsel %vm6424_vm9, %v6338_v25, %v6488_v47  ;;  %v13224_v25 = vld [vmem:[#allocation10_spill] sm:$0xff]  ;;  %v13225_v47 = vld [vmem:[#allocation47_spill] sm:$0xff] }
 0x528   :  { %v6056_v15 = vpop.f32.mrb[116].mxu1 }
 0x529   :  { %v8479_v50 = vadd.f32 %v6056_v15, %v5190_v10  ;;  %v6058_v46 = vpop.f32.mrb[117].mxu1  ;;  %v6553_v63 = vsel %vm6425_vm10, %v6341_v53, %v6489_v55  ;;  %v9262_v10 = vld [vmem:[%s12964_s5 + $0x8] ss:$16 sps:$4 sm:$0xff]   ;;  %v9276_v55 = vld [vmem:[%s12964_s5 + $0x8c] ss:$16 sps:$4 sm:$0xff]  }
 0x52a   :  { %v6059_v12 = vpop.f32.mrb[118].mxu1  ;;  %v6620_v14 = vpack.c.bf16 %v6553_v63, %v6552_v18  ;;  %v9274_v15 = vld [vmem:[%s12964_s5 + $0x88] ss:$16 sps:$4 sm:$0xff]   ;;  %v9285_v18 = vld [vmem:[%s12964_s5 + $0xec] ss:$16 sps:$4 sm:$0xff]  }
 0x52b   :  { %v6346_v43 = vadd.f32 %v8479_v50, %v12577_v39  ;;  %v8481_v28 = vadd.f32 %v6059_v12, %v5193_v29  ;;  %v6061_v31 = vpop.f32.mrb[119].mxu1  ;;  %v5201_v39 = vadd.f32 %v13220_v48, %v12724_v33  ;;  %v13222_v33 = vld [vmem:[#allocation44_spill] sm:$0xff] }
 0x52c   :  { %8044 = vmatprep.subr.bf16.mxu0 %v6620_v14  ;;  %v5206_v4 = vadd.f32 %v13222_v33, %v12743_v56  ;;  %v9277_v29 = vld [vmem:[%s12964_s5 + $0xa8] ss:$16 sps:$4 sm:$0xff]   ;;  %v9282_v50 = vld [vmem:[%s12964_s5 + $0xcc] ss:$16 sps:$4 sm:$0xff]  }
 0x52d   :  { %v6490_v3 = vmul.f32 0.01, %v6346_v43  ;;  %v6349_v27 = vadd.f32 %v8481_v28, %v12583_v44  ;;  %8045 = vmatpush3.bf16.msra.mxu0 %v13218_v7  ;;  %vm6426_vm11 = vcmp.ge.f32.partialorder %v6346_v43, 0.0  ;;  %v9280_v46 = vld [vmem:[%s12964_s5 + $0xc8] ss:$16 sps:$4 sm:$0xff]  }
 0x52e   :  { %v9283_v63 = vld [vmem:[%s12964_s5 + $0xe8] ss:$16 sps:$4 sm:$0xff]  }
 0x52f   :  { %vm6427_vm12 = vcmp.ge.f32.partialorder %v6349_v27, 0.0  ;;  %v6491_v35 = vmul.f32 0.01, %v6349_v27  ;;  %v6554_v6 = vsel %vm6426_vm11, %v6346_v43, %v6490_v3 }
 0x530   :  { %v6064_v34 = vpop.f32.mrb[120].mxu1 }
 0x531   :  { %v8483_v9 = vadd.f32 %v6064_v34, %v5198_v21  ;;  %v6066_v24 = vpop.f32.mrb[121].mxu1  ;;  %v6555_v37 = vsel %vm6427_vm12, %v6349_v27, %v6491_v35 }
 0x532   :  { %v6067_v62 = vpop.f32.mrb[122].mxu1  ;;  %v6621_v44 = vpack.c.bf16 %v6555_v37, %v6554_v6 }
 0x533   :  { %v6354_v42 = vadd.f32 %v8483_v9, %v12615_v5  ;;  %v8485_v1 = vadd.f32 %v6067_v62, %v5201_v39  ;;  %v6069_v20 = vpop.f32.mrb[123].mxu1  ;;  %v5209_v5 = vadd.f32 %v13223_v49, %v12750_v30 }
 0x534   :  { %8046 = vmatprep.subr.bf16.mxu0 %v6621_v44 }
 0x535   :  { %v6492_v45 = vmul.f32 0.01, %v6354_v42  ;;  %v6357_v51 = vadd.f32 %v8485_v1, %v12621_v22  ;;  %8047 = vmatpush3.bf16.msra.mxu0 %v13221_v60  ;;  %vm6428_vm13 = vcmp.ge.f32.partialorder %v6354_v42, 0.0 }
 0x537   :  { %vm6429_vm14 = vcmp.ge.f32.partialorder %v6357_v51, 0.0  ;;  %v6493_v17 = vmul.f32 0.01, %v6357_v51  ;;  %v6556_v58 = vsel %vm6428_vm13, %v6354_v42, %v6492_v45 }
 0x538   :  { %v6072_v54 = vpop.f32.mrb[124].mxu1 }
 0x539   :  { %v8487_v32 = vadd.f32 %v6072_v54, %v5206_v4  ;;  %v6074_v26 = vpop.f32.mrb[125].mxu1  ;;  %v6557_v2 = vsel %vm6429_vm14, %v6357_v51, %v6493_v17 }
 0x53a   :  { %v6075_v36 = vpop.f32.mrb[126].mxu1  ;;  %v6622_v22 = vpack.c.bf16 %v6557_v2, %v6556_v58 }
 0x53b   :  { %v6362_v41 = vadd.f32 %v8487_v32, %v13224_v25  ;;  %v8489_v57 = vadd.f32 %v6075_v36, %v5209_v5  ;;  %v6077_v16 = vpop.f32.mrb[127].mxu1 }
 0x53c   :  { %8048 = vmatprep.subr.bf16.mxu0 %v6622_v22 }
 0x53d   :  { %v6494_v40 = vmul.f32 0.01, %v6362_v41  ;;  %v6365_v56 = vadd.f32 %v8489_v57, %v13225_v47  ;;  %8049 = vmatpush3.bf16.msra.mxu0 %v6614_v23  ;;  %vm6430_vm15 = vcmp.ge.f32.partialorder %v6362_v41, 0.0  ;;  %v9270_v23 = vld [vmem:[%s12964_s5 + $0x4c] ss:$16 sps:$4 sm:$0xff]  }
 0x53f   :  { %vm6431_vm1 = vcmp.ge.f32.partialorder %v6365_v56, 0.0  ;;  %v6495_v30 = vmul.f32 0.01, %v6365_v56  ;;  %v6558_v53 = vsel %vm6430_vm15, %v6362_v41, %v6494_v40 }
 0x541   :  { %v6559_v19 = vsel %vm6431_vm1, %v6365_v56, %v6495_v30 }
 0x542   :  { %v6623_v61 = vpack.c.bf16 %v6559_v19, %v6558_v53 }
 0x544   :  { %8050 = vmatprep.subr.bf16.mxu0 %v6623_v61  ;;  %v9286_v61 = vld [vmem:[%s12965_s7] sm:$0xff]  }
 0x545   :  { %8051 = vmatpush3.bf16.msra.mxu0 %v6615_v11  ;;  %v9271_v11 = vld [vmem:[%s12964_s5 + $0x68] ss:$16 sps:$4 sm:$0xff]  }
 0x548   :  { %7010 = vmatmul.mubr.bf16.vlgmr.msra.gmra.mrb[112].mxu0 %v9262_v10 }
 0x549   :  { %7017 = vmatprep.mubr.bf16.mxu0 %v9267_v59  ;;  %v6643_v59 = vpop.permute.xlu0 %6642 }
 0x550   :  { %7018 = vmatmul.mubr.bf16.gmra.mrb[116].mxu0 %v9265_v52 }
 0x551   :  { %7025 = vmatprep.mubr.bf16.mxu0 %v9270_v23 }
 0x558   :  { %7026 = vmatmul.mubr.bf16.gmra.mrb[120].mxu0 %v9268_v0 }
 0x559   :  { %7033 = vmatprep.mubr.bf16.mxu0 %v9273_v38 }
 0x560   :  { %7034 = vmatmul.mubr.bf16.gmra.mrb[124].mxu0 %v9271_v11  ;;  %v6648_v11 = vpop.permute.xlu1 %6647 }
 0x561   :  { %7041 = vmatprep.mubr.bf16.mxu0 %v9276_v55 }
 0x568   :  { %7042 = vmatmul.mubr.bf16.gmra.mrb[128].mxu0 %v9274_v15 }
 0x569   :  { %7049 = vmatprep.mubr.bf16.mxu0 %v9279_v13 }
 0x570   :  { %7050 = vmatmul.mubr.bf16.gmra.mrb[132].mxu0 %v9277_v29 }
 0x571   :  { %7057 = vmatprep.mubr.bf16.mxu0 %v9282_v50 }
 0x578   :  { %7058 = vmatmul.mubr.bf16.gmra.mrb[136].mxu0 %v9280_v46 }
 0x579   :  { %7065 = vmatprep.mubr.bf16.mxu0 %v9285_v18 }
 0x580   :  { %7066 = vmatmul.mubr.bf16.gmra.mrb[140].mxu0 %v9283_v63 }
 0x581   :  { %8354 = vmatprep.mubr.bf16.mxu0 %v9286_v61 }
 0x59b   :  { %v7988_v12 = vpop.f32.mrb[80].mxu0 }
 0x59c   :  { %v7989_v14 = vpop.f32.mrb[81].mxu0 }
 0x59d   :  { %v7990_v43 = vadd.f32 %v7989_v14, %v7988_v12  ;;  %v7991_v28 = vpop.f32.mrb[82].mxu0  ;;  %v6653_v12 = vpop.permute.xlu0 %6652 }
 0x59e   :  { %v7992_v31 = vpop.f32.mrb[83].mxu0 }
 0x59f   :  { %v7993_v3 = vadd.f32 %v7992_v31, %v7991_v28  ;;  %v6915_v23 = vadd.f32 %v7990_v43, %v6643_v59 }
 0x5a1   :  { %v6918_v15 = vadd.f32 %v7993_v3, %v6648_v11 }
 0x5a3   :  { %v7994_v27 = vpop.f32.mrb[84].mxu0 }
 0x5a4   :  { %v7995_v7 = vpop.f32.mrb[85].mxu0 }
 0x5a5   :  { %v7996_v8 = vadd.f32 %v7995_v7, %v7994_v27  ;;  %v7997_v21 = vpop.f32.mrb[86].mxu0 }
 0x5a6   :  { %v7998_v35 = vpop.f32.mrb[87].mxu0 }
 0x5a7   :  { %v12901_v34 = vadd.f32 %v7998_v35, %v7997_v21  ;;  %v6923_v28 = vadd.f32 %v7996_v8, %v6653_v12  ;;  %v6658_v21 = vpop.permute.xlu1 %6657  ;;  %v6663_v8 = vpop.permute.xlu0 %6662 }
 0x5a9   :  { %v6926_v3 = vadd.f32 %v12901_v34, %v6658_v21 }
 0x5ab   :  { %v8000_v48 = vpop.f32.mrb[88].mxu0 }
 0x5ac   :  { %v8001_v39 = vpop.f32.mrb[89].mxu0 }
 0x5ad   :  { %v12903_v9 = vadd.f32 %v8001_v39, %v8000_v48  ;;  %v8003_v24 = vpop.f32.mrb[90].mxu0 }
 0x5ae   :  { %v8004_v6 = vpop.f32.mrb[91].mxu0 }
 0x5af   :  { %v12905_v37 = vadd.f32 %v8004_v6, %v8003_v24 }
 0x5b3   :  { %v8006_v62 = vpop.f32.mrb[92].mxu0 }
 0x5b4   :  { %v8007_v44 = vpop.f32.mrb[93].mxu0 }
 0x5b5   :  { %v12907_v42 = vadd.f32 %v8007_v44, %v8006_v62  ;;  %v8009_v1 = vpop.f32.mrb[94].mxu0 }
 0x5b6   :  { %v8010_v20 = vpop.f32.mrb[95].mxu0 }
 0x5b7   :  { %v12909_v45 = vadd.f32 %v8010_v20, %v8009_v1 }
 0x5bb   :  { %v8012_v51 = vpop.f32.mrb[96].mxu0 }
 0x5bc   :  { %v8013_v60 = vpop.f32.mrb[97].mxu0 }
 0x5bd   :  { %v12911_v33 = vadd.f32 %v8013_v60, %v8012_v51  ;;  %v8015_v4 = vpop.f32.mrb[98].mxu0  ;;  %v6931_v51 = vadd.f32 %v12903_v9, %v6663_v8  ;;  %v6673_v9 = vpop.permute.xlu0 %6672 }
 0x5be   :  { %v8016_v17 = vpop.f32.mrb[99].mxu0 }
 0x5bf   :  { %v12913_v54 = vadd.f32 %v8016_v17, %v8015_v4 }
 0x5c3   :  { %v8018_v49 = vpop.f32.mrb[100].mxu0 }
 0x5c4   :  { %v8019_v5 = vpop.f32.mrb[101].mxu0 }
 0x5c5   :  { %v12915_v32 = vadd.f32 %v8019_v5, %v8018_v49  ;;  %v8021_v26 = vpop.f32.mrb[102].mxu0  ;;  %v6668_v5 = vpop.permute.xlu1 %6667 }
 0x5c6   :  { %v8022_v58 = vpop.f32.mrb[103].mxu0 }
 0x5c7   :  { %v12917_v2 = vadd.f32 %v8022_v58, %v8021_v26  ;;  %v6934_v58 = vadd.f32 %v12905_v37, %v6668_v5 }
 0x5cb   :  { %v8024_v36 = vpop.f32.mrb[104].mxu0 }
 0x5cc   :  { %v8025_v22 = vpop.f32.mrb[105].mxu0 }
 0x5cd   :  { %v12919_v25 = vadd.f32 %v8025_v22, %v8024_v36  ;;  %v8027_v41 = vpop.f32.mrb[106].mxu0 }
 0x5ce   :  { %v8028_v57 = vpop.f32.mrb[107].mxu0 }
 0x5cf   :  { %v12921_v16 = vadd.f32 %v8028_v57, %v8027_v41 }
 0x5d3   :  { %v8030_v40 = vpop.f32.mrb[108].mxu0 }
 0x5d4   :  { %v8031_v47 = vpop.f32.mrb[109].mxu0 }
 0x5d5   :  { %v12923_v56 = vadd.f32 %v8031_v47, %v8030_v40  ;;  %v8033_v30 = vpop.f32.mrb[110].mxu0 }
 0x5d6   :  { %v8034_v53 = vpop.f32.mrb[111].mxu0 }
 0x5d7   :  { %v12925_v19 = vadd.f32 %v8034_v53, %v8033_v30  ;;  %v6939_v53 = vadd.f32 %v12907_v42, %v6673_v9  ;;  %v6683_v42 = vpop.permute.xlu0 %6682 }
 0x61b   :  { %v8052_v10 = vpop.f32.mrb[112].mxu0 }
 0x61c   :  { %v8053_v52 = vpop.f32.mrb[113].mxu0 }
 0x61d   :  { %v8054_v0 = vadd.f32 %v8053_v52, %v8052_v10  ;;  %v8055_v38 = vpop.f32.mrb[114].mxu0 }
 0x61e   :  { %v8056_v55 = vpop.f32.mrb[115].mxu0 }
 0x61f   :  { %v7012_v13 = vadd.f32 %v8054_v0, %v6915_v23  ;;  %v8057_v29 = vadd.f32 %v8056_v55, %v8055_v38  ;;  %v6678_v23 = vpop.permute.xlu1 %6677 }
 0x620   :  { %v6942_v38 = vadd.f32 %v12909_v45, %v6678_v23 }
 0x621   :  { %v7090_v50 = vmul.f32 0.01, %v7012_v13  ;;  %v7015_v46 = vadd.f32 %v8057_v29, %v6918_v15  ;;  %vm7074_vm2 = vcmp.ge.f32.partialorder %v7012_v13, 0.0 }
 0x623   :  { %vm7075_vm3 = vcmp.ge.f32.partialorder %v7015_v46, 0.0  ;;  %v7091_v18 = vmul.f32 0.01, %v7015_v46  ;;  %v8058_v63 = vpop.f32.mrb[116].mxu0  ;;  %v7106_v7 = vsel %vm7074_vm2, %v7012_v13, %v7090_v50 }
 0x624   :  { %v8059_v14 = vpop.f32.mrb[117].mxu0 }
 0x625   :  { %v8060_v31 = vadd.f32 %v8059_v14, %v8058_v63  ;;  %v8061_v27 = vpop.f32.mrb[118].mxu0  ;;  %v7107_v43 = vsel %vm7075_vm3, %v7015_v46, %v7091_v18  ;;  %v6947_v18 = vadd.f32 %v12911_v33, %v6683_v42  ;;  %v6693_v33 = vpop.permute.xlu0 %6692 }
 0x626   :  { %v8062_v35 = vpop.f32.mrb[119].mxu0  ;;  %v7130_v48 = vpack.c.bf16 %v7107_v43, %v7106_v7 }
 0x627   :  { %v7020_v39 = vadd.f32 %v8060_v31, %v6923_v28  ;;  %v8063_v24 = vadd.f32 %v8062_v35, %v8061_v27  ;;  %v6688_v31 = vpop.permute.xlu1 %6687 }
 0x628   :  { %8338 = vmatprep.subr.bf16.mxu0 %v7130_v48  ;;  %v6950_v7 = vadd.f32 %v12913_v54, %v6688_v31  ;;  %v9287_v31 = vld [vmem:[%s12965_s7 + $0x8] sm:$0xff]  }
 0x629   :  { %v7092_v6 = vmul.f32 0.01, %v7020_v39  ;;  %v7023_v62 = vadd.f32 %v8063_v24, %v6926_v3  ;;  %8339 = vmatpush3.bf16.msra.mxu0 %v7130_v48  ;;  %vm7076_vm4 = vcmp.ge.f32.partialorder %v7020_v39, 0.0 }
 0x62b   :  { %vm7077_vm0 = vcmp.ge.f32.partialorder %v7023_v62, 0.0  ;;  %v7093_v44 = vmul.f32 0.01, %v7023_v62  ;;  %v8064_v1 = vpop.f32.mrb[120].mxu0  ;;  %v7108_v17 = vsel %vm7076_vm4, %v7020_v39, %v7092_v6  ;;  %v6955_v6 = vadd.f32 %v12915_v32, %v6693_v33  ;;  %v6703_v32 = vpop.permute.xlu0 %6702 }
 0x62c   :  { %v8065_v20 = vpop.f32.mrb[121].mxu0 }
 0x62d   :  { %v8066_v60 = vadd.f32 %v8065_v20, %v8064_v1  ;;  %v8067_v4 = vpop.f32.mrb[122].mxu0  ;;  %v7109_v49 = vsel %vm7077_vm0, %v7023_v62, %v7093_v44  ;;  %v6698_v20 = vpop.permute.xlu1 %6697 }
 0x62e   :  { %v8068_v34 = vpop.f32.mrb[123].mxu0  ;;  %v7131_v26 = vpack.c.bf16 %v7109_v49, %v7108_v17 }
 0x62f   :  { %v7028_v36 = vadd.f32 %v8066_v60, %v6931_v51  ;;  %v8069_v22 = vadd.f32 %v8068_v34, %v8067_v4  ;;  %v6958_v60 = vadd.f32 %v12917_v2, %v6698_v20 }
 0x630   :  { %8340 = vmatprep.subr.bf16.mxu0 %v7131_v26 }
 0x631   :  { %v7094_v41 = vmul.f32 0.01, %v7028_v36  ;;  %v7031_v57 = vadd.f32 %v8069_v22, %v6934_v58  ;;  %8341 = vmatpush3.bf16.msra.mxu0 %v7131_v26  ;;  %vm7078_vm5 = vcmp.ge.f32.partialorder %v7028_v36, 0.0 }
 0x633   :  { %vm7079_vm6 = vcmp.ge.f32.partialorder %v7031_v57, 0.0  ;;  %v7095_v40 = vmul.f32 0.01, %v7031_v57  ;;  %v8070_v47 = vpop.f32.mrb[124].mxu0  ;;  %v7110_v59 = vsel %vm7078_vm5, %v7028_v36, %v7094_v41  ;;  %v6963_v36 = vadd.f32 %v12919_v25, %v6703_v32  ;;  %v6713_v25 = vpop.permute.xlu0 %6712 }
 0x634   :  { %v8071_v30 = vpop.f32.mrb[125].mxu0 }
 0x635   :  { %v8072_v61 = vadd.f32 %v8071_v30, %v8070_v47  ;;  %v8073_v10 = vpop.f32.mrb[126].mxu0  ;;  %v7111_v52 = vsel %vm7079_vm6, %v7031_v57, %v7095_v40  ;;  %v6708_v47 = vpop.permute.xlu1 %6707 }
 0x636   :  { %v8074_v37 = vpop.f32.mrb[127].mxu0  ;;  %v7132_v0 = vpack.c.bf16 %v7111_v52, %v7110_v59  ;;  %v6966_v30 = vadd.f32 %v12921_v16, %v6708_v47 }
 0x637   :  { %v7036_v11 = vadd.f32 %v8072_v61, %v6939_v53  ;;  %v8075_v55 = vadd.f32 %v8074_v37, %v8073_v10 }
 0x638   :  { %8342 = vmatprep.subr.bf16.mxu0 %v7132_v0 }
 0x639   :  { %v7096_v15 = vmul.f32 0.01, %v7036_v11  ;;  %v7039_v13 = vadd.f32 %v8075_v55, %v6942_v38  ;;  %8343 = vmatpush3.bf16.msra.mxu0 %v7132_v0  ;;  %vm7080_vm7 = vcmp.ge.f32.partialorder %v7036_v11, 0.0  ;;  %v6971_v0 = vadd.f32 %v12923_v56, %v6713_v25 }
 0x63b   :  { %vm7081_vm8 = vcmp.ge.f32.partialorder %v7039_v13, 0.0  ;;  %v7097_v29 = vmul.f32 0.01, %v7039_v13  ;;  %v8076_v50 = vpop.f32.mrb[128].mxu0  ;;  %v7112_v14 = vsel %vm7080_vm7, %v7036_v11, %v7096_v15 }
 0x63c   :  { %v8077_v46 = vpop.f32.mrb[129].mxu0 }
 0x63d   :  { %v8078_v63 = vadd.f32 %v8077_v46, %v8076_v50  ;;  %v8079_v12 = vpop.f32.mrb[130].mxu0  ;;  %v7113_v28 = vsel %vm7081_vm8, %v7039_v13, %v7097_v29  ;;  %v6718_v13 = vpop.permute.xlu1 %6717 }
 0x63e   :  { %v8080_v45 = vpop.f32.mrb[131].mxu0  ;;  %v7133_v27 = vpack.c.bf16 %v7113_v28, %v7112_v14  ;;  %v6974_v50 = vadd.f32 %v12925_v19, %v6718_v13  ;;  %v9288_v19 = vld [vmem:[%s12965_s7 + $0x10] sm:$0xff]  }
 0x63f   :  { %v7044_v43 = vadd.f32 %v8078_v63, %v6947_v18  ;;  %v8081_v21 = vadd.f32 %v8080_v45, %v8079_v12  ;;  %v9289_v45 = vld [vmem:[%s12965_s7 + $0x18] sm:$0xff]  }
 0x640   :  { %8344 = vmatprep.subr.bf16.mxu0 %v7133_v27 }
 0x641   :  { %v7098_v35 = vmul.f32 0.01, %v7044_v43  ;;  %v7047_v48 = vadd.f32 %v8081_v21, %v6950_v7  ;;  %8345 = vmatpush3.bf16.msra.mxu0 %v7133_v27  ;;  %vm7082_vm9 = vcmp.ge.f32.partialorder %v7044_v43, 0.0  ;;  %v7149_v27 = vpop.permute.xlu0 %7148  ;;  %v7154_v7 = vpop.permute.xlu1 %7153 }
 0x643   :  { %vm7083_vm10 = vcmp.ge.f32.partialorder %v7047_v48, 0.0  ;;  %v7099_v3 = vmul.f32 0.01, %v7047_v48  ;;  %v8082_v39 = vpop.f32.mrb[132].mxu0  ;;  %v7114_v1 = vsel %vm7082_vm9, %v7044_v43, %v7098_v35 }
 0x644   :  { %v8083_v24 = vpop.f32.mrb[133].mxu0 }
 0x645   :  { %v8084_v62 = vadd.f32 %v8083_v24, %v8082_v39  ;;  %v8085_v44 = vpop.f32.mrb[134].mxu0  ;;  %v7115_v8 = vsel %vm7083_vm10, %v7047_v48, %v7099_v3  ;;  %v7159_v43 = vpop.permute.xlu0 %7158 }
 0x646   :  { %v8086_v54 = vpop.f32.mrb[135].mxu0  ;;  %v7134_v51 = vpack.c.bf16 %v7115_v8, %v7114_v1  ;;  %v7164_v21 = vpop.permute.xlu1 %7163 }
 0x647   :  { %v7052_v4 = vadd.f32 %v8084_v62, %v6955_v6  ;;  %v8087_v17 = vadd.f32 %v8086_v54, %v8085_v44 }
 0x648   :  { %8346 = vmatprep.subr.bf16.mxu0 %v7134_v51 }
 0x649   :  { %v7100_v49 = vmul.f32 0.01, %v7052_v4  ;;  %v7055_v5 = vadd.f32 %v8087_v17, %v6958_v60  ;;  %8347 = vmatpush3.bf16.msra.mxu0 %v7134_v51  ;;  %vm7084_vm11 = vcmp.ge.f32.partialorder %v7052_v4, 0.0  ;;  %v7310_v35 = vpop.permute.xlu0 %7309 }
 0x64a   :  { %v7315_v48 = vpop.permute.xlu1 %7314 }
 0x64b   :  { %vm7085_vm12 = vcmp.ge.f32.partialorder %v7055_v5, 0.0  ;;  %v7101_v34 = vmul.f32 0.01, %v7055_v5  ;;  %v8088_v26 = vpop.f32.mrb[136].mxu0  ;;  %v7116_v57 = vsel %vm7084_vm11, %v7052_v4, %v7100_v49 }
 0x64c   :  { %v8089_v58 = vpop.f32.mrb[137].mxu0 }
 0x64d   :  { %v8090_v22 = vadd.f32 %v8089_v58, %v8088_v26  ;;  %v8091_v41 = vpop.f32.mrb[138].mxu0  ;;  %v7117_v40 = vsel %vm7085_vm12, %v7055_v5, %v7101_v34  ;;  %v7169_v3 = vpop.permute.xlu0 %7168 }
 0x64e   :  { %v8092_v2 = vpop.f32.mrb[139].mxu0  ;;  %v7135_v9 = vpack.c.bf16 %v7117_v40, %v7116_v57  ;;  %v7320_v39 = vpop.permute.xlu1 %7319 }
 0x64f   :  { %v7060_v53 = vadd.f32 %v8090_v22, %v6963_v36  ;;  %v8093_v61 = vadd.f32 %v8092_v2, %v8091_v41 }
 0x650   :  { %8348 = vmatprep.subr.bf16.mxu0 %v7135_v9 }
 0x651   :  { %v7102_v10 = vmul.f32 0.01, %v7060_v53  ;;  %v7063_v59 = vadd.f32 %v8093_v61, %v6966_v30  ;;  %8349 = vmatpush3.bf16.msra.mxu0 %v7135_v9  ;;  %vm7086_vm13 = vcmp.ge.f32.partialorder %v7060_v53, 0.0  ;;  %v7174_v33 = vpop.permute.xlu0 %7173 }
 0x652   :  { %v7325_v44 = vpop.permute.xlu1 %7324 }
 0x653   :  { %vm7087_vm14 = vcmp.ge.f32.partialorder %v7063_v59, 0.0  ;;  %v7103_v52 = vmul.f32 0.01, %v7063_v59  ;;  %v8094_v23 = vpop.f32.mrb[140].mxu0  ;;  %v7118_v55 = vsel %vm7086_vm13, %v7060_v53, %v7102_v10 }
 0x654   :  { %v8095_v37 = vpop.f32.mrb[141].mxu0 }
 0x655   :  { %v8096_v38 = vadd.f32 %v8095_v37, %v8094_v23  ;;  %v8097_v11 = vpop.f32.mrb[142].mxu0  ;;  %v7119_v15 = vsel %vm7087_vm14, %v7063_v59, %v7103_v52  ;;  %v7179_v51 = vpop.permute.xlu0 %7178 }
 0x656   :  { %v8098_v16 = vpop.f32.mrb[143].mxu0  ;;  %v7136_v29 = vpack.c.bf16 %v7119_v15, %v7118_v55  ;;  %v7330_v26 = vpop.permute.xlu1 %7329 }
 0x657   :  { %v7068_v42 = vadd.f32 %v8096_v38, %v6971_v0  ;;  %v8099_v46 = vadd.f32 %v8098_v16, %v8097_v11 }
 0x658   :  { %8350 = vmatprep.subr.bf16.mxu0 %v7136_v29 }
 0x659   :  { %v7104_v18 = vmul.f32 0.01, %v7068_v42  ;;  %v7071_v63 = vadd.f32 %v8099_v46, %v6974_v50  ;;  %8351 = vmatpush3.bf16.msra.mxu0 %v7136_v29  ;;  %vm7088_vm15 = vcmp.ge.f32.partialorder %v7068_v42, 0.0  ;;  %v7184_v47 = vpop.permute.xlu0 %7183 }
 0x65a   :  { %v7335_v38 = vpop.permute.xlu1 %7334 }
 0x65b   :  { %vm7089_vm1 = vcmp.ge.f32.partialorder %v7071_v63, 0.0  ;;  %v7105_v12 = vmul.f32 0.01, %v7071_v63  ;;  %v7120_v14 = vsel %vm7088_vm15, %v7068_v42, %v7104_v18 }
 0x65d   :  { %v7121_v56 = vsel %vm7089_vm1, %v7071_v63, %v7105_v12  ;;  %v7340_v18 = vpop.permute.xlu0 %7339 }
 0x65e   :  { %v7137_v28 = vpack.c.bf16 %v7121_v56, %v7120_v14  ;;  %v7345_v56 = vpop.permute.xlu1 %7344 }
 0x660   :  { %8352 = vmatprep.subr.bf16.mxu0 %v7137_v28 }
 0x661   :  { %8353 = vmatpush3.bf16.msra.mxu0 %v7137_v28 }
 0x664   :  { %8355 = vmatmul.mubr.bf16.vlgmr.msra.gmra.mrb[144].mxu0 %v9287_v31 }
 0x665   :  { %8358 = vmatprep.mubr.bf16.mxu0 %v9288_v19  ;;  %v7374_v19 = vlaneseq }
 0x66c   :  { %8359 = vmatmul.mubr.bf16.gmra.mrb[148].mxu0 %v9289_v45 }
 0x737   :  { %v8356_v24 = vpop.f32.mrb[144].mxu0 }
 0x738   :  { %v7253_v6 = vadd.f32 %v8356_v24, %v7159_v43  ;;  %v7244_v62 = vpop.f32.mrb[145].mxu0 }
 0x739   :  { %v7245_v1 = vadd.f32 %v7244_v62, %v7149_v27  ;;  %v8357_v8 = vpop.f32.mrb[146].mxu0 }
 0x73a   :  { %v7256_v20 = vadd.f32 %v8357_v8, %v7164_v21  ;;  %v7247_v54 = vpop.f32.mrb[147].mxu0  ;;  %v7285_v60 = vmul.f32 0.01, %v7253_v6  ;;  %vm7277_vm3 = vcmp.ge.f32.partialorder %v7253_v6, 0.0 }
 0x73b   :  { %vm7275_vm2 = vcmp.ge.f32.partialorder %v7245_v1, 0.0  ;;  %v7283_v4 = vmul.f32 0.01, %v7245_v1  ;;  %v7248_v17 = vadd.f32 %v7247_v54, %v7154_v7  ;;  %v7375_v7 = vshrl.u32 %v7374_v19, 7 }
 0x73c   :  { %v7286_v5 = vmul.f32 0.01, %v7256_v20  ;;  %vm7278_vm0 = vcmp.ge.f32.partialorder %v7256_v20, 0.0  ;;  %v7293_v32 = vsel %vm7277_vm3, %v7253_v6, %v7285_v60 }
 0x73d   :  { %v7291_v49 = vsel %vm7275_vm2, %v7245_v1, %v7283_v4  ;;  %vm7276_vm4 = vcmp.ge.f32.partialorder %v7248_v17, 0.0  ;;  %v7284_v34 = vmul.f32 0.01, %v7248_v17  ;;  %v7349_v53 = vmul.f32 %v7320_v39, %v7293_v32 }
 0x73e   :  { %v7347_v22 = vmul.f32 %v7310_v35, %v7291_v49  ;;  %v7294_v2 = vsel %vm7278_vm0, %v7256_v20, %v7286_v5  ;;  %v7376_v35 = vsub.s32 0, %v7375_v7 }
 0x73f   :  { %v7292_v58 = vsel %vm7276_vm4, %v7248_v17, %v7284_v34  ;;  %v8360_v36 = vpop.f32.mrb[148].mxu0  ;;  %v7350_v37 = vmul.f32 %v7325_v44, %v7294_v2 }
 0x740   :  { %v7348_v41 = vmul.f32 %v7315_v48, %v7292_v58  ;;  %v7269_v57 = vadd.f32 %v8360_v36, %v7179_v51  ;;  %v7260_v40 = vpop.f32.mrb[149].mxu0 }
 0x741   :  { %v7261_v9 = vadd.f32 %v7260_v40, %v7169_v3  ;;  %v8361_v30 = vpop.f32.mrb[150].mxu0  ;;  %v7372_v3 = vpop.permute.xlu0 %7371 }
 0x742   :  { %v7355_v61 = vadd.f32 %v7348_v41, %v7347_v22  ;;  %v7272_v10 = vadd.f32 %v8361_v30, %v7184_v47  ;;  %v7263_v59 = vpop.f32.mrb[151].mxu0  ;;  %v7289_v52 = vmul.f32 0.01, %v7269_v57  ;;  %vm7281_vm6 = vcmp.ge.f32.partialorder %v7269_v57, 0.0 }
 0x743   :  { %vm7279_vm5 = vcmp.ge.f32.partialorder %v7261_v9, 0.0  ;;  %v7287_v23 = vmul.f32 0.01, %v7261_v9  ;;  %v7264_v25 = vadd.f32 %v7263_v59, %v7174_v33  ;;  %v7377_v33 = vrot.slane %v7372_v3, %v7376_v35 }
 0x744   :  { %v7356_v0 = vadd.f32 %v7355_v61, %v7349_v53  ;;  %v7290_v55 = vmul.f32 0.01, %v7272_v10  ;;  %vm7282_vm8 = vcmp.ge.f32.partialorder %v7272_v10, 0.0  ;;  %v7297_v29 = vsel %vm7281_vm6, %v7269_v57, %v7289_v52 }
 0x745   :  { %v7295_v11 = vsel %vm7279_vm5, %v7261_v9, %v7287_v23  ;;  %vm7280_vm7 = vcmp.ge.f32.partialorder %v7264_v25, 0.0  ;;  %v7288_v15 = vmul.f32 0.01, %v7264_v25  ;;  %v7353_v12 = vmul.f32 %v7340_v18, %v7297_v29 }
 0x746   :  { %v7351_v13 = vmul.f32 %v7330_v26, %v7295_v11  ;;  %v7357_v16 = vadd.f32 %v7356_v0, %v7350_v37  ;;  %v7298_v63 = vsel %vm7282_vm8, %v7272_v10, %v7290_v55 }
 0x747   :  { %v7296_v50 = vsel %vm7280_vm7, %v7264_v25, %v7288_v15  ;;  %v7354_v28 = vmul.f32 %v7345_v56, %v7298_v63 }
 0x748   :  { %v7358_v42 = vadd.f32 %v7357_v16, %v7351_v13  ;;  %v7352_v46 = vmul.f32 %v7335_v38, %v7296_v50 }
 0x74a   :  { %v7359_v14 = vadd.f32 %v7358_v42, %v7352_v46 }
 0x74c   :  { %v7360_v31 = vadd.f32 %v7359_v14, %v7353_v12 }
 0x74e   :  { %v7361_v45 = vadd.f32 %v7360_v31, %v7354_v28 }
 0x750   :  { %v7362_v27 = vrot.slane %v7361_v45, 4 }
 0x752   :  { %v7363_v43 = vadd.f32 %v7362_v27, %v7361_v45 }
 0x754   :  { %v7364_v21 = vrot.slane %v7363_v43, 2 }
 0x756   :  { %v7365_v48 = vadd.f32 %v7364_v21, %v7363_v43 }
 0x758   :  { %v7366_v39 = vrot.slane %v7365_v48, 1 }
 0x75a   :  { %v7367_v24 = vadd.f32 %v7366_v39, %v7365_v48 }
 0x75c   :  { %v7378_v6 = vadd.f32 %v7377_v33, %v7367_v24 }
 0x75e   :  { %v7379_v62 = vsub.f32 0.0, %v7378_v6 }
 0x760   :  { %v7380_v44 = vmul.f32 1.442695, %v7379_v62 }
 0x762   :  { %9290 = vpow2.f32 %v7380_v44 }
 0x76c   :  { %v9291_v1 = vpop.eup %9290 }
 0x76d   :  { %v7382_v8 = vadd.f32 1.0, %v9291_v1 }
 0x76f   :  { %9292 = vrcp.f32 %v7382_v8 }
 0x779   :  { %v9293_v20 = vpop.eup %9292 }
 0x77a   :  { %7385 = vst [vmem:[%s12966_s11] sm:$0x1] %v9293_v20 }

</bundles_post_ra>
